<compile_context>
chip_gen: v7x
topology: tpu7x:2x2x1
jax: 0.10.0
libtpu: 0.0.40
codegen_flags: <defaults>
</compile_context>

<pallas_src>
import jax
import jax.numpy as jnp
from jax import lax
from jax.experimental import pallas as pl
from jax.experimental.pallas import tpu as pltpu

EPS = 1e-5


# ------------------------------ Pallas kernels ------------------------------ #

def _make_conv_bn_kernel(relu: bool, residual: bool):
    """Fused conv-as-GEMM + BatchNorm (batch stats) [+ residual] [+ ReLU].

    Refs:
      w_ref : (Cout, K)  bf16   (PyTorch weight reshaped, K zero-padded)
      a_ref : (K, M)     bf16   (im2col'd activation, transposed, K zero-padded)
      r_ref : (Cout, M)  f32    (optional residual, already BN'd)
      o_ref : (Cout, M)  f32
    """
    def kern(*refs):
        if residual:
            w_ref, a_ref, r_ref, o_ref = refs
        else:
            w_ref, a_ref, o_ref = refs
        # MXU: bf16 operands, f32 accumulation.
        acc = jnp.dot(w_ref[...], a_ref[...],
                      preferred_element_type=jnp.float32)        # (C, M) f32
        m = acc.shape[-1]
        inv_m = 1.0 / m
        mean = jnp.sum(acc, axis=-1, keepdims=True) * inv_m       # (C, 1)
        xc = acc - mean
        var = jnp.sum(xc * xc, axis=-1, keepdims=True) * inv_m    # centered, >= 0
        inv_std = lax.rsqrt(var + EPS)                            # EUP
        y = xc * inv_std                                          # gamma=1, beta=0
        if residual:
            y = y + r_ref[...]
        if relu:
            y = jnp.maximum(y, 0.0)
        o_ref[...] = y
    return kern


def conv_bn(wm, at, residual=None, *, relu):
    """wm: (C, K) bf16, at: (K, M) bf16, residual: (C, M) f32 or None -> (C, M) f32."""
    C, K = wm.shape
    M = at.shape[1]
    kernel = _make_conv_bn_kernel(relu, residual is not None)
    in_specs = [pl.BlockSpec((C, K), lambda i: (0, 0)),
                pl.BlockSpec((K, M), lambda i: (0, 0))]
    args = [wm, at]
    if residual is not None:
        in_specs.append(pl.BlockSpec((C, M), lambda i: (0, 0)))
        args.append(residual)
    return pl.pallas_call(
        kernel,
        out_shape=jax.ShapeDtypeStruct((C, M), jnp.float32),
        grid=(1,),
        in_specs=in_specs,
        out_specs=pl.BlockSpec((C, M), lambda i: (0, 0)),
        compiler_params=pltpu.CompilerParams(
            dimension_semantics=("arbitrary",)),
    )(*args)


def _max_kernel(p_ref, o_ref):
    o_ref[...] = jnp.max(p_ref[...], axis=0)


def maxpool_reduce(patches):
    # patches: (k^3, C, M) f32 -> (C, M) f32   (M lane-dense)
    P, C, M = patches.shape
    return pl.pallas_call(
        _max_kernel,
        out_shape=jax.ShapeDtypeStruct((C, M), jnp.float32),
        grid=(1,),
        in_specs=[pl.BlockSpec((P, C, M), lambda i: (0, 0, 0))],
        out_specs=pl.BlockSpec((C, M), lambda i: (0, 0)),
        compiler_params=pltpu.CompilerParams(
            dimension_semantics=("arbitrary",)),
    )(patches)


# --------------------------------- JAX glue --------------------------------- #

def _out_size(s, k, stride, pad):
    return (s + 2 * pad - k) // stride + 1


def _round_up(x, m):
    return (x + m - 1) // m * m


def im2col_T(x, k, stride, pad):
    """x: (C, N, D, H, W) f32 -> A^T (K_pad, M) bf16, plus output spatial shape.

    K ordering is (Cin, kd, kh, kw), matching weight.reshape(Cout, -1)."""
    C, N, D, H, W = x.shape
    xb = x.astype(jnp.bfloat16)          # halves the duplicated im2col traffic
    xp = jnp.pad(xb, ((0, 0), (0, 0), (pad, pad), (pad, pad), (pad, pad)))
    oD = _out_size(D, k, stride, pad)
    oH = _out_size(H, k, stride, pad)
    oW = _out_size(W, k, stride, pad)
    cols = []
    for a in range(k):
        for b in range(k):
            for c in range(k):
                cols.append(xp[:, :, a:a + stride * oD:stride,
                               b:b + stride * oH:stride,
                               c:c + stride * oW:stride])
    pat = jnp.stack(cols, axis=1)        # (C, k^3, N, oD, oH, oW)
    K = C * k * k * k
    M = N * oD * oH * oW
    at = pat.reshape(K, M)
    K_pad = _round_up(K, 128)
    if K_pad != K:
        at = jnp.pad(at, ((0, K_pad - K), (0, 0)))
    return at, (N, oD, oH, oW)


def prep_weight(w):
    """w: (Cout, Cin, k, k, k) f32 (PyTorch layout) -> (Cout, K_pad) bf16."""
    Cout = w.shape[0]
    K = w.shape[1] * w.shape[2] * w.shape[3] * w.shape[4]
    wm = w.reshape(Cout, K).astype(jnp.bfloat16)
    K_pad = _round_up(K, 128)
    if K_pad != K:
        wm = jnp.pad(wm, ((0, 0), (0, K_pad - K)))
    return wm


def conv3d_bn(x, w, *, stride, pad, relu, residual=None):
    """x: (C, N, D, H, W) f32 -> (Cout, N, oD, oH, oW) f32 (fused conv+BN[+res][+ReLU])."""
    at, (N, oD, oH, oW) = im2col_T(x, w.shape[-1], stride, pad)
    wm = prep_weight(w)
    out = conv_bn(wm, at, residual, relu=relu)
    return out.reshape(w.shape[0], N, oD, oH, oW)


def maxpool3d(x, k=3, stride=2, pad=1):
    """x: (C, N, D, H, W) f32 channel-first maxpool."""
    C, N, D, H, W = x.shape
    xp = jnp.pad(x, ((0, 0), (0, 0), (pad, pad), (pad, pad), (pad, pad)),
                 constant_values=-jnp.inf)
    oD = _out_size(D, k, stride, pad)
    oH = _out_size(H, k, stride, pad)
    oW = _out_size(W, k, stride, pad)
    cols = []
    for a in range(k):
        for b in range(k):
            for c in range(k):
                cols.append(xp[:, :, a:a + stride * oD:stride,
                               b:b + stride * oH:stride,
                               c:c + stride * oW:stride])
    patches = jnp.stack(cols, axis=0).reshape(k * k * k, C, N * oD * oH * oW)
    out = maxpool_reduce(patches)
    return out.reshape(C, N, oD, oH, oW)


def basic_block(x, p, stride):
    """x: (C, N, D, H, W) channel-first f32."""
    # conv1 + bn1 + relu (one kernel)
    out = conv3d_bn(x, p['conv1_w'], stride=stride, pad=1, relu=True)

    # identity path (optionally 1x1 conv + bn, fused in one kernel)
    if 'down_w' in p:
        identity5 = conv3d_bn(x, p['down_w'], stride=stride, pad=0, relu=False)
    else:
        identity5 = x
    Cout = p['conv2_w'].shape[0]
    identity = identity5.reshape(Cout, -1)

    # conv2 + bn2 + residual add + relu (one kernel)
    at, (N, oD, oH, oW) = im2col_T(out, 3, 1, 1)
    wm = prep_weight(p['conv2_w'])
    out2 = conv_bn(wm, at, identity, relu=True)
    return out2.reshape(Cout, N, oD, oH, oW)


def resnet2_forward(params, x_ncdhw):
    # PyTorch NCDHW input -> internal channel-first (C, N, D, H, W).
    x = jnp.transpose(x_ncdhw, (1, 0, 2, 3, 4)).astype(jnp.float32)

    # stem: conv7x7x7 s2 p3 + BN + ReLU (one fused kernel), then maxpool k3 s2 p1.
    x = conv3d_bn(x, params['conv1'], stride=2, pad=3, relu=True)
    x = maxpool3d(x)

    x = basic_block(x, params['l1'], stride=1)
    x = basic_block(x, params['l2'], stride=2)
    x = basic_block(x, params['l3'], stride=2)
    x = basic_block(x, params['l4'], stride=1)

    # AdaptiveAvgPool3d(1) + flatten + FC.  (2,32)x(32,10): plain jnp, a Pallas
    # call here would be pure launch overhead (perf review item).
    C, N = x.shape[0], x.shape[1]
    feat = jnp.mean(x.reshape(C, N, -1), axis=-1).T            # (N, C)
    return jnp.dot(feat, params['fc_w'].T,
                   preferred_element_type=jnp.float32) + params['fc_b']


# ------------------------------ parameter init ------------------------------ #

def _kaiming_conv(key, cout, cin, k):
    fan_out = cout * k * k * k
    std = (2.0 / fan_out) ** 0.5
    return std * jax.random.normal(key, (cout, cin, k, k, k), jnp.float32)


def init_params(key, num_classes=10, input_channel=1):
    ks = jax.random.split(key, 16)
    p = {'conv1': _kaiming_conv(ks[0], 32, input_channel, 7)}
    p['l1'] = {'conv1_w': _kaiming_conv(ks[1], 32, 32, 3),
               'conv2_w': _kaiming_conv(ks[2], 32, 32, 3)}
    p['l2'] = {'conv1_w': _kaiming_conv(ks[3], 32, 32, 3),
               'conv2_w': _kaiming_conv(ks[4], 32, 32, 3),
               'down_w': _kaiming_conv(ks[5], 32, 32, 1)}
    p['l3'] = {'conv1_w': _kaiming_conv(ks[6], 32, 32, 3),
               'conv2_w': _kaiming_conv(ks[7], 32, 32, 3),
               'down_w': _kaiming_conv(ks[8], 32, 32, 1)}
    p['l4'] = {'conv1_w': _kaiming_conv(ks[9], 32, 32, 3),
               'conv2_w': _kaiming_conv(ks[10], 32, 32, 3)}
    bound = 1.0 / (32.0 ** 0.5)
    p['fc_w'] = jax.random.uniform(ks[11], (10 if num_classes == 10 else num_classes, 32),
                                   jnp.float32, minval=-bound, maxval=bound)
    p['fc_b'] = jax.random.uniform(ks[12], (num_classes,), jnp.float32,
                                   minval=-bound, maxval=bound)
    return p


# ----------------------------------- main ----------------------------------- #

if __name__ == "__main__":
    key = jax.random.PRNGKey(0)
    k_param, k_in = jax.random.split(key)

    # ResNet_2(BasicBlock, [1, 1, 1, 1], num_classes=10, dims=3, input_channel=1)
    params = init_params(k_param, num_classes=10, input_channel=1)

    # Small 3-D input, NCDHW like PyTorch: (batch=2, C=1, D=H=W=16)
    x = jax.random.normal(k_in, (2, 1, 16, 16, 16), jnp.float32)

    fwd = jax.jit(resnet2_forward)
    logits = fwd(params, x)
    jax.block_until_ready(logits)
    assert logits.shape == (2, 10) and logits.dtype == jnp.float32
    print("KERNEL_OK")
</pallas_src>

<mosaic_0001>
module attributes {stable_mosaic.version = 11 : i64} {
  func.func @kern(%arg0: i32, %arg1: memref<32x384xbf16, #tpu.memory_space<vmem>>, %arg2: memref<384x1024xbf16, #tpu.memory_space<vmem>>, %arg3: memref<32x1024xf32, #tpu.memory_space<vmem>>) attributes {dimension_semantics = [#tpu.dimension_semantics<arbitrary>], iteration_bounds = array<i64: 1>, scalar_prefetch = 0 : i64, scratch_operands = 0 : i64, tpu.core_type = #tpu.core_type<tc>, window_params = [{pipeline_mode = #tpu.pipeline_mode<synchronous>, transform_indices = @transform_0, window_bounds = array<i64: 32, 384>}, {pipeline_mode = #tpu.pipeline_mode<synchronous>, transform_indices = @transform_1, window_bounds = array<i64: 384, 1024>}, {pipeline_mode = #tpu.pipeline_mode<synchronous>, transform_indices = @transform_2, window_bounds = array<i64: 32, 1024>}]} {
    %c0 = arith.constant 0 : index
    %c0_0 = arith.constant 0 : index
    %0 = vector.load %arg1[%c0, %c0_0] : memref<32x384xbf16, #tpu.memory_space<vmem>>, vector<32x384xbf16>
    %c0_1 = arith.constant 0 : index
    %c0_2 = arith.constant 0 : index
    %1 = vector.load %arg2[%c0_1, %c0_2] : memref<384x1024xbf16, #tpu.memory_space<vmem>>, vector<384x1024xbf16>
    %cst = arith.constant dense<0.000000e+00> : vector<32x1024xf32>
    %2 = tpu.matmul %0, %1, %cst {dimension_numbers = #tpu.dot_dimension_numbers<[1], [0], [0], [1], [0, 0, 1, 1], [], []>} : vector<32x384xbf16>, vector<384x1024xbf16>, vector<32x1024xf32> -> vector<32x1024xf32>
    %cst_3 = arith.constant dense<0.000000e+00> : vector<32xf32>
    %3 = vector.multi_reduction <add>, %2, %cst_3 [1] : vector<32x1024xf32> to vector<32xf32>
    %4 = vector.shape_cast %3 : vector<32xf32> to vector<32x1xf32>
    %cst_4 = arith.constant 9.765625E-4 : f32
    %5 = vector.broadcast %cst_4 : f32 to vector<32x1xf32>
    %6 = arith.mulf %4, %5 : vector<32x1xf32>
    %7 = vector.broadcast %6 : vector<32x1xf32> to vector<32x1024xf32>
    %8 = arith.subf %2, %7 : vector<32x1024xf32>
    %9 = arith.mulf %8, %8 : vector<32x1024xf32>
    %cst_5 = arith.constant dense<0.000000e+00> : vector<32xf32>
    %10 = vector.multi_reduction <add>, %9, %cst_5 [1] : vector<32x1024xf32> to vector<32xf32>
    %11 = vector.shape_cast %10 : vector<32xf32> to vector<32x1xf32>
    %cst_6 = arith.constant 9.765625E-4 : f32
    %12 = vector.broadcast %cst_6 : f32 to vector<32x1xf32>
    %13 = arith.mulf %11, %12 : vector<32x1xf32>
    %cst_7 = arith.constant 9.99999974E-6 : f32
    %14 = vector.broadcast %cst_7 : f32 to vector<32x1xf32>
    %15 = arith.addf %13, %14 : vector<32x1xf32>
    %16 = math.rsqrt %15 : vector<32x1xf32>
    %17 = vector.broadcast %16 : vector<32x1xf32> to vector<32x1024xf32>
    %18 = arith.mulf %8, %17 : vector<32x1024xf32>
    %cst_8 = arith.constant 0.000000e+00 : f32
    %19 = vector.broadcast %cst_8 : f32 to vector<32x1024xf32>
    %20 = arith.maximumf %18, %19 : vector<32x1024xf32>
    %c0_9 = arith.constant 0 : index
    %c0_10 = arith.constant 0 : index
    %21 = vector.load %arg3[%c0_9, %c0_10] : memref<32x1024xf32, #tpu.memory_space<vmem>>, vector<32x1024xf32>
    tpu.vector_store %arg3[%c0_9, %c0_10], %20 {strides = array<i32>} : memref<32x1024xf32, #tpu.memory_space<vmem>>, vector<32x1024xf32>,
    return
  }
  func.func @transform_0(%arg0: i32) -> (i32, i32) {
    %c0_i32 = arith.constant 0 : i32
    %c0_i32_0 = arith.constant 0 : i32
    %c0_i32_1 = arith.constant 0 : i32
    return %c0_i32, %c0_i32_0 : i32, i32
  }
  func.func @transform_1(%arg0: i32) -> (i32, i32) {
    %c0_i32 = arith.constant 0 : i32
    %c0_i32_0 = arith.constant 0 : i32
    %c0_i32_1 = arith.constant 0 : i32
    return %c0_i32, %c0_i32_0 : i32, i32
  }
  func.func @transform_2(%arg0: i32) -> (i32, i32) {
    %c0_i32 = arith.constant 0 : i32
    %c0_i32_0 = arith.constant 0 : i32
    %c0_i32_1 = arith.constant 0 : i32
    return %c0_i32, %c0_i32_0 : i32, i32
  }
}

module attributes {stable_mosaic.version = 11 : i64} {
  func.func @_max_kernel(%arg0: i32, %arg1: memref<27x32x128xf32, #tpu.memory_space<vmem>>, %arg2: memref<32x128xf32, #tpu.memory_space<vmem>>) attributes {dimension_semantics = [#tpu.dimension_semantics<arbitrary>], iteration_bounds = array<i64: 1>, scalar_prefetch = 0 : i64, scratch_operands = 0 : i64, tpu.core_type = #tpu.core_type<tc>, window_params = [{pipeline_mode = #tpu.pipeline_mode<synchronous>, transform_indices = @transform_0, window_bounds = array<i64: 27, 32, 128>}, {pipeline_mode = #tpu.pipeline_mode<synchronous>, transform_indices = @transform_1, window_bounds = array<i64: 32, 128>}]} {
    %c0 = arith.constant 0 : index
    %c0_0 = arith.constant 0 : index
    %c0_1 = arith.constant 0 : index
    %0 = vector.load %arg1[%c0, %c0_0, %c0_1] : memref<27x32x128xf32, #tpu.memory_space<vmem>>, vector<27x32x128xf32>
    %cst = arith.constant dense<0xFF800000> : vector<32x128xf32>
    %1 = vector.multi_reduction <maximumf>, %0, %cst [0] : vector<27x32x128xf32> to vector<32x128xf32>
    %c0_2 = arith.constant 0 : index
    %c0_3 = arith.constant 0 : index
    %2 = vector.load %arg2[%c0_2, %c0_3] : memref<32x128xf32, #tpu.memory_space<vmem>>, vector<32x128xf32>
    tpu.vector_store %arg2[%c0_2, %c0_3], %1 {strides = array<i32>} : memref<32x128xf32, #tpu.memory_space<vmem>>, vector<32x128xf32>,
    return
  }
  func.func @transform_0(%arg0: i32) -> (i32, i32, i32) {
    %c0_i32 = arith.constant 0 : i32
    %c0_i32_0 = arith.constant 0 : i32
    %c0_i32_1 = arith.constant 0 : i32
    %c0_i32_2 = arith.constant 0 : i32
    return %c0_i32, %c0_i32_0, %c0_i32_1 : i32, i32, i32
  }
  func.func @transform_1(%arg0: i32) -> (i32, i32) {
    %c0_i32 = arith.constant 0 : i32
    %c0_i32_0 = arith.constant 0 : i32
    %c0_i32_1 = arith.constant 0 : i32
    return %c0_i32, %c0_i32_0 : i32, i32
  }
}

module attributes {stable_mosaic.version = 11 : i64} {
  func.func @kern(%arg0: i32, %arg1: memref<32x896xbf16, #tpu.memory_space<vmem>>, %arg2: memref<896x128xbf16, #tpu.memory_space<vmem>>, %arg3: memref<32x128xf32, #tpu.memory_space<vmem>>) attributes {dimension_semantics = [#tpu.dimension_semantics<arbitrary>], iteration_bounds = array<i64: 1>, scalar_prefetch = 0 : i64, scratch_operands = 0 : i64, tpu.core_type = #tpu.core_type<tc>, window_params = [{pipeline_mode = #tpu.pipeline_mode<synchronous>, transform_indices = @transform_0, window_bounds = array<i64: 32, 896>}, {pipeline_mode = #tpu.pipeline_mode<synchronous>, transform_indices = @transform_1, window_bounds = array<i64: 896, 128>}, {pipeline_mode = #tpu.pipeline_mode<synchronous>, transform_indices = @transform_2, window_bounds = array<i64: 32, 128>}]} {
    %c0 = arith.constant 0 : index
    %c0_0 = arith.constant 0 : index
    %0 = vector.load %arg1[%c0, %c0_0] : memref<32x896xbf16, #tpu.memory_space<vmem>>, vector<32x896xbf16>
    %c0_1 = arith.constant 0 : index
    %c0_2 = arith.constant 0 : index
    %1 = vector.load %arg2[%c0_1, %c0_2] : memref<896x128xbf16, #tpu.memory_space<vmem>>, vector<896x128xbf16>
    %cst = arith.constant dense<0.000000e+00> : vector<32x128xf32>
    %2 = tpu.matmul %0, %1, %cst {dimension_numbers = #tpu.dot_dimension_numbers<[1], [0], [0], [1], [0, 0, 1, 1], [], []>} : vector<32x896xbf16>, vector<896x128xbf16>, vector<32x128xf32> -> vector<32x128xf32>
    %cst_3 = arith.constant dense<0.000000e+00> : vector<32xf32>
    %3 = vector.multi_reduction <add>, %2, %cst_3 [1] : vector<32x128xf32> to vector<32xf32>
    %4 = vector.shape_cast %3 : vector<32xf32> to vector<32x1xf32>
    %cst_4 = arith.constant 7.812500e-03 : f32
    %5 = vector.broadcast %cst_4 : f32 to vector<32x1xf32>
    %6 = arith.mulf %4, %5 : vector<32x1xf32>
    %7 = vector.broadcast %6 : vector<32x1xf32> to vector<32x128xf32>
    %8 = arith.subf %2, %7 : vector<32x128xf32>
    %9 = arith.mulf %8, %8 : vector<32x128xf32>
    %cst_5 = arith.constant dense<0.000000e+00> : vector<32xf32>
    %10 = vector.multi_reduction <add>, %9, %cst_5 [1] : vector<32x128xf32> to vector<32xf32>
    %11 = vector.shape_cast %10 : vector<32xf32> to vector<32x1xf32>
    %cst_6 = arith.constant 7.812500e-03 : f32
    %12 = vector.broadcast %cst_6 : f32 to vector<32x1xf32>
    %13 = arith.mulf %11, %12 : vector<32x1xf32>
    %cst_7 = arith.constant 9.99999974E-6 : f32
    %14 = vector.broadcast %cst_7 : f32 to vector<32x1xf32>
    %15 = arith.addf %13, %14 : vector<32x1xf32>
    %16 = math.rsqrt %15 : vector<32x1xf32>
    %17 = vector.broadcast %16 : vector<32x1xf32> to vector<32x128xf32>
    %18 = arith.mulf %8, %17 : vector<32x128xf32>
    %cst_8 = arith.constant 0.000000e+00 : f32
    %19 = vector.broadcast %cst_8 : f32 to vector<32x128xf32>
    %20 = arith.maximumf %18, %19 : vector<32x128xf32>
    %c0_9 = arith.constant 0 : index
    %c0_10 = arith.constant 0 : index
    %21 = vector.load %arg3[%c0_9, %c0_10] : memref<32x128xf32, #tpu.memory_space<vmem>>, vector<32x128xf32>
    tpu.vector_store %arg3[%c0_9, %c0_10], %20 {strides = array<i32>} : memref<32x128xf32, #tpu.memory_space<vmem>>, vector<32x128xf32>,
    return
  }
  func.func @transform_0(%arg0: i32) -> (i32, i32) {
    %c0_i32 = arith.constant 0 : i32
    %c0_i32_0 = arith.constant 0 : i32
    %c0_i32_1 = arith.constant 0 : i32
    return %c0_i32, %c0_i32_0 : i32, i32
  }
  func.func @transform_1(%arg0: i32) -> (i32, i32) {
    %c0_i32 = arith.constant 0 : i32
    %c0_i32_0 = arith.constant 0 : i32
    %c0_i32_1 = arith.constant 0 : i32
    return %c0_i32, %c0_i32_0 : i32, i32
  }
  func.func @transform_2(%arg0: i32) -> (i32, i32) {
    %c0_i32 = arith.constant 0 : i32
    %c0_i32_0 = arith.constant 0 : i32
    %c0_i32_1 = arith.constant 0 : i32
    return %c0_i32, %c0_i32_0 : i32, i32
  }
}

module attributes {stable_mosaic.version = 11 : i64} {
  func.func @kern(%arg0: i32, %arg1: memref<32x896xbf16, #tpu.memory_space<vmem>>, %arg2: memref<896x128xbf16, #tpu.memory_space<vmem>>, %arg3: memref<32x128xf32, #tpu.memory_space<vmem>>, %arg4: memref<32x128xf32, #tpu.memory_space<vmem>>) attributes {dimension_semantics = [#tpu.dimension_semantics<arbitrary>], iteration_bounds = array<i64: 1>, scalar_prefetch = 0 : i64, scratch_operands = 0 : i64, tpu.core_type = #tpu.core_type<tc>, window_params = [{pipeline_mode = #tpu.pipeline_mode<synchronous>, transform_indices = @transform_0, window_bounds = array<i64: 32, 896>}, {pipeline_mode = #tpu.pipeline_mode<synchronous>, transform_indices = @transform_1, window_bounds = array<i64: 896, 128>}, {pipeline_mode = #tpu.pipeline_mode<synchronous>, transform_indices = @transform_2, window_bounds = array<i64: 32, 128>}, {pipeline_mode = #tpu.pipeline_mode<synchronous>, transform_indices = @transform_3, window_bounds = array<i64: 32, 128>}]} {
    %c0 = arith.constant 0 : index
    %c0_0 = arith.constant 0 : index
    %0 = vector.load %arg1[%c0, %c0_0] : memref<32x896xbf16, #tpu.memory_space<vmem>>, vector<32x896xbf16>
    %c0_1 = arith.constant 0 : index
    %c0_2 = arith.constant 0 : index
    %1 = vector.load %arg2[%c0_1, %c0_2] : memref<896x128xbf16, #tpu.memory_space<vmem>>, vector<896x128xbf16>
    %cst = arith.constant dense<0.000000e+00> : vector<32x128xf32>
    %2 = tpu.matmul %0, %1, %cst {dimension_numbers = #tpu.dot_dimension_numbers<[1], [0], [0], [1], [0, 0, 1, 1], [], []>} : vector<32x896xbf16>, vector<896x128xbf16>, vector<32x128xf32> -> vector<32x128xf32>
    %cst_3 = arith.constant dense<0.000000e+00> : vector<32xf32>
    %3 = vector.multi_reduction <add>, %2, %cst_3 [1] : vector<32x128xf32> to vector<32xf32>
    %4 = vector.shape_cast %3 : vector<32xf32> to vector<32x1xf32>
    %cst_4 = arith.constant 7.812500e-03 : f32
    %5 = vector.broadcast %cst_4 : f32 to vector<32x1xf32>
    %6 = arith.mulf %4, %5 : vector<32x1xf32>
    %7 = vector.broadcast %6 : vector<32x1xf32> to vector<32x128xf32>
    %8 = arith.subf %2, %7 : vector<32x128xf32>
    %9 = arith.mulf %8, %8 : vector<32x128xf32>
    %cst_5 = arith.constant dense<0.000000e+00> : vector<32xf32>
    %10 = vector.multi_reduction <add>, %9, %cst_5 [1] : vector<32x128xf32> to vector<32xf32>
    %11 = vector.shape_cast %10 : vector<32xf32> to vector<32x1xf32>
    %cst_6 = arith.constant 7.812500e-03 : f32
    %12 = vector.broadcast %cst_6 : f32 to vector<32x1xf32>
    %13 = arith.mulf %11, %12 : vector<32x1xf32>
    %cst_7 = arith.constant 9.99999974E-6 : f32
    %14 = vector.broadcast %cst_7 : f32 to vector<32x1xf32>
    %15 = arith.addf %13, %14 : vector<32x1xf32>
    %16 = math.rsqrt %15 : vector<32x1xf32>
    %17 = vector.broadcast %16 : vector<32x1xf32> to vector<32x128xf32>
    %18 = arith.mulf %8, %17 : vector<32x128xf32>
    %c0_8 = arith.constant 0 : index
    %c0_9 = arith.constant 0 : index
    %19 = vector.load %arg3[%c0_8, %c0_9] : memref<32x128xf32, #tpu.memory_space<vmem>>, vector<32x128xf32>
    %20 = arith.addf %18, %19 : vector<32x128xf32>
    %cst_10 = arith.constant 0.000000e+00 : f32
    %21 = vector.broadcast %cst_10 : f32 to vector<32x128xf32>
    %22 = arith.maximumf %20, %21 : vector<32x128xf32>
    %c0_11 = arith.constant 0 : index
    %c0_12 = arith.constant 0 : index
    %23 = vector.load %arg4[%c0_11, %c0_12] : memref<32x128xf32, #tpu.memory_space<vmem>>, vector<32x128xf32>
    tpu.vector_store %arg4[%c0_11, %c0_12], %22 {strides = array<i32>} : memref<32x128xf32, #tpu.memory_space<vmem>>, vector<32x128xf32>,
    return
  }
  func.func @transform_0(%arg0: i32) -> (i32, i32) {
    %c0_i32 = arith.constant 0 : i32
    %c0_i32_0 = arith.constant 0 : i32
    %c0_i32_1 = arith.constant 0 : i32
    return %c0_i32, %c0_i32_0 : i32, i32
  }
  func.func @transform_1(%arg0: i32) -> (i32, i32) {
    %c0_i32 = arith.constant 0 : i32
    %c0_i32_0 = arith.constant 0 : i32
    %c0_i32_1 = arith.constant 0 : i32
    return %c0_i32, %c0_i32_0 : i32, i32
  }
  func.func @transform_2(%arg0: i32) -> (i32, i32) {
    %c0_i32 = arith.constant 0 : i32
    %c0_i32_0 = arith.constant 0 : i32
    %c0_i32_1 = arith.constant 0 : i32
    return %c0_i32, %c0_i32_0 : i32, i32
  }
  func.func @transform_3(%arg0: i32) -> (i32, i32) {
    %c0_i32 = arith.constant 0 : i32
    %c0_i32_0 = arith.constant 0 : i32
    %c0_i32_1 = arith.constant 0 : i32
    return %c0_i32, %c0_i32_0 : i32, i32
  }
}

module attributes {stable_mosaic.version = 11 : i64} {
  func.func @kern(%arg0: i32, %arg1: memref<32x896xbf16, #tpu.memory_space<vmem>>, %arg2: memref<896x16xbf16, #tpu.memory_space<vmem>>, %arg3: memref<32x16xf32, #tpu.memory_space<vmem>>) attributes {dimension_semantics = [#tpu.dimension_semantics<arbitrary>], iteration_bounds = array<i64: 1>, scalar_prefetch = 0 : i64, scratch_operands = 0 : i64, tpu.core_type = #tpu.core_type<tc>, window_params = [{pipeline_mode = #tpu.pipeline_mode<synchronous>, transform_indices = @transform_0, window_bounds = array<i64: 32, 896>}, {pipeline_mode = #tpu.pipeline_mode<synchronous>, transform_indices = @transform_1, window_bounds = array<i64: 896, 16>}, {pipeline_mode = #tpu.pipeline_mode<synchronous>, transform_indices = @transform_2, window_bounds = array<i64: 32, 16>}]} {
    %c0 = arith.constant 0 : index
    %c0_0 = arith.constant 0 : index
    %0 = vector.load %arg1[%c0, %c0_0] : memref<32x896xbf16, #tpu.memory_space<vmem>>, vector<32x896xbf16>
    %c0_1 = arith.constant 0 : index
    %c0_2 = arith.constant 0 : index
    %1 = vector.load %arg2[%c0_1, %c0_2] : memref<896x16xbf16, #tpu.memory_space<vmem>>, vector<896x16xbf16>
    %cst = arith.constant dense<0.000000e+00> : vector<32x16xf32>
    %2 = tpu.matmul %0, %1, %cst {dimension_numbers = #tpu.dot_dimension_numbers<[1], [0], [0], [1], [0, 0, 1, 1], [], []>} : vector<32x896xbf16>, vector<896x16xbf16>, vector<32x16xf32> -> vector<32x16xf32>
    %cst_3 = arith.constant dense<0.000000e+00> : vector<32xf32>
    %3 = vector.multi_reduction <add>, %2, %cst_3 [1] : vector<32x16xf32> to vector<32xf32>
    %4 = vector.shape_cast %3 : vector<32xf32> to vector<32x1xf32>
    %cst_4 = arith.constant 6.250000e-02 : f32
    %5 = vector.broadcast %cst_4 : f32 to vector<32x1xf32>
    %6 = arith.mulf %4, %5 : vector<32x1xf32>
    %7 = vector.broadcast %6 : vector<32x1xf32> to vector<32x16xf32>
    %8 = arith.subf %2, %7 : vector<32x16xf32>
    %9 = arith.mulf %8, %8 : vector<32x16xf32>
    %cst_5 = arith.constant dense<0.000000e+00> : vector<32xf32>
    %10 = vector.multi_reduction <add>, %9, %cst_5 [1] : vector<32x16xf32> to vector<32xf32>
    %11 = vector.shape_cast %10 : vector<32xf32> to vector<32x1xf32>
    %cst_6 = arith.constant 6.250000e-02 : f32
    %12 = vector.broadcast %cst_6 : f32 to vector<32x1xf32>
    %13 = arith.mulf %11, %12 : vector<32x1xf32>
    %cst_7 = arith.constant 9.99999974E-6 : f32
    %14 = vector.broadcast %cst_7 : f32 to vector<32x1xf32>
    %15 = arith.addf %13, %14 : vector<32x1xf32>
    %16 = math.rsqrt %15 : vector<32x1xf32>
    %17 = vector.broadcast %16 : vector<32x1xf32> to vector<32x16xf32>
    %18 = arith.mulf %8, %17 : vector<32x16xf32>
    %cst_8 = arith.constant 0.000000e+00 : f32
    %19 = vector.broadcast %cst_8 : f32 to vector<32x16xf32>
    %20 = arith.maximumf %18, %19 : vector<32x16xf32>
    %c0_9 = arith.constant 0 : index
    %c0_10 = arith.constant 0 : index
    %21 = vector.load %arg3[%c0_9, %c0_10] : memref<32x16xf32, #tpu.memory_space<vmem>>, vector<32x16xf32>
    tpu.vector_store %arg3[%c0_9, %c0_10], %20 {strides = array<i32>} : memref<32x16xf32, #tpu.memory_space<vmem>>, vector<32x16xf32>,
    return
  }
  func.func @transform_0(%arg0: i32) -> (i32, i32) {
    %c0_i32 = arith.constant 0 : i32
    %c0_i32_0 = arith.constant 0 : i32
    %c0_i32_1 = arith.constant 0 : i32
    return %c0_i32, %c0_i32_0 : i32, i32
  }
  func.func @transform_1(%arg0: i32) -> (i32, i32) {
    %c0_i32 = arith.constant 0 : i32
    %c0_i32_0 = arith.constant 0 : i32
    %c0_i32_1 = arith.constant 0 : i32
    return %c0_i32, %c0_i32_0 : i32, i32
  }
  func.func @transform_2(%arg0: i32) -> (i32, i32) {
    %c0_i32 = arith.constant 0 : i32
    %c0_i32_0 = arith.constant 0 : i32
    %c0_i32_1 = arith.constant 0 : i32
    return %c0_i32, %c0_i32_0 : i32, i32
  }
}

module attributes {stable_mosaic.version = 11 : i64} {
  func.func @kern(%arg0: i32, %arg1: memref<32x128xbf16, #tpu.memory_space<vmem>>, %arg2: memref<128x16xbf16, #tpu.memory_space<vmem>>, %arg3: memref<32x16xf32, #tpu.memory_space<vmem>>) attributes {dimension_semantics = [#tpu.dimension_semantics<arbitrary>], iteration_bounds = array<i64: 1>, scalar_prefetch = 0 : i64, scratch_operands = 0 : i64, tpu.core_type = #tpu.core_type<tc>, window_params = [{pipeline_mode = #tpu.pipeline_mode<synchronous>, transform_indices = @transform_0, window_bounds = array<i64: 32, 128>}, {pipeline_mode = #tpu.pipeline_mode<synchronous>, transform_indices = @transform_1, window_bounds = array<i64: 128, 16>}, {pipeline_mode = #tpu.pipeline_mode<synchronous>, transform_indices = @transform_2, window_bounds = array<i64: 32, 16>}]} {
    %c0 = arith.constant 0 : index
    %c0_0 = arith.constant 0 : index
    %0 = vector.load %arg1[%c0, %c0_0] : memref<32x128xbf16, #tpu.memory_space<vmem>>, vector<32x128xbf16>
    %c0_1 = arith.constant 0 : index
    %c0_2 = arith.constant 0 : index
    %1 = vector.load %arg2[%c0_1, %c0_2] : memref<128x16xbf16, #tpu.memory_space<vmem>>, vector<128x16xbf16>
    %cst = arith.constant dense<0.000000e+00> : vector<32x16xf32>
    %2 = tpu.matmul %0, %1, %cst {dimension_numbers = #tpu.dot_dimension_numbers<[1], [0], [0], [1], [0, 0, 1, 1], [], []>} : vector<32x128xbf16>, vector<128x16xbf16>, vector<32x16xf32> -> vector<32x16xf32>
    %cst_3 = arith.constant dense<0.000000e+00> : vector<32xf32>
    %3 = vector.multi_reduction <add>, %2, %cst_3 [1] : vector<32x16xf32> to vector<32xf32>
    %4 = vector.shape_cast %3 : vector<32xf32> to vector<32x1xf32>
    %cst_4 = arith.constant 6.250000e-02 : f32
    %5 = vector.broadcast %cst_4 : f32 to vector<32x1xf32>
    %6 = arith.mulf %4, %5 : vector<32x1xf32>
    %7 = vector.broadcast %6 : vector<32x1xf32> to vector<32x16xf32>
    %8 = arith.subf %2, %7 : vector<32x16xf32>
    %9 = arith.mulf %8, %8 : vector<32x16xf32>
    %cst_5 = arith.constant dense<0.000000e+00> : vector<32xf32>
    %10 = vector.multi_reduction <add>, %9, %cst_5 [1] : vector<32x16xf32> to vector<32xf32>
    %11 = vector.shape_cast %10 : vector<32xf32> to vector<32x1xf32>
    %cst_6 = arith.constant 6.250000e-02 : f32
    %12 = vector.broadcast %cst_6 : f32 to vector<32x1xf32>
    %13 = arith.mulf %11, %12 : vector<32x1xf32>
    %cst_7 = arith.constant 9.99999974E-6 : f32
    %14 = vector.broadcast %cst_7 : f32 to vector<32x1xf32>
    %15 = arith.addf %13, %14 : vector<32x1xf32>
    %16 = math.rsqrt %15 : vector<32x1xf32>
    %17 = vector.broadcast %16 : vector<32x1xf32> to vector<32x16xf32>
    %18 = arith.mulf %8, %17 : vector<32x16xf32>
    %c0_8 = arith.constant 0 : index
    %c0_9 = arith.constant 0 : index
    %19 = vector.load %arg3[%c0_8, %c0_9] : memref<32x16xf32, #tpu.memory_space<vmem>>, vector<32x16xf32>
    tpu.vector_store %arg3[%c0_8, %c0_9], %18 {strides = array<i32>} : memref<32x16xf32, #tpu.memory_space<vmem>>, vector<32x16xf32>,
    return
  }
  func.func @transform_0(%arg0: i32) -> (i32, i32) {
    %c0_i32 = arith.constant 0 : i32
    %c0_i32_0 = arith.constant 0 : i32
    %c0_i32_1 = arith.constant 0 : i32
    return %c0_i32, %c0_i32_0 : i32, i32
  }
  func.func @transform_1(%arg0: i32) -> (i32, i32) {
    %c0_i32 = arith.constant 0 : i32
    %c0_i32_0 = arith.constant 0 : i32
    %c0_i32_1 = arith.constant 0 : i32
    return %c0_i32, %c0_i32_0 : i32, i32
  }
  func.func @transform_2(%arg0: i32) -> (i32, i32) {
    %c0_i32 = arith.constant 0 : i32
    %c0_i32_0 = arith.constant 0 : i32
    %c0_i32_1 = arith.constant 0 : i32
    return %c0_i32, %c0_i32_0 : i32, i32
  }
}

module attributes {stable_mosaic.version = 11 : i64} {
  func.func @kern(%arg0: i32, %arg1: memref<32x896xbf16, #tpu.memory_space<vmem>>, %arg2: memref<896x16xbf16, #tpu.memory_space<vmem>>, %arg3: memref<32x16xf32, #tpu.memory_space<vmem>>, %arg4: memref<32x16xf32, #tpu.memory_space<vmem>>) attributes {dimension_semantics = [#tpu.dimension_semantics<arbitrary>], iteration_bounds = array<i64: 1>, scalar_prefetch = 0 : i64, scratch_operands = 0 : i64, tpu.core_type = #tpu.core_type<tc>, window_params = [{pipeline_mode = #tpu.pipeline_mode<synchronous>, transform_indices = @transform_0, window_bounds = array<i64: 32, 896>}, {pipeline_mode = #tpu.pipeline_mode<synchronous>, transform_indices = @transform_1, window_bounds = array<i64: 896, 16>}, {pipeline_mode = #tpu.pipeline_mode<synchronous>, transform_indices = @transform_2, window_bounds = array<i64: 32, 16>}, {pipeline_mode = #tpu.pipeline_mode<synchronous>, transform_indices = @transform_3, window_bounds = array<i64: 32, 16>}]} {
    %c0 = arith.constant 0 : index
    %c0_0 = arith.constant 0 : index
    %0 = vector.load %arg1[%c0, %c0_0] : memref<32x896xbf16, #tpu.memory_space<vmem>>, vector<32x896xbf16>
    %c0_1 = arith.constant 0 : index
    %c0_2 = arith.constant 0 : index
    %1 = vector.load %arg2[%c0_1, %c0_2] : memref<896x16xbf16, #tpu.memory_space<vmem>>, vector<896x16xbf16>
    %cst = arith.constant dense<0.000000e+00> : vector<32x16xf32>
    %2 = tpu.matmul %0, %1, %cst {dimension_numbers = #tpu.dot_dimension_numbers<[1], [0], [0], [1], [0, 0, 1, 1], [], []>} : vector<32x896xbf16>, vector<896x16xbf16>, vector<32x16xf32> -> vector<32x16xf32>
    %cst_3 = arith.constant dense<0.000000e+00> : vector<32xf32>
    %3 = vector.multi_reduction <add>, %2, %cst_3 [1] : vector<32x16xf32> to vector<32xf32>
    %4 = vector.shape_cast %3 : vector<32xf32> to vector<32x1xf32>
    %cst_4 = arith.constant 6.250000e-02 : f32
    %5 = vector.broadcast %cst_4 : f32 to vector<32x1xf32>
    %6 = arith.mulf %4, %5 : vector<32x1xf32>
    %7 = vector.broadcast %6 : vector<32x1xf32> to vector<32x16xf32>
    %8 = arith.subf %2, %7 : vector<32x16xf32>
    %9 = arith.mulf %8, %8 : vector<32x16xf32>
    %cst_5 = arith.constant dense<0.000000e+00> : vector<32xf32>
    %10 = vector.multi_reduction <add>, %9, %cst_5 [1] : vector<32x16xf32> to vector<32xf32>
    %11 = vector.shape_cast %10 : vector<32xf32> to vector<32x1xf32>
    %cst_6 = arith.constant 6.250000e-02 : f32
    %12 = vector.broadcast %cst_6 : f32 to vector<32x1xf32>
    %13 = arith.mulf %11, %12 : vector<32x1xf32>
    %cst_7 = arith.constant 9.99999974E-6 : f32
    %14 = vector.broadcast %cst_7 : f32 to vector<32x1xf32>
    %15 = arith.addf %13, %14 : vector<32x1xf32>
    %16 = math.rsqrt %15 : vector<32x1xf32>
    %17 = vector.broadcast %16 : vector<32x1xf32> to vector<32x16xf32>
    %18 = arith.mulf %8, %17 : vector<32x16xf32>
    %c0_8 = arith.constant 0 : index
    %c0_9 = arith.constant 0 : index
    %19 = vector.load %arg3[%c0_8, %c0_9] : memref<32x16xf32, #tpu.memory_space<vmem>>, vector<32x16xf32>
    %20 = arith.addf %18, %19 : vector<32x16xf32>
    %cst_10 = arith.constant 0.000000e+00 : f32
    %21 = vector.broadcast %cst_10 : f32 to vector<32x16xf32>
    %22 = arith.maximumf %20, %21 : vector<32x16xf32>
    %c0_11 = arith.constant 0 : index
    %c0_12 = arith.constant 0 : index
    %23 = vector.load %arg4[%c0_11, %c0_12] : memref<32x16xf32, #tpu.memory_space<vmem>>, vector<32x16xf32>
    tpu.vector_store %arg4[%c0_11, %c0_12], %22 {strides = array<i32>} : memref<32x16xf32, #tpu.memory_space<vmem>>, vector<32x16xf32>,
    return
  }
  func.func @transform_0(%arg0: i32) -> (i32, i32) {
    %c0_i32 = arith.constant 0 : i32
    %c0_i32_0 = arith.constant 0 : i32
    %c0_i32_1 = arith.constant 0 : i32
    return %c0_i32, %c0_i32_0 : i32, i32
  }
  func.func @transform_1(%arg0: i32) -> (i32, i32) {
    %c0_i32 = arith.constant 0 : i32
    %c0_i32_0 = arith.constant 0 : i32
    %c0_i32_1 = arith.constant 0 : i32
    return %c0_i32, %c0_i32_0 : i32, i32
  }
  func.func @transform_2(%arg0: i32) -> (i32, i32) {
    %c0_i32 = arith.constant 0 : i32
    %c0_i32_0 = arith.constant 0 : i32
    %c0_i32_1 = arith.constant 0 : i32
    return %c0_i32, %c0_i32_0 : i32, i32
  }
  func.func @transform_3(%arg0: i32) -> (i32, i32) {
    %c0_i32 = arith.constant 0 : i32
    %c0_i32_0 = arith.constant 0 : i32
    %c0_i32_1 = arith.constant 0 : i32
    return %c0_i32, %c0_i32_0 : i32, i32
  }
}

module attributes {stable_mosaic.version = 11 : i64} {
  func.func @kern(%arg0: i32, %arg1: memref<32x896xbf16, #tpu.memory_space<vmem>>, %arg2: memref<896x2xbf16, #tpu.memory_space<vmem>>, %arg3: memref<32x2xf32, #tpu.memory_space<vmem>>) attributes {dimension_semantics = [#tpu.dimension_semantics<arbitrary>], iteration_bounds = array<i64: 1>, scalar_prefetch = 0 : i64, scratch_operands = 0 : i64, tpu.core_type = #tpu.core_type<tc>, window_params = [{pipeline_mode = #tpu.pipeline_mode<synchronous>, transform_indices = @transform_0, window_bounds = array<i64: 32, 896>}, {pipeline_mode = #tpu.pipeline_mode<synchronous>, transform_indices = @transform_1, window_bounds = array<i64: 896, 2>}, {pipeline_mode = #tpu.pipeline_mode<synchronous>, transform_indices = @transform_2, window_bounds = array<i64: 32, 2>}]} {
    %c0 = arith.constant 0 : index
    %c0_0 = arith.constant 0 : index
    %0 = vector.load %arg1[%c0, %c0_0] : memref<32x896xbf16, #tpu.memory_space<vmem>>, vector<32x896xbf16>
    %c0_1 = arith.constant 0 : index
    %c0_2 = arith.constant 0 : index
    %1 = vector.load %arg2[%c0_1, %c0_2] : memref<896x2xbf16, #tpu.memory_space<vmem>>, vector<896x2xbf16>
    %cst = arith.constant dense<0.000000e+00> : vector<32x2xf32>
    %2 = tpu.matmul %0, %1, %cst {dimension_numbers = #tpu.dot_dimension_numbers<[1], [0], [0], [1], [0, 0, 1, 1], [], []>} : vector<32x896xbf16>, vector<896x2xbf16>, vector<32x2xf32> -> vector<32x2xf32>
    %cst_3 = arith.constant dense<0.000000e+00> : vector<32xf32>
    %3 = vector.multi_reduction <add>, %2, %cst_3 [1] : vector<32x2xf32> to vector<32xf32>
    %4 = vector.shape_cast %3 : vector<32xf32> to vector<32x1xf32>
    %cst_4 = arith.constant 5.000000e-01 : f32
    %5 = vector.broadcast %cst_4 : f32 to vector<32x1xf32>
    %6 = arith.mulf %4, %5 : vector<32x1xf32>
    %7 = vector.broadcast %6 : vector<32x1xf32> to vector<32x2xf32>
    %8 = arith.subf %2, %7 : vector<32x2xf32>
    %9 = arith.mulf %8, %8 : vector<32x2xf32>
    %cst_5 = arith.constant dense<0.000000e+00> : vector<32xf32>
    %10 = vector.multi_reduction <add>, %9, %cst_5 [1] : vector<32x2xf32> to vector<32xf32>
    %11 = vector.shape_cast %10 : vector<32xf32> to vector<32x1xf32>
    %cst_6 = arith.constant 5.000000e-01 : f32
    %12 = vector.broadcast %cst_6 : f32 to vector<32x1xf32>
    %13 = arith.mulf %11, %12 : vector<32x1xf32>
    %cst_7 = arith.constant 9.99999974E-6 : f32
    %14 = vector.broadcast %cst_7 : f32 to vector<32x1xf32>
    %15 = arith.addf %13, %14 : vector<32x1xf32>
    %16 = math.rsqrt %15 : vector<32x1xf32>
    %17 = vector.broadcast %16 : vector<32x1xf32> to vector<32x2xf32>
    %18 = arith.mulf %8, %17 : vector<32x2xf32>
    %cst_8 = arith.constant 0.000000e+00 : f32
    %19 = vector.broadcast %cst_8 : f32 to vector<32x2xf32>
    %20 = arith.maximumf %18, %19 : vector<32x2xf32>
    %c0_9 = arith.constant 0 : index
    %c0_10 = arith.constant 0 : index
    %21 = vector.load %arg3[%c0_9, %c0_10] : memref<32x2xf32, #tpu.memory_space<vmem>>, vector<32x2xf32>
    tpu.vector_store %arg3[%c0_9, %c0_10], %20 {strides = array<i32>} : memref<32x2xf32, #tpu.memory_space<vmem>>, vector<32x2xf32>,
    return
  }
  func.func @transform_0(%arg0: i32) -> (i32, i32) {
    %c0_i32 = arith.constant 0 : i32
    %c0_i32_0 = arith.constant 0 : i32
    %c0_i32_1 = arith.constant 0 : i32
    return %c0_i32, %c0_i32_0 : i32, i32
  }
  func.func @transform_1(%arg0: i32) -> (i32, i32) {
    %c0_i32 = arith.constant 0 : i32
    %c0_i32_0 = arith.constant 0 : i32
    %c0_i32_1 = arith.constant 0 : i32
    return %c0_i32, %c0_i32_0 : i32, i32
  }
  func.func @transform_2(%arg0: i32) -> (i32, i32) {
    %c0_i32 = arith.constant 0 : i32
    %c0_i32_0 = arith.constant 0 : i32
    %c0_i32_1 = arith.constant 0 : i32
    return %c0_i32, %c0_i32_0 : i32, i32
  }
}

module attributes {stable_mosaic.version = 11 : i64} {
  func.func @kern(%arg0: i32, %arg1: memref<32x896xbf16, #tpu.memory_space<vmem>>, %arg2: memref<896x2xbf16, #tpu.memory_space<vmem>>, %arg3: memref<32x2xf32, #tpu.memory_space<vmem>>, %arg4: memref<32x2xf32, #tpu.memory_space<vmem>>) attributes {dimension_semantics = [#tpu.dimension_semantics<arbitrary>], iteration_bounds = array<i64: 1>, scalar_prefetch = 0 : i64, scratch_operands = 0 : i64, tpu.core_type = #tpu.core_type<tc>, window_params = [{pipeline_mode = #tpu.pipeline_mode<synchronous>, transform_indices = @transform_0, window_bounds = array<i64: 32, 896>}, {pipeline_mode = #tpu.pipeline_mode<synchronous>, transform_indices = @transform_1, window_bounds = array<i64: 896, 2>}, {pipeline_mode = #tpu.pipeline_mode<synchronous>, transform_indices = @transform_2, window_bounds = array<i64: 32, 2>}, {pipeline_mode = #tpu.pipeline_mode<synchronous>, transform_indices = @transform_3, window_bounds = array<i64: 32, 2>}]} {
    %c0 = arith.constant 0 : index
    %c0_0 = arith.constant 0 : index
    %0 = vector.load %arg1[%c0, %c0_0] : memref<32x896xbf16, #tpu.memory_space<vmem>>, vector<32x896xbf16>
    %c0_1 = arith.constant 0 : index
    %c0_2 = arith.constant 0 : index
    %1 = vector.load %arg2[%c0_1, %c0_2] : memref<896x2xbf16, #tpu.memory_space<vmem>>, vector<896x2xbf16>
    %cst = arith.constant dense<0.000000e+00> : vector<32x2xf32>
    %2 = tpu.matmul %0, %1, %cst {dimension_numbers = #tpu.dot_dimension_numbers<[1], [0], [0], [1], [0, 0, 1, 1], [], []>} : vector<32x896xbf16>, vector<896x2xbf16>, vector<32x2xf32> -> vector<32x2xf32>
    %cst_3 = arith.constant dense<0.000000e+00> : vector<32xf32>
    %3 = vector.multi_reduction <add>, %2, %cst_3 [1] : vector<32x2xf32> to vector<32xf32>
    %4 = vector.shape_cast %3 : vector<32xf32> to vector<32x1xf32>
    %cst_4 = arith.constant 5.000000e-01 : f32
    %5 = vector.broadcast %cst_4 : f32 to vector<32x1xf32>
    %6 = arith.mulf %4, %5 : vector<32x1xf32>
    %7 = vector.broadcast %6 : vector<32x1xf32> to vector<32x2xf32>
    %8 = arith.subf %2, %7 : vector<32x2xf32>
    %9 = arith.mulf %8, %8 : vector<32x2xf32>
    %cst_5 = arith.constant dense<0.000000e+00> : vector<32xf32>
    %10 = vector.multi_reduction <add>, %9, %cst_5 [1] : vector<32x2xf32> to vector<32xf32>
    %11 = vector.shape_cast %10 : vector<32xf32> to vector<32x1xf32>
    %cst_6 = arith.constant 5.000000e-01 : f32
    %12 = vector.broadcast %cst_6 : f32 to vector<32x1xf32>
    %13 = arith.mulf %11, %12 : vector<32x1xf32>
    %cst_7 = arith.constant 9.99999974E-6 : f32
    %14 = vector.broadcast %cst_7 : f32 to vector<32x1xf32>
    %15 = arith.addf %13, %14 : vector<32x1xf32>
    %16 = math.rsqrt %15 : vector<32x1xf32>
    %17 = vector.broadcast %16 : vector<32x1xf32> to vector<32x2xf32>
    %18 = arith.mulf %8, %17 : vector<32x2xf32>
    %c0_8 = arith.constant 0 : index
    %c0_9 = arith.constant 0 : index
    %19 = vector.load %arg3[%c0_8, %c0_9] : memref<32x2xf32, #tpu.memory_space<vmem>>, vector<32x2xf32>
    %20 = arith.addf %18, %19 : vector<32x2xf32>
    %cst_10 = arith.constant 0.000000e+00 : f32
    %21 = vector.broadcast %cst_10 : f32 to vector<32x2xf32>
    %22 = arith.maximumf %20, %21 : vector<32x2xf32>
    %c0_11 = arith.constant 0 : index
    %c0_12 = arith.constant 0 : index
    %23 = vector.load %arg4[%c0_11, %c0_12] : memref<32x2xf32, #tpu.memory_space<vmem>>, vector<32x2xf32>
    tpu.vector_store %arg4[%c0_11, %c0_12], %22 {strides = array<i32>} : memref<32x2xf32, #tpu.memory_space<vmem>>, vector<32x2xf32>,
    return
  }
  func.func @transform_0(%arg0: i32) -> (i32, i32) {
    %c0_i32 = arith.constant 0 : i32
    %c0_i32_0 = arith.constant 0 : i32
    %c0_i32_1 = arith.constant 0 : i32
    return %c0_i32, %c0_i32_0 : i32, i32
  }
  func.func @transform_1(%arg0: i32) -> (i32, i32) {
    %c0_i32 = arith.constant 0 : i32
    %c0_i32_0 = arith.constant 0 : i32
    %c0_i32_1 = arith.constant 0 : i32
    return %c0_i32, %c0_i32_0 : i32, i32
  }
  func.func @transform_2(%arg0: i32) -> (i32, i32) {
    %c0_i32 = arith.constant 0 : i32
    %c0_i32_0 = arith.constant 0 : i32
    %c0_i32_1 = arith.constant 0 : i32
    return %c0_i32, %c0_i32_0 : i32, i32
  }
  func.func @transform_3(%arg0: i32) -> (i32, i32) {
    %c0_i32 = arith.constant 0 : i32
    %c0_i32_0 = arith.constant 0 : i32
    %c0_i32_1 = arith.constant 0 : i32
    return %c0_i32, %c0_i32_0 : i32, i32
  }
}

module attributes {stable_mosaic.version = 11 : i64} {
  func.func @kern(%arg0: i32, %arg1: memref<32x128xbf16, #tpu.memory_space<vmem>>, %arg2: memref<128x2xbf16, #tpu.memory_space<vmem>>, %arg3: memref<32x2xf32, #tpu.memory_space<vmem>>) attributes {dimension_semantics = [#tpu.dimension_semantics<arbitrary>], iteration_bounds = array<i64: 1>, scalar_prefetch = 0 : i64, scratch_operands = 0 : i64, tpu.core_type = #tpu.core_type<tc>, window_params = [{pipeline_mode = #tpu.pipeline_mode<synchronous>, transform_indices = @transform_0, window_bounds = array<i64: 32, 128>}, {pipeline_mode = #tpu.pipeline_mode<synchronous>, transform_indices = @transform_1, window_bounds = array<i64: 128, 2>}, {pipeline_mode = #tpu.pipeline_mode<synchronous>, transform_indices = @transform_2, window_bounds = array<i64: 32, 2>}]} {
    %c0 = arith.constant 0 : index
    %c0_0 = arith.constant 0 : index
    %0 = vector.load %arg1[%c0, %c0_0] : memref<32x128xbf16, #tpu.memory_space<vmem>>, vector<32x128xbf16>
    %c0_1 = arith.constant 0 : index
    %c0_2 = arith.constant 0 : index
    %1 = vector.load %arg2[%c0_1, %c0_2] : memref<128x2xbf16, #tpu.memory_space<vmem>>, vector<128x2xbf16>
    %cst = arith.constant dense<0.000000e+00> : vector<32x2xf32>
    %2 = tpu.matmul %0, %1, %cst {dimension_numbers = #tpu.dot_dimension_numbers<[1], [0], [0], [1], [0, 0, 1, 1], [], []>} : vector<32x128xbf16>, vector<128x2xbf16>, vector<32x2xf32> -> vector<32x2xf32>
    %cst_3 = arith.constant dense<0.000000e+00> : vector<32xf32>
    %3 = vector.multi_reduction <add>, %2, %cst_3 [1] : vector<32x2xf32> to vector<32xf32>
    %4 = vector.shape_cast %3 : vector<32xf32> to vector<32x1xf32>
    %cst_4 = arith.constant 5.000000e-01 : f32
    %5 = vector.broadcast %cst_4 : f32 to vector<32x1xf32>
    %6 = arith.mulf %4, %5 : vector<32x1xf32>
    %7 = vector.broadcast %6 : vector<32x1xf32> to vector<32x2xf32>
    %8 = arith.subf %2, %7 : vector<32x2xf32>
    %9 = arith.mulf %8, %8 : vector<32x2xf32>
    %cst_5 = arith.constant dense<0.000000e+00> : vector<32xf32>
    %10 = vector.multi_reduction <add>, %9, %cst_5 [1] : vector<32x2xf32> to vector<32xf32>
    %11 = vector.shape_cast %10 : vector<32xf32> to vector<32x1xf32>
    %cst_6 = arith.constant 5.000000e-01 : f32
    %12 = vector.broadcast %cst_6 : f32 to vector<32x1xf32>
    %13 = arith.mulf %11, %12 : vector<32x1xf32>
    %cst_7 = arith.constant 9.99999974E-6 : f32
    %14 = vector.broadcast %cst_7 : f32 to vector<32x1xf32>
    %15 = arith.addf %13, %14 : vector<32x1xf32>
    %16 = math.rsqrt %15 : vector<32x1xf32>
    %17 = vector.broadcast %16 : vector<32x1xf32> to vector<32x2xf32>
    %18 = arith.mulf %8, %17 : vector<32x2xf32>
    %c0_8 = arith.constant 0 : index
    %c0_9 = arith.constant 0 : index
    %19 = vector.load %arg3[%c0_8, %c0_9] : memref<32x2xf32, #tpu.memory_space<vmem>>, vector<32x2xf32>
    tpu.vector_store %arg3[%c0_8, %c0_9], %18 {strides = array<i32>} : memref<32x2xf32, #tpu.memory_space<vmem>>, vector<32x2xf32>,
    return
  }
  func.func @transform_0(%arg0: i32) -> (i32, i32) {
    %c0_i32 = arith.constant 0 : i32
    %c0_i32_0 = arith.constant 0 : i32
    %c0_i32_1 = arith.constant 0 : i32
    return %c0_i32, %c0_i32_0 : i32, i32
  }
  func.func @transform_1(%arg0: i32) -> (i32, i32) {
    %c0_i32 = arith.constant 0 : i32
    %c0_i32_0 = arith.constant 0 : i32
    %c0_i32_1 = arith.constant 0 : i32
    return %c0_i32, %c0_i32_0 : i32, i32
  }
  func.func @transform_2(%arg0: i32) -> (i32, i32) {
    %c0_i32 = arith.constant 0 : i32
    %c0_i32_0 = arith.constant 0 : i32
    %c0_i32_1 = arith.constant 0 : i32
    return %c0_i32, %c0_i32_0 : i32, i32
  }
}

</mosaic_0001>

<bundles_post_ra>
// kernel: resnet2_forward.12
= control target key start
LH: loop header
LB: loop body
LE: loop exit
PB: predicated region body
PF: predicated region fallthrough
CT: control target
= control target key end

     0   :  { %s3145_s1 = inlined_call_operand.vmem [shape: bf16[384,1024], index: 1, kind: input, shape index: {}]   ;;  %s3146_s0 = inlined_call_operand.vmem [shape: bf16[32,384], index: 0, kind: input, shape index: {}]   ;;  %s3147_s2 = inlined_call_operand.vmem [shape: f32[32,1024], index: 2, kind: output, shape index: {}]  }
   0x1   :  { %v20_v0 = vld [vmem:[%s3145_s1] sm:$0xff]  ;;  %v21_v2 = vld [vmem:[%s3145_s1 + $0x8] sm:$0xff] }
   0x2   :  { %v24_v1 = vld [vmem:[%s3145_s1 + $0x20] sm:$0xff]  ;;  %v25_v4 = vld [vmem:[%s3145_s1 + $0x28] sm:$0xff] }
   0x3   :  { %v1887_v3 = vcombine.high %v20_v0, %v24_v1  ;;  %v1886_v5 = vcombine.low %v20_v0, %v24_v1  ;;  %v28_v6 = vld [vmem:[%s3145_s1 + $0x40] sm:$0xff]  ;;  %v1889_v8 = vcombine.high %v21_v2, %v25_v4  ;;  %v1888_v9 = vcombine.low %v21_v2, %v25_v4  ;;  %v29_v11 = vld [vmem:[%s3145_s1 + $0x48] sm:$0xff] }
   0x4   :  { %v32_v7 = vld [vmem:[%s3145_s1 + $0x60] sm:$0xff]  ;;  %v33_v12 = vld [vmem:[%s3145_s1 + $0x68] sm:$0xff] }
   0x5   :  { %v1895_v10 = vcombine.high %v28_v6, %v32_v7  ;;  %v36_v13 = vld [vmem:[%s3145_s1 + $0x80] sm:$0xff]  ;;  %1204 = vmatprep.subr.bf16.mxu0 %v1887_v3  ;;  %v1897_v14 = vcombine.high %v29_v11, %v33_v12  ;;  %v37_v16 = vld [vmem:[%s3145_s1 + $0x88] sm:$0xff]  ;;  %1310 = vmatprep.subr.bf16.mxu1 %v1889_v8  ;;  %v1894_v18 = vcombine.low %v28_v6, %v32_v7 }
   0x6   :  { %v40_v15 = vld [vmem:[%s3145_s1 + $0xa0] sm:$0xff]  ;;  %v41_v17 = vld [vmem:[%s3145_s1 + $0xa8] sm:$0xff]  ;;  %1205 = vmatpush1.bf16.msra.mxu0 %v1886_v5  ;;  %1311 = vmatpush1.bf16.msra.mxu1 %v1888_v9  ;;  %v1896_v19 = vcombine.low %v29_v11, %v33_v12 }
   0x7   :  { %1206 = vmatprep.subr.bf16.mxu0 %v1895_v10  ;;  %v1903_v20 = vcombine.high %v36_v13, %v40_v15  ;;  %1312 = vmatprep.subr.bf16.mxu1 %v1897_v14  ;;  %v1905_v21 = vcombine.high %v37_v16, %v41_v17  ;;  %v44_v22 = vld [vmem:[%s3145_s1 + $0xc0] sm:$0xff]  ;;  %v45_v24 = vld [vmem:[%s3145_s1 + $0xc8] sm:$0xff]  ;;  %v1902_v26 = vcombine.low %v36_v13, %v40_v15 }
   0x8   :  { %v48_v23 = vld [vmem:[%s3145_s1 + $0xe0] sm:$0xff]  ;;  %v49_v25 = vld [vmem:[%s3145_s1 + $0xe8] sm:$0xff]  ;;  %v1904_v27 = vcombine.low %v37_v16, %v41_v17 }
   0x9   :  { %v1911_v28 = vcombine.high %v44_v22, %v48_v23  ;;  %v1913_v29 = vcombine.high %v45_v24, %v49_v25  ;;  %v52_v30 = vld [vmem:[%s3145_s1 + $0x100] sm:$0xff]  ;;  %v53_v32 = vld [vmem:[%s3145_s1 + $0x108] sm:$0xff]  ;;  %v1910_v34 = vcombine.low %v44_v22, %v48_v23  ;;  %v1912_v35 = vcombine.low %v45_v24, %v49_v25 }
   0xa   :  { %1207 = vmatpush1.bf16.msra.mxu0 %v1894_v18  ;;  %1313 = vmatpush1.bf16.msra.mxu1 %v1896_v19  ;;  %v56_v31 = vld [vmem:[%s3145_s1 + $0x120] sm:$0xff]  ;;  %v57_v33 = vld [vmem:[%s3145_s1 + $0x128] sm:$0xff] }
   0xb   :  { %1208 = vmatprep.subr.bf16.mxu0 %v1903_v20  ;;  %1314 = vmatprep.subr.bf16.mxu1 %v1905_v21  ;;  %v1919_v36 = vcombine.high %v52_v30, %v56_v31  ;;  %v1921_v37 = vcombine.high %v53_v32, %v57_v33  ;;  %v60_v38 = vld [vmem:[%s3145_s1 + $0x140] sm:$0xff]  ;;  %v61_v40 = vld [vmem:[%s3145_s1 + $0x148] sm:$0xff]  ;;  %v1918_v42 = vcombine.low %v52_v30, %v56_v31 }
   0xc   :  { %v64_v39 = vld [vmem:[%s3145_s1 + $0x160] sm:$0xff]  ;;  %v65_v41 = vld [vmem:[%s3145_s1 + $0x168] sm:$0xff]  ;;  %v1920_v43 = vcombine.low %v53_v32, %v57_v33 }
   0xd   :  { %v1927_v44 = vcombine.high %v60_v38, %v64_v39  ;;  %v1929_v45 = vcombine.high %v61_v40, %v65_v41  ;;  %v68_v46 = vld [vmem:[%s3145_s1 + $0x180] sm:$0xff]  ;;  %v69_v48 = vld [vmem:[%s3145_s1 + $0x188] sm:$0xff]  ;;  %v1926_v50 = vcombine.low %v60_v38, %v64_v39  ;;  %v1928_v51 = vcombine.low %v61_v40, %v65_v41 }
   0xe   :  { %1209 = vmatpush1.bf16.msra.mxu0 %v1902_v26  ;;  %1315 = vmatpush1.bf16.msra.mxu1 %v1904_v27  ;;  %v72_v47 = vld [vmem:[%s3145_s1 + $0x1a0] sm:$0xff]  ;;  %v73_v49 = vld [vmem:[%s3145_s1 + $0x1a8] sm:$0xff] }
   0xf   :  { %1210 = vmatprep.subr.bf16.mxu0 %v1911_v28  ;;  %1316 = vmatprep.subr.bf16.mxu1 %v1913_v29  ;;  %v1935_v52 = vcombine.high %v68_v46, %v72_v47  ;;  %v1937_v53 = vcombine.high %v69_v48, %v73_v49  ;;  %v76_v54 = vld [vmem:[%s3145_s1 + $0x1c0] sm:$0xff]  ;;  %v77_v57 = vld [vmem:[%s3145_s1 + $0x1c8] sm:$0xff]  ;;  %v1934_v59 = vcombine.low %v68_v46, %v72_v47 }
  0x10   :  { %v80_v55 = vld [vmem:[%s3145_s1 + $0x1e0] sm:$0xff]  ;;  %v81_v58 = vld [vmem:[%s3145_s1 + $0x1e8] sm:$0xff]  ;;  %v1936_v60 = vcombine.low %v69_v48, %v73_v49 }
  0x11   :  { %v2236_v56 = vld [vmem:[%s3146_s0 + $0x4] ss:$12 sps:$4 sm:$0xff]   ;;  %v1943_v61 = vcombine.high %v76_v54, %v80_v55  ;;  %v1945_v62 = vcombine.high %v77_v57, %v81_v58  ;;  %v85_v1 = vld [vmem:[%s3145_s1 + $0x208] sm:$0xff]  ;;  %v1942_v3 = vcombine.low %v76_v54, %v80_v55  ;;  %v1944_v4 = vcombine.low %v77_v57, %v81_v58 }
  0x12   :  { %1211 = vmatpush1.bf16.msra.mxu0 %v1910_v34  ;;  %1317 = vmatpush1.bf16.msra.mxu1 %v1912_v35  ;;  %v84_v63 = vld [vmem:[%s3145_s1 + $0x200] sm:$0xff]  ;;  %v89_v2 = vld [vmem:[%s3145_s1 + $0x228] sm:$0xff] }
  0x13   :  { %1212 = vmatprep.subr.bf16.mxu0 %v1919_v36  ;;  %1318 = vmatprep.subr.bf16.mxu1 %v1921_v37  ;;  %v88_v0 = vld [vmem:[%s3145_s1 + $0x220] sm:$0xff]  ;;  %v1953_v6 = vcombine.high %v85_v1, %v89_v2  ;;  %v93_v9 = vld [vmem:[%s3145_s1 + $0x248] sm:$0xff]  ;;  %v1952_v12 = vcombine.low %v85_v1, %v89_v2 }
  0x14   :  { %1236 = vmatprep.mubr.bf16.mxu0 %v2236_v56  ;;  %1342 = vmatprep.mubr.bf16.mxu1 %v2236_v56  ;;  %v1951_v5 = vcombine.high %v84_v63, %v88_v0  ;;  %v92_v7 = vld [vmem:[%s3145_s1 + $0x240] sm:$0xff]  ;;  %v97_v10 = vld [vmem:[%s3145_s1 + $0x268] sm:$0xff]  ;;  %v1950_v11 = vcombine.low %v84_v63, %v88_v0 }
  0x15   :  { %v96_v8 = vld [vmem:[%s3145_s1 + $0x260] sm:$0xff]  ;;  %v1961_v14 = vcombine.high %v93_v9, %v97_v10  ;;  %v101_v17 = vld [vmem:[%s3145_s1 + $0x288] sm:$0xff]  ;;  %v1960_v20 = vcombine.low %v93_v9, %v97_v10 }
  0x16   :  { %1213 = vmatpush1.bf16.msra.mxu0 %v1918_v42  ;;  %1319 = vmatpush1.bf16.msra.mxu1 %v1920_v43  ;;  %v1959_v13 = vcombine.high %v92_v7, %v96_v8  ;;  %v100_v15 = vld [vmem:[%s3145_s1 + $0x280] sm:$0xff]  ;;  %v105_v18 = vld [vmem:[%s3145_s1 + $0x2a8] sm:$0xff]  ;;  %v1958_v19 = vcombine.low %v92_v7, %v96_v8 }
  0x17   :  { %1214 = vmatprep.subr.bf16.mxu0 %v1927_v44  ;;  %1320 = vmatprep.subr.bf16.mxu1 %v1929_v45  ;;  %v104_v16 = vld [vmem:[%s3145_s1 + $0x2a0] sm:$0xff]  ;;  %v1969_v23 = vcombine.high %v101_v17, %v105_v18  ;;  %v109_v25 = vld [vmem:[%s3145_s1 + $0x2c8] sm:$0xff]  ;;  %v1968_v28 = vcombine.low %v101_v17, %v105_v18 }
  0x18   :  { %v1967_v21 = vcombine.high %v100_v15, %v104_v16  ;;  %v108_v22 = vld [vmem:[%s3145_s1 + $0x2c0] sm:$0xff]  ;;  %v113_v26 = vld [vmem:[%s3145_s1 + $0x2e8] sm:$0xff]  ;;  %v1966_v27 = vcombine.low %v100_v15, %v104_v16 }
  0x19   :  { %v112_v24 = vld [vmem:[%s3145_s1 + $0x2e0] sm:$0xff]  ;;  %v1977_v30 = vcombine.high %v109_v25, %v113_v26  ;;  %v117_v33 = vld [vmem:[%s3145_s1 + $0x308] sm:$0xff]  ;;  %v1976_v36 = vcombine.low %v109_v25, %v113_v26 }
  0x1a   :  { %1215 = vmatpush1.bf16.msra.mxu0 %v1926_v50  ;;  %1321 = vmatpush1.bf16.msra.mxu1 %v1928_v51  ;;  %v1975_v29 = vcombine.high %v108_v22, %v112_v24  ;;  %v116_v31 = vld [vmem:[%s3145_s1 + $0x300] sm:$0xff]  ;;  %v121_v34 = vld [vmem:[%s3145_s1 + $0x328] sm:$0xff]  ;;  %v1974_v35 = vcombine.low %v108_v22, %v112_v24 }
  0x1b   :  { %1216 = vmatprep.subr.bf16.mxu0 %v1935_v52  ;;  %1322 = vmatprep.subr.bf16.mxu1 %v1937_v53  ;;  %v120_v32 = vld [vmem:[%s3145_s1 + $0x320] sm:$0xff]  ;;  %v1985_v38 = vcombine.high %v117_v33, %v121_v34  ;;  %v125_v41 = vld [vmem:[%s3145_s1 + $0x348] sm:$0xff]  ;;  %v1984_v44 = vcombine.low %v117_v33, %v121_v34 }
  0x1c   :  { %v1983_v37 = vcombine.high %v116_v31, %v120_v32  ;;  %v124_v39 = vld [vmem:[%s3145_s1 + $0x340] sm:$0xff]  ;;  %v129_v42 = vld [vmem:[%s3145_s1 + $0x368] sm:$0xff]  ;;  %v1982_v43 = vcombine.low %v116_v31, %v120_v32 }
  0x1d   :  { %v128_v40 = vld [vmem:[%s3145_s1 + $0x360] sm:$0xff]  ;;  %v1993_v46 = vcombine.high %v125_v41, %v129_v42  ;;  %v133_v49 = vld [vmem:[%s3145_s1 + $0x388] sm:$0xff]  ;;  %v1992_v52 = vcombine.low %v125_v41, %v129_v42 }
  0x1e   :  { %1217 = vmatpush1.bf16.msra.mxu0 %v1934_v59  ;;  %1323 = vmatpush1.bf16.msra.mxu1 %v1936_v60  ;;  %v1991_v45 = vcombine.high %v124_v39, %v128_v40  ;;  %v132_v47 = vld [vmem:[%s3145_s1 + $0x380] sm:$0xff]  ;;  %v137_v50 = vld [vmem:[%s3145_s1 + $0x3a8] sm:$0xff]  ;;  %v1990_v51 = vcombine.low %v124_v39, %v128_v40 }
  0x1f   :  { %1218 = vmatprep.subr.bf16.mxu0 %v1943_v61  ;;  %1324 = vmatprep.subr.bf16.mxu1 %v1945_v62  ;;  %v136_v48 = vld [vmem:[%s3145_s1 + $0x3a0] sm:$0xff]  ;;  %v2001_v54 = vcombine.high %v133_v49, %v137_v50  ;;  %v141_v58 = vld [vmem:[%s3145_s1 + $0x3c8] sm:$0xff]  ;;  %v2000_v61 = vcombine.low %v133_v49, %v137_v50 }
  0x20   :  { %v1999_v53 = vcombine.high %v132_v47, %v136_v48  ;;  %v140_v55 = vld [vmem:[%s3145_s1 + $0x3c0] sm:$0xff]  ;;  %v145_v59 = vld [vmem:[%s3145_s1 + $0x3e8] sm:$0xff]  ;;  %v1998_v60 = vcombine.low %v132_v47, %v136_v48 }
  0x21   :  { %v144_v57 = vld [vmem:[%s3145_s1 + $0x3e0] sm:$0xff]  ;;  %v2009_v63 = vcombine.high %v141_v58, %v145_v59  ;;  %v149_v2 = vld [vmem:[%s3145_s1 + $0x408] sm:$0xff] }
  0x22   :  { %1219 = vmatpush1.bf16.msra.mxu0 %v1942_v3  ;;  %1325 = vmatpush1.bf16.msra.mxu1 %v1944_v4  ;;  %v2007_v62 = vcombine.high %v140_v55, %v144_v57  ;;  %v148_v0 = vld [vmem:[%s3145_s1 + $0x400] sm:$0xff]  ;;  %v153_v3 = vld [vmem:[%s3145_s1 + $0x428] sm:$0xff]  ;;  %v2006_v4 = vcombine.low %v140_v55, %v144_v57 }
  0x23   :  { %1220 = vmatprep.subr.bf16.mxu0 %v1951_v5  ;;  %1326 = vmatprep.subr.bf16.mxu1 %v1953_v6  ;;  %v152_v1 = vld [vmem:[%s3145_s1 + $0x420] sm:$0xff]  ;;  %v2008_v5 = vcombine.low %v141_v58, %v145_v59  ;;  %v2017_v7 = vcombine.high %v149_v2, %v153_v3  ;;  %v193_v47 = vld [vmem:[%s3145_s1 + $0x568] sm:$0xff] }
  0x24   :  { %v2015_v6 = vcombine.high %v148_v0, %v152_v1  ;;  %v156_v8 = vld [vmem:[%s3145_s1 + $0x440] sm:$0xff]  ;;  %v201_v55 = vld [vmem:[%s3145_s1 + $0x5a8] sm:$0xff] }
  0x25   :  { %v160_v9 = vld [vmem:[%s3145_s1 + $0x460] sm:$0xff] }
  0x26   :  { %1221 = vmatpush1.bf16.msra.mxu0 %v1950_v11  ;;  %1327 = vmatpush1.bf16.msra.mxu1 %v1952_v12  ;;  %v2363_v10 = vld [vmem:[%s3146_s0] ss:$12 sps:$4 sm:$0xff]   ;;  %v2023_v15 = vcombine.high %v156_v8, %v160_v9  ;;  %v2022_v22 = vcombine.low %v156_v8, %v160_v9  ;;  %v27_v8 = vld [vmem:[%s3145_s1 + $0x38] sm:$0xff] }
  0x27   :  { %1222 = vmatprep.subr.bf16.mxu0 %v1959_v13  ;;  %1328 = vmatprep.subr.bf16.mxu1 %v1961_v14  ;;  %v157_v11 = vld [vmem:[%s3145_s1 + $0x448] sm:$0xff]  ;;  %v2014_v13 = vcombine.low %v148_v0, %v152_v1  ;;  %v2016_v14 = vcombine.low %v149_v2, %v153_v3  ;;  %v164_v17 = vld [vmem:[%s3145_s1 + $0x480] sm:$0xff] }
  0x28   :  { %v161_v12 = vld [vmem:[%s3145_s1 + $0x468] sm:$0xff]  ;;  %v168_v18 = vld [vmem:[%s3145_s1 + $0x4a0] sm:$0xff] }
  0x29   :  { %v2025_v16 = vcombine.high %v157_v11, %v161_v12  ;;  %v2031_v24 = vcombine.high %v164_v17, %v168_v18  ;;  %v172_v26 = vld [vmem:[%s3145_s1 + $0x4c0] sm:$0xff]  ;;  %v2030_v31 = vcombine.low %v164_v17, %v168_v18  ;;  %v209_v0 = vld [vmem:[%s3145_s1 + $0x5e8] sm:$0xff]  ;;  %v31_v17 = vld [vmem:[%s3145_s1 + $0x58] sm:$0xff] }
  0x2a   :  { %1223 = vmatpush1.bf16.msra.mxu0 %v1958_v19  ;;  %1329 = vmatpush1.bf16.msra.mxu1 %v1960_v20  ;;  %v2380_v19 = vld [vmem:[%s3146_s0 + $0x1c] ss:$12 sps:$4 sm:$0xff]  }
  0x2b   :  { %1224 = vmatprep.subr.bf16.mxu0 %v1967_v21  ;;  %1330 = vmatprep.subr.bf16.mxu1 %v1969_v23  ;;  %v165_v20 = vld [vmem:[%s3145_s1 + $0x488] sm:$0xff]  ;;  %v2024_v23 = vcombine.low %v157_v11, %v161_v12  ;;  %v35_v18 = vld [vmem:[%s3145_s1 + $0x78] sm:$0xff] }
  0x2c   :  { %v169_v21 = vld [vmem:[%s3145_s1 + $0x4a8] sm:$0xff] }
  0x2d   :  { %v2033_v25 = vcombine.high %v165_v20, %v169_v21  ;;  %v2032_v32 = vcombine.low %v165_v20, %v169_v21 }
  0x2e   :  { %1225 = vmatpush1.bf16.msra.mxu0 %v1966_v27  ;;  %1331 = vmatpush1.bf16.msra.mxu1 %v1968_v28  ;;  %v176_v27 = vld [vmem:[%s3145_s1 + $0x4e0] sm:$0xff]  ;;  %v173_v28 = vld [vmem:[%s3145_s1 + $0x4c8] sm:$0xff] }
  0x2f   :  { %1226 = vmatprep.subr.bf16.mxu0 %v1975_v29  ;;  %1332 = vmatprep.subr.bf16.mxu1 %v1977_v30  ;;  %v177_v29 = vld [vmem:[%s3145_s1 + $0x4e8] sm:$0xff]  ;;  %v2407_v30 = vld [vmem:[%s3146_s0 + $0x18] ss:$12 sps:$4 sm:$0xff]   ;;  %v2039_v33 = vcombine.high %v172_v26, %v176_v27  ;;  %v2038_v39 = vcombine.low %v172_v26, %v176_v27 }
  0x30   :  { %v2041_v34 = vcombine.high %v173_v28, %v177_v29  ;;  %v2040_v40 = vcombine.low %v173_v28, %v177_v29  ;;  %v39_v26 = vld [vmem:[%s3145_s1 + $0x98] sm:$0xff]  ;;  %v1900_v29 = vcombine.low %v31_v17, %v35_v18 }
  0x31   :  { %v43_v27 = vld [vmem:[%s3145_s1 + $0xb8] sm:$0xff] }
  0x32   :  { %1227 = vmatpush1.bf16.msra.mxu0 %v1974_v35  ;;  %1333 = vmatpush1.bf16.msra.mxu1 %v1976_v36  ;;  %v180_v35 = vld [vmem:[%s3145_s1 + $0x500] sm:$0xff] }
  0x33   :  { %1228 = vmatprep.subr.bf16.mxu0 %v1983_v37  ;;  %1334 = vmatprep.subr.bf16.mxu1 %v1985_v38  ;;  %v184_v36 = vld [vmem:[%s3145_s1 + $0x520] sm:$0xff]  ;;  %v181_v37 = vld [vmem:[%s3145_s1 + $0x508] sm:$0xff] }
  0x34   :  { %v185_v38 = vld [vmem:[%s3145_s1 + $0x528] sm:$0xff]  ;;  %v2047_v41 = vcombine.high %v180_v35, %v184_v36  ;;  %v2046_v48 = vcombine.low %v180_v35, %v184_v36  ;;  %v47_v36 = vld [vmem:[%s3145_s1 + $0xd8] sm:$0xff] }
  0x35   :  { %v2049_v42 = vcombine.high %v181_v37, %v185_v38  ;;  %v2048_v49 = vcombine.low %v181_v37, %v185_v38  ;;  %v2515_v35 = vld [vmem:[%s3146_s0 + $0x20] ss:$12 sps:$4 sm:$0xff]   ;;  %v51_v37 = vld [vmem:[%s3145_s1 + $0xf8] sm:$0xff] }
  0x36   :  { %1229 = vmatpush1.bf16.msra.mxu0 %v1982_v43  ;;  %1335 = vmatpush1.bf16.msra.mxu1 %v1984_v44  ;;  %v188_v43 = vld [vmem:[%s3145_s1 + $0x540] sm:$0xff] }
  0x37   :  { %1230 = vmatprep.subr.bf16.mxu0 %v1991_v45  ;;  %1336 = vmatprep.subr.bf16.mxu1 %v1993_v46  ;;  %v192_v44 = vld [vmem:[%s3145_s1 + $0x560] sm:$0xff]  ;;  %v2127_v45 = vmov 0   ;;  %v189_v46 = vld [vmem:[%s3145_s1 + $0x548] sm:$0xff] }
  0x38   :  { %v2055_v50 = vcombine.high %v188_v43, %v192_v44  ;;  %v2054_v57 = vcombine.low %v188_v43, %v192_v44  ;;  %v2056_v58 = vcombine.low %v189_v46, %v193_v47  ;;  %v58_v43 = vld [vmem:[%s3145_s1 + $0x130] sm:$0xff]  ;;  %v55_v44 = vld [vmem:[%s3145_s1 + $0x118] sm:$0xff] }
  0x3a   :  { %1231 = vmatpush1.bf16.msra.mxu0 %v1990_v51  ;;  %1337 = vmatpush1.bf16.msra.mxu1 %v1992_v52  ;;  %v2057_v51 = vcombine.high %v189_v46, %v193_v47  ;;  %v196_v52 = vld [vmem:[%s3145_s1 + $0x580] sm:$0xff]  ;;  %v59_v46 = vld [vmem:[%s3145_s1 + $0x138] sm:$0xff] }
  0x3b   :  { %1232 = vmatprep.subr.bf16.mxu0 %v1999_v53  ;;  %1338 = vmatprep.subr.bf16.mxu1 %v2001_v54  ;;  %v200_v53 = vld [vmem:[%s3145_s1 + $0x5a0] sm:$0xff]  ;;  %v197_v54 = vld [vmem:[%s3145_s1 + $0x588] sm:$0xff] }
  0x3c   :  { %v2063_v59 = vcombine.high %v196_v52, %v200_v53  ;;  %v2062_v1 = vcombine.low %v196_v52, %v200_v53  ;;  %v2064_v2 = vcombine.low %v197_v54, %v201_v55  ;;  %v66_v52 = vld [vmem:[%s3145_s1 + $0x170] sm:$0xff]  ;;  %v63_v53 = vld [vmem:[%s3145_s1 + $0x158] sm:$0xff] }
  0x3e   :  { %1233 = vmatpush1.bf16.msra.mxu0 %v1998_v60  ;;  %1339 = vmatpush1.bf16.msra.mxu1 %v2000_v61  ;;  %v2065_v60 = vcombine.high %v197_v54, %v201_v55  ;;  %v204_v61 = vld [vmem:[%s3145_s1 + $0x5c0] sm:$0xff]  ;;  %v67_v54 = vld [vmem:[%s3145_s1 + $0x178] sm:$0xff] }
  0x3f   :  { %1234 = vmatprep.subr.bf16.mxu0 %v2007_v62  ;;  %1340 = vmatprep.subr.bf16.mxu1 %v2009_v63  ;;  %v208_v62 = vld [vmem:[%s3145_s1 + $0x5e0] sm:$0xff]  ;;  %v205_v63 = vld [vmem:[%s3145_s1 + $0x5c8] sm:$0xff] }
  0x40   :  { %v2071_v3 = vcombine.high %v204_v61, %v208_v62  ;;  %v2070_v9 = vcombine.low %v204_v61, %v208_v62  ;;  %v2072_v11 = vcombine.low %v205_v63, %v209_v0  ;;  %v74_v61 = vld [vmem:[%s3145_s1 + $0x1b0] sm:$0xff]  ;;  %v75_v62 = vld [vmem:[%s3145_s1 + $0x1b8] sm:$0xff] }
  0x42   :  { %1235 = vmatpush1.bf16.msra.mxu0 %v2006_v4  ;;  %1341 = vmatpush1.bf16.msra.mxu1 %v2008_v5  ;;  %v2073_v4 = vcombine.high %v205_v63, %v209_v0  ;;  %v22_v5 = vld [vmem:[%s3145_s1 + $0x10] sm:$0xff]  ;;  %v1932_v0 = vcombine.low %v63_v53, %v67_v54 }
  0x43   :  { %1257 = vmatprep.subr.bf16.mxu0 %v2015_v6  ;;  %1363 = vmatprep.subr.bf16.mxu1 %v2017_v7  ;;  %v26_v6 = vld [vmem:[%s3145_s1 + $0x30] sm:$0xff]  ;;  %v23_v7 = vld [vmem:[%s3145_s1 + $0x18] sm:$0xff] }
  0x44   :  { %v1891_v12 = vcombine.high %v22_v5, %v26_v6  ;;  %v1890_v20 = vcombine.low %v22_v5, %v26_v6  ;;  %v1892_v21 = vcombine.low %v23_v7, %v27_v8  ;;  %v79_v5 = vld [vmem:[%s3145_s1 + $0x1d8] sm:$0xff] }
  0x45   :  { %1237 = vmatmul.mubr.bf16.vlgmr.msra.gmra.mrb[0].mxu0 %v2363_v10  ;;  %1343 = vmatmul.mubr.bf16.vlgmr.msra.gmra.mrb[0].mxu1 %v2363_v10  ;;  %v83_v6 = vld [vmem:[%s3145_s1 + $0x1f8] sm:$0xff] }
  0x46   :  { %1258 = vmatpush1.bf16.msra.mxu0 %v2014_v13  ;;  %1364 = vmatpush1.bf16.msra.mxu1 %v2016_v14  ;;  %v1893_v13 = vcombine.high %v23_v7, %v27_v8  ;;  %v30_v14 = vld [vmem:[%s3145_s1 + $0x50] sm:$0xff] }
  0x47   :  { %1259 = vmatprep.subr.bf16.mxu0 %v2023_v15  ;;  %1365 = vmatprep.subr.bf16.mxu1 %v2025_v16  ;;  %v34_v15 = vld [vmem:[%s3145_s1 + $0x70] sm:$0xff] }
  0x48   :  { %1246 = vmatprep.mubr.bf16.mxu0 %v2380_v19  ;;  %1352 = vmatprep.mubr.bf16.mxu1 %v2380_v19  ;;  %v2482_v16 = vld [vmem:[%s3146_s0 + $0x8] ss:$12 sps:$4 sm:$0xff]   ;;  %v1898_v28 = vcombine.low %v30_v14, %v34_v15 }
  0x4a   :  { %1260 = vmatpush1.bf16.msra.mxu0 %v2022_v22  ;;  %1366 = vmatpush1.bf16.msra.mxu1 %v2024_v23  ;;  %v1899_v22 = vcombine.high %v30_v14, %v34_v15  ;;  %v1901_v23 = vcombine.high %v31_v17, %v35_v18  ;;  %v87_v14 = vld [vmem:[%s3145_s1 + $0x218] sm:$0xff]  ;;  %v1948_v18 = vcombine.low %v79_v5, %v83_v6 }
  0x4b   :  { %1261 = vmatprep.subr.bf16.mxu0 %v2031_v24  ;;  %1367 = vmatprep.subr.bf16.mxu1 %v2033_v25  ;;  %v38_v24 = vld [vmem:[%s3145_s1 + $0x90] sm:$0xff]  ;;  %v91_v15 = vld [vmem:[%s3145_s1 + $0x238] sm:$0xff] }
  0x4c   :  { %v42_v25 = vld [vmem:[%s3145_s1 + $0xb0] sm:$0xff] }
  0x4d   :  { %1247 = vmatmul.mubr.bf16.gmra.mrb[4].mxu0 %v2407_v30  ;;  %1353 = vmatmul.mubr.bf16.gmra.mrb[4].mxu1 %v2407_v30  ;;  %v1906_v38 = vcombine.low %v38_v24, %v42_v25 }
  0x4e   :  { %1262 = vmatpush1.bf16.msra.mxu0 %v2030_v31  ;;  %1368 = vmatpush1.bf16.msra.mxu1 %v2032_v32  ;;  %v1907_v31 = vcombine.high %v38_v24, %v42_v25  ;;  %v1909_v32 = vcombine.high %v39_v26, %v43_v27  ;;  %v95_v24 = vld [vmem:[%s3145_s1 + $0x258] sm:$0xff] }
  0x4f   :  { %1263 = vmatprep.subr.bf16.mxu0 %v2039_v33  ;;  %1369 = vmatprep.subr.bf16.mxu1 %v2041_v34  ;;  %v46_v33 = vld [vmem:[%s3145_s1 + $0xd0] sm:$0xff]  ;;  %v99_v25 = vld [vmem:[%s3145_s1 + $0x278] sm:$0xff] }
  0x50   :  { %1289 = vmatprep.mubr.bf16.mxu0 %v2127_v45  ;;  %1395 = vmatprep.mubr.bf16.mxu1 %v2127_v45  ;;  %v50_v34 = vld [vmem:[%s3145_s1 + $0xf0] sm:$0xff] }
  0x51   :  { %v1914_v47 = vcombine.low %v46_v33, %v50_v34 }
  0x52   :  { %1264 = vmatpush1.bf16.msra.mxu0 %v2038_v39  ;;  %1370 = vmatpush1.bf16.msra.mxu1 %v2040_v40  ;;  %v1908_v39 = vcombine.low %v39_v26, %v43_v27  ;;  %v1915_v40 = vcombine.high %v46_v33, %v50_v34  ;;  %v1956_v27 = vcombine.low %v87_v14, %v91_v15  ;;  %v103_v33 = vld [vmem:[%s3145_s1 + $0x298] sm:$0xff] }
  0x53   :  { %1265 = vmatprep.subr.bf16.mxu0 %v2047_v41  ;;  %1371 = vmatprep.subr.bf16.mxu1 %v2049_v42  ;;  %v1917_v41 = vcombine.high %v47_v36, %v51_v37  ;;  %v54_v42 = vld [vmem:[%s3145_s1 + $0x110] sm:$0xff]  ;;  %v107_v34 = vld [vmem:[%s3145_s1 + $0x2b8] sm:$0xff] }
  0x54   :  { %v1922_v55 = vcombine.low %v54_v42, %v58_v43 }
  0x56   :  { %1266 = vmatpush1.bf16.msra.mxu0 %v2046_v48  ;;  %1372 = vmatpush1.bf16.msra.mxu1 %v2048_v49  ;;  %v1916_v48 = vcombine.low %v47_v36, %v51_v37  ;;  %v1923_v49 = vcombine.high %v54_v42, %v58_v43  ;;  %v1964_v37 = vcombine.low %v95_v24, %v99_v25  ;;  %v111_v42 = vld [vmem:[%s3145_s1 + $0x2d8] sm:$0xff] }
  0x57   :  { %1267 = vmatprep.subr.bf16.mxu0 %v2055_v50  ;;  %1373 = vmatprep.subr.bf16.mxu1 %v2057_v51  ;;  %v1925_v50 = vcombine.high %v55_v44, %v59_v46  ;;  %v62_v51 = vld [vmem:[%s3145_s1 + $0x150] sm:$0xff]  ;;  %v115_v43 = vld [vmem:[%s3145_s1 + $0x2f8] sm:$0xff] }
  0x58   :  { %v1930_v63 = vcombine.low %v62_v51, %v66_v52 }
  0x5a   :  { %1268 = vmatpush1.bf16.msra.mxu0 %v2054_v57  ;;  %1374 = vmatpush1.bf16.msra.mxu1 %v2056_v58  ;;  %v1924_v57 = vcombine.low %v55_v44, %v59_v46  ;;  %v1931_v58 = vcombine.high %v62_v51, %v66_v52  ;;  %v1972_v46 = vcombine.low %v103_v33, %v107_v34  ;;  %v119_v51 = vld [vmem:[%s3145_s1 + $0x318] sm:$0xff] }
  0x5b   :  { %1269 = vmatprep.subr.bf16.mxu0 %v2063_v59  ;;  %1375 = vmatprep.subr.bf16.mxu1 %v2065_v60  ;;  %v1933_v59 = vcombine.high %v63_v53, %v67_v54  ;;  %v70_v60 = vld [vmem:[%s3145_s1 + $0x190] sm:$0xff]  ;;  %v123_v52 = vld [vmem:[%s3145_s1 + $0x338] sm:$0xff]  ;;  %v1980_v54 = vcombine.low %v111_v42, %v115_v43 }
  0x5c   :  { %v1938_v7 = vcombine.low %v70_v60, %v74_v61 }
  0x5e   :  { %1270 = vmatpush1.bf16.msra.mxu0 %v2062_v1  ;;  %1376 = vmatpush1.bf16.msra.mxu1 %v2064_v2  ;;  %v1939_v1 = vcombine.high %v70_v60, %v74_v61  ;;  %v127_v60 = vld [vmem:[%s3145_s1 + $0x358] sm:$0xff] }
  0x5f   :  { %1271 = vmatprep.subr.bf16.mxu0 %v2071_v3  ;;  %1377 = vmatprep.subr.bf16.mxu1 %v2073_v4  ;;  %v78_v3 = vld [vmem:[%s3145_s1 + $0x1d0] sm:$0xff]  ;;  %v131_v61 = vld [vmem:[%s3145_s1 + $0x378] sm:$0xff] }
  0x60   :  { %v82_v4 = vld [vmem:[%s3145_s1 + $0x1f0] sm:$0xff] }
  0x61   :  { %v1946_v17 = vcombine.low %v78_v3, %v82_v4 }
  0x62   :  { %1272 = vmatpush1.bf16.msra.mxu0 %v2070_v9  ;;  %1378 = vmatpush1.bf16.msra.mxu1 %v2072_v11  ;;  %v1947_v9 = vcombine.high %v78_v3, %v82_v4  ;;  %v1949_v11 = vcombine.high %v79_v5, %v83_v6  ;;  %v135_v3 = vld [vmem:[%s3145_s1 + $0x398] sm:$0xff]  ;;  %v1996_v6 = vcombine.low %v127_v60, %v131_v61 }
  0x63   :  { %1416 = vmatprep.subr.bf16.mxu0 %v1891_v12  ;;  %1522 = vmatprep.subr.bf16.mxu1 %v1893_v13  ;;  %v86_v12 = vld [vmem:[%s3145_s1 + $0x210] sm:$0xff]  ;;  %v139_v4 = vld [vmem:[%s3145_s1 + $0x3b8] sm:$0xff] }
  0x64   :  { %v90_v13 = vld [vmem:[%s3145_s1 + $0x230] sm:$0xff] }
  0x65   :  { %1290 = vmatmul.mubr.bf16.vlgmr.msra.gmra.mrb[0].mxu0 %v2482_v16  ;;  %1396 = vmatmul.mubr.bf16.vlgmr.msra.gmra.mrb[0].mxu1 %v2482_v16  ;;  %v1954_v26 = vcombine.low %v86_v12, %v90_v13 }
  0x66   :  { %1417 = vmatpush1.bf16.msra.mxu0 %v1890_v20  ;;  %1523 = vmatpush1.bf16.msra.mxu1 %v1892_v21  ;;  %v1955_v20 = vcombine.high %v86_v12, %v90_v13  ;;  %v1957_v21 = vcombine.high %v87_v14, %v91_v15  ;;  %v143_v12 = vld [vmem:[%s3145_s1 + $0x3d8] sm:$0xff]  ;;  %v2004_v15 = vcombine.low %v135_v3, %v139_v4 }
  0x67   :  { %1418 = vmatprep.subr.bf16.mxu0 %v1899_v22  ;;  %1524 = vmatprep.subr.bf16.mxu1 %v1901_v23  ;;  %v94_v22 = vld [vmem:[%s3145_s1 + $0x250] sm:$0xff]  ;;  %v147_v13 = vld [vmem:[%s3145_s1 + $0x3f8] sm:$0xff] }
  0x68   :  { %1299 = vmatprep.mubr.bf16.mxu0 %v2127_v45  ;;  %1405 = vmatprep.mubr.bf16.mxu1 %v2127_v45  ;;  %v98_v23 = vld [vmem:[%s3145_s1 + $0x270] sm:$0xff] }
  0x69   :  { %v1962_v36 = vcombine.low %v94_v22, %v98_v23 }
  0x6a   :  { %1419 = vmatpush1.bf16.msra.mxu0 %v1898_v28  ;;  %1525 = vmatpush1.bf16.msra.mxu1 %v1900_v29  ;;  %v1963_v28 = vcombine.high %v94_v22, %v98_v23  ;;  %v1965_v29 = vcombine.high %v95_v24, %v99_v25  ;;  %v151_v22 = vld [vmem:[%s3145_s1 + $0x418] sm:$0xff]  ;;  %v2012_v25 = vcombine.low %v143_v12, %v147_v13 }
  0x6b   :  { %1420 = vmatprep.subr.bf16.mxu0 %v1907_v31  ;;  %1526 = vmatprep.subr.bf16.mxu1 %v1909_v32  ;;  %v102_v31 = vld [vmem:[%s3145_s1 + $0x290] sm:$0xff]  ;;  %v155_v23 = vld [vmem:[%s3145_s1 + $0x438] sm:$0xff] }
  0x6c   :  { %v106_v32 = vld [vmem:[%s3145_s1 + $0x2b0] sm:$0xff] }
  0x6d   :  { %1300 = vmatmul.mubr.bf16.gmra.mrb[4].mxu0 %v2515_v35  ;;  %1406 = vmatmul.mubr.bf16.gmra.mrb[4].mxu1 %v2515_v35  ;;  %v1970_v44 = vcombine.low %v102_v31, %v106_v32 }
  0x6e   :  { %1421 = vmatpush1.bf16.msra.mxu0 %v1906_v38  ;;  %1527 = vmatpush1.bf16.msra.mxu1 %v1908_v39  ;;  %v1971_v38 = vcombine.high %v102_v31, %v106_v32  ;;  %v1973_v39 = vcombine.high %v103_v33, %v107_v34  ;;  %v159_v31 = vld [vmem:[%s3145_s1 + $0x458] sm:$0xff]  ;;  %v2020_v34 = vcombine.low %v151_v22, %v155_v23 }
  0x6f   :  { %1422 = vmatprep.subr.bf16.mxu0 %v1915_v40  ;;  %1528 = vmatprep.subr.bf16.mxu1 %v1917_v41  ;;  %v110_v40 = vld [vmem:[%s3145_s1 + $0x2d0] sm:$0xff]  ;;  %v163_v32 = vld [vmem:[%s3145_s1 + $0x478] sm:$0xff] }
  0x70   :  { %1448 = vmatprep.mubr.bf16.mxu0 %v2236_v56  ;;  %1554 = vmatprep.mubr.bf16.mxu1 %v2236_v56  ;;  %v71_v56 = vld [vmem:[%s3145_s1 + $0x198] sm:$0xff]  ;;  %v114_v41 = vld [vmem:[%s3145_s1 + $0x2f0] sm:$0xff] }
  0x71   :  { %v1941_v2 = vcombine.high %v71_v56, %v75_v62  ;;  %v1940_v8 = vcombine.low %v71_v56, %v75_v62  ;;  %v1978_v53 = vcombine.low %v110_v40, %v114_v41  ;;  %v1988_v62 = vcombine.low %v119_v51, %v123_v52 }
  0x72   :  { %1423 = vmatpush1.bf16.msra.mxu0 %v1914_v47  ;;  %1529 = vmatpush1.bf16.msra.mxu1 %v1916_v48  ;;  %v1979_v47 = vcombine.high %v110_v40, %v114_v41  ;;  %v1981_v48 = vcombine.high %v111_v42, %v115_v43  ;;  %v167_v40 = vld [vmem:[%s3145_s1 + $0x498] sm:$0xff]  ;;  %v2028_v43 = vcombine.low %v159_v31, %v163_v32 }
  0x73   :  { %1424 = vmatprep.subr.bf16.mxu0 %v1923_v49  ;;  %1530 = vmatprep.subr.bf16.mxu1 %v1925_v50  ;;  %v118_v49 = vld [vmem:[%s3145_s1 + $0x310] sm:$0xff]  ;;  %v171_v41 = vld [vmem:[%s3145_s1 + $0x4b8] sm:$0xff] }
  0x74   :  { %v122_v50 = vld [vmem:[%s3145_s1 + $0x330] sm:$0xff] }
  0x75   :  { %v1986_v56 = vcombine.low %v118_v49, %v122_v50 }
  0x76   :  { %1425 = vmatpush1.bf16.msra.mxu0 %v1922_v55  ;;  %1531 = vmatpush1.bf16.msra.mxu1 %v1924_v57  ;;  %v1987_v55 = vcombine.high %v118_v49, %v122_v50  ;;  %v1989_v57 = vcombine.high %v119_v51, %v123_v52  ;;  %v179_v49 = vld [vmem:[%s3145_s1 + $0x4f8] sm:$0xff]  ;;  %v2036_v51 = vcombine.low %v167_v40, %v171_v41 }
  0x77   :  { %1426 = vmatprep.subr.bf16.mxu0 %v1931_v58  ;;  %1532 = vmatprep.subr.bf16.mxu1 %v1933_v59  ;;  %v126_v58 = vld [vmem:[%s3145_s1 + $0x350] sm:$0xff] }
  0x78   :  { %v130_v59 = vld [vmem:[%s3145_s1 + $0x370] sm:$0xff] }
  0x79   :  { %v1994_v5 = vcombine.low %v126_v58, %v130_v59 }
  0x7a   :  { %1427 = vmatpush1.bf16.msra.mxu0 %v1930_v63  ;;  %1533 = vmatpush1.bf16.msra.mxu1 %v1932_v0  ;;  %v1995_v63 = vcombine.high %v126_v58, %v130_v59  ;;  %v1997_v0 = vcombine.high %v127_v60, %v131_v61 }
  0x7b   :  { %1428 = vmatprep.subr.bf16.mxu0 %v1939_v1  ;;  %1534 = vmatprep.subr.bf16.mxu1 %v1941_v2  ;;  %v134_v1 = vld [vmem:[%s3145_s1 + $0x390] sm:$0xff] }
  0x7c   :  { %v138_v2 = vld [vmem:[%s3145_s1 + $0x3b0] sm:$0xff] }
  0x7d   :  { %v2002_v14 = vcombine.low %v134_v1, %v138_v2 }
  0x7e   :  { %1429 = vmatpush1.bf16.msra.mxu0 %v1938_v7  ;;  %1535 = vmatpush1.bf16.msra.mxu1 %v1940_v8  ;;  %v2003_v7 = vcombine.high %v134_v1, %v138_v2  ;;  %v2005_v8 = vcombine.high %v135_v3, %v139_v4  ;;  %v198_v4 = vld [vmem:[%s3145_s1 + $0x590] sm:$0xff] }
  0x7f   :  { %1430 = vmatprep.subr.bf16.mxu0 %v1947_v9  ;;  %1536 = vmatprep.subr.bf16.mxu1 %v1949_v11  ;;  %v142_v9 = vld [vmem:[%s3145_s1 + $0x3d0] sm:$0xff] }
  0x80   :  { %v146_v11 = vld [vmem:[%s3145_s1 + $0x3f0] sm:$0xff] }
  0x81   :  { %v2010_v24 = vcombine.low %v142_v9, %v146_v11 }
  0x82   :  { %1431 = vmatpush1.bf16.msra.mxu0 %v1946_v17  ;;  %1537 = vmatpush1.bf16.msra.mxu1 %v1948_v18  ;;  %v2011_v17 = vcombine.high %v142_v9, %v146_v11  ;;  %v2013_v18 = vcombine.high %v143_v12, %v147_v13  ;;  %v206_v13 = vld [vmem:[%s3145_s1 + $0x5d0] sm:$0xff] }
  0x83   :  { %1432 = vmatprep.subr.bf16.mxu0 %v1955_v20  ;;  %1538 = vmatprep.subr.bf16.mxu1 %v1957_v21  ;;  %v150_v20 = vld [vmem:[%s3145_s1 + $0x410] sm:$0xff] }
  0x84   :  { %v154_v21 = vld [vmem:[%s3145_s1 + $0x430] sm:$0xff] }
  0x85   :  { %v2018_v33 = vcombine.low %v150_v20, %v154_v21 }
  0x86   :  { %1433 = vmatpush1.bf16.msra.mxu0 %v1954_v26  ;;  %1539 = vmatpush1.bf16.msra.mxu1 %v1956_v27  ;;  %v2019_v26 = vcombine.high %v150_v20, %v154_v21  ;;  %v2021_v27 = vcombine.high %v151_v22, %v155_v23 }
  0x87   :  { %1434 = vmatprep.subr.bf16.mxu0 %v1963_v28  ;;  %1540 = vmatprep.subr.bf16.mxu1 %v1965_v29  ;;  %v158_v28 = vld [vmem:[%s3145_s1 + $0x450] sm:$0xff] }
  0x88   :  { %v162_v29 = vld [vmem:[%s3145_s1 + $0x470] sm:$0xff] }
  0x89   :  { %v2026_v42 = vcombine.low %v158_v28, %v162_v29 }
  0x8a   :  { %1435 = vmatpush1.bf16.msra.mxu0 %v1962_v36  ;;  %1541 = vmatpush1.bf16.msra.mxu1 %v1964_v37  ;;  %v2027_v36 = vcombine.high %v158_v28, %v162_v29  ;;  %v2029_v37 = vcombine.high %v159_v31, %v163_v32 }
  0x8b   :  { %1436 = vmatprep.subr.bf16.mxu0 %v1971_v38  ;;  %1542 = vmatprep.subr.bf16.mxu1 %v1973_v39  ;;  %v166_v38 = vld [vmem:[%s3145_s1 + $0x490] sm:$0xff] }
  0x8c   :  { %v170_v39 = vld [vmem:[%s3145_s1 + $0x4b0] sm:$0xff] }
  0x8d   :  { %v2034_v50 = vcombine.low %v166_v38, %v170_v39 }
  0x8e   :  { %1437 = vmatpush1.bf16.msra.mxu0 %v1970_v44  ;;  %1543 = vmatpush1.bf16.msra.mxu1 %v1972_v46  ;;  %v2035_v44 = vcombine.high %v166_v38, %v170_v39  ;;  %v2037_v46 = vcombine.high %v167_v40, %v171_v41 }
  0x8f   :  { %1438 = vmatprep.subr.bf16.mxu0 %v1979_v47  ;;  %1544 = vmatprep.subr.bf16.mxu1 %v1981_v48  ;;  %v174_v47 = vld [vmem:[%s3145_s1 + $0x4d0] sm:$0xff] }
  0x90   :  { %v178_v48 = vld [vmem:[%s3145_s1 + $0x4f0] sm:$0xff] }
  0x91   :  { %v2043_v52 = vcombine.high %v174_v47, %v178_v48  ;;  %v2042_v58 = vcombine.low %v174_v47, %v178_v48 }
  0x92   :  { %1439 = vmatpush1.bf16.msra.mxu0 %v1978_v53  ;;  %1545 = vmatpush1.bf16.msra.mxu1 %v1980_v54  ;;  %v182_v54 = vld [vmem:[%s3145_s1 + $0x510] sm:$0xff] }
  0x93   :  { %1440 = vmatprep.subr.bf16.mxu0 %v1987_v55  ;;  %1546 = vmatprep.subr.bf16.mxu1 %v1989_v57  ;;  %v186_v55 = vld [vmem:[%s3145_s1 + $0x530] sm:$0xff]  ;;  %v187_v57 = vld [vmem:[%s3145_s1 + $0x538] sm:$0xff] }
  0x94   :  { %v2051_v60 = vcombine.high %v182_v54, %v186_v55 }
  0x96   :  { %1441 = vmatpush1.bf16.msra.mxu0 %v1986_v56  ;;  %1547 = vmatpush1.bf16.msra.mxu1 %v1988_v62  ;;  %v190_v56 = vld [vmem:[%s3145_s1 + $0x550] sm:$0xff] }
  0x97   :  { %1442 = vmatprep.subr.bf16.mxu0 %v1995_v63  ;;  %1548 = vmatprep.subr.bf16.mxu1 %v1997_v0  ;;  %v194_v62 = vld [vmem:[%s3145_s1 + $0x570] sm:$0xff]  ;;  %v195_v63 = vld [vmem:[%s3145_s1 + $0x578] sm:$0xff]  ;;  %v2050_v0 = vcombine.low %v182_v54, %v186_v55 }
  0x98   :  { %v2059_v2 = vcombine.high %v190_v56, %v194_v62 }
  0x9a   :  { %1443 = vmatpush1.bf16.msra.mxu0 %v1994_v5  ;;  %1549 = vmatpush1.bf16.msra.mxu1 %v1996_v6  ;;  %v202_v5 = vld [vmem:[%s3145_s1 + $0x5b0] sm:$0xff]  ;;  %v199_v6 = vld [vmem:[%s3145_s1 + $0x598] sm:$0xff] }
  0x9b   :  { %1444 = vmatprep.subr.bf16.mxu0 %v2003_v7  ;;  %1550 = vmatprep.subr.bf16.mxu1 %v2005_v8  ;;  %v203_v7 = vld [vmem:[%s3145_s1 + $0x5b8] sm:$0xff]  ;;  %v2058_v8 = vcombine.low %v190_v56, %v194_v62  ;;  %v2067_v11 = vcombine.high %v198_v4, %v202_v5 }
  0x9c   :  { %v2069_v12 = vcombine.high %v199_v6, %v203_v7  ;;  %v2068_v20 = vcombine.low %v199_v6, %v203_v7 }
  0x9e   :  { %1445 = vmatpush1.bf16.msra.mxu0 %v2002_v14  ;;  %1551 = vmatpush1.bf16.msra.mxu1 %v2004_v15  ;;  %v210_v14 = vld [vmem:[%s3145_s1 + $0x5f0] sm:$0xff]  ;;  %v207_v15 = vld [vmem:[%s3145_s1 + $0x5d8] sm:$0xff] }
  0x9f   :  { %1446 = vmatprep.subr.bf16.mxu0 %v2011_v17  ;;  %1552 = vmatprep.subr.bf16.mxu1 %v2013_v18  ;;  %v211_v17 = vld [vmem:[%s3145_s1 + $0x5f8] sm:$0xff]  ;;  %v2066_v18 = vcombine.low %v198_v4, %v202_v5  ;;  %v2075_v21 = vcombine.high %v206_v13, %v210_v14  ;;  %v2074_v23 = vcombine.low %v206_v13, %v210_v14 }
  0xa0   :  { %v2077_v22 = vcombine.high %v207_v15, %v211_v17 }
  0xa2   :  { %1447 = vmatpush1.bf16.msra.mxu0 %v2010_v24  ;;  %1553 = vmatpush1.bf16.msra.mxu1 %v2012_v25  ;;  %v2076_v24 = vcombine.low %v207_v15, %v211_v17 }
  0xa3   :  { %1469 = vmatprep.subr.bf16.mxu0 %v2019_v26  ;;  %1575 = vmatprep.subr.bf16.mxu1 %v2021_v27 }
  0xa5   :  { %1449 = vmatmul.mubr.bf16.vlgmr.msra.gmra.mrb[8].mxu0 %v2363_v10  ;;  %1555 = vmatmul.mubr.bf16.vlgmr.msra.gmra.mrb[8].mxu1 %v2363_v10  ;;  %v175_v10 = vld [vmem:[%s3145_s1 + $0x4d8] sm:$0xff] }
  0xa6   :  { %1470 = vmatpush1.bf16.msra.mxu0 %v2018_v33  ;;  %1576 = vmatpush1.bf16.msra.mxu1 %v2020_v34  ;;  %v2045_v53 = vcombine.high %v175_v10, %v179_v49  ;;  %v2044_v59 = vcombine.low %v175_v10, %v179_v49 }
  0xa7   :  { %1471 = vmatprep.subr.bf16.mxu0 %v2027_v36  ;;  %1577 = vmatprep.subr.bf16.mxu1 %v2029_v37 }
  0xa8   :  { %1458 = vmatprep.mubr.bf16.mxu0 %v2380_v19  ;;  %1564 = vmatprep.mubr.bf16.mxu1 %v2380_v19  ;;  %v183_v19 = vld [vmem:[%s3145_s1 + $0x518] sm:$0xff] }
  0xa9   :  { %v2053_v61 = vcombine.high %v183_v19, %v187_v57  ;;  %v2052_v1 = vcombine.low %v183_v19, %v187_v57 }
  0xaa   :  { %1472 = vmatpush1.bf16.msra.mxu0 %v2026_v42  ;;  %1578 = vmatpush1.bf16.msra.mxu1 %v2028_v43 }
  0xab   :  { %1473 = vmatprep.subr.bf16.mxu0 %v2035_v44  ;;  %1579 = vmatprep.subr.bf16.mxu1 %v2037_v46 }
  0xad   :  { %1459 = vmatmul.mubr.bf16.gmra.mrb[12].mxu0 %v2407_v30  ;;  %1565 = vmatmul.mubr.bf16.gmra.mrb[12].mxu1 %v2407_v30  ;;  %v191_v30 = vld [vmem:[%s3145_s1 + $0x558] sm:$0xff] }
  0xae   :  { %1474 = vmatpush1.bf16.msra.mxu0 %v2034_v50  ;;  %1580 = vmatpush1.bf16.msra.mxu1 %v2036_v51  ;;  %v2061_v3 = vcombine.high %v191_v30, %v195_v63  ;;  %v2060_v9 = vcombine.low %v191_v30, %v195_v63 }
  0xaf   :  { %1475 = vmatprep.subr.bf16.mxu0 %v2043_v52  ;;  %1581 = vmatprep.subr.bf16.mxu1 %v2045_v53 }
  0xb0   :  { %1501 = vmatprep.mubr.bf16.mxu0 %v2127_v45  ;;  %1607 = vmatprep.mubr.bf16.mxu1 %v2127_v45 }
  0xb2   :  { %1476 = vmatpush1.bf16.msra.mxu0 %v2042_v58  ;;  %1582 = vmatpush1.bf16.msra.mxu1 %v2044_v59 }
  0xb3   :  { %1477 = vmatprep.subr.bf16.mxu0 %v2051_v60  ;;  %1583 = vmatprep.subr.bf16.mxu1 %v2053_v61 }
  0xb6   :  { %1478 = vmatpush1.bf16.msra.mxu0 %v2050_v0  ;;  %1584 = vmatpush1.bf16.msra.mxu1 %v2052_v1 }
  0xb7   :  { %1479 = vmatprep.subr.bf16.mxu0 %v2059_v2  ;;  %1585 = vmatprep.subr.bf16.mxu1 %v2061_v3 }
  0xba   :  { %1480 = vmatpush1.bf16.msra.mxu0 %v2058_v8  ;;  %1586 = vmatpush1.bf16.msra.mxu1 %v2060_v9 }
  0xbb   :  { %1481 = vmatprep.subr.bf16.mxu0 %v2067_v11  ;;  %1587 = vmatprep.subr.bf16.mxu1 %v2069_v12 }
  0xbe   :  { %1482 = vmatpush1.bf16.msra.mxu0 %v2066_v18  ;;  %1588 = vmatpush1.bf16.msra.mxu1 %v2068_v20 }
  0xbf   :  { %1483 = vmatprep.subr.bf16.mxu0 %v2075_v21  ;;  %1589 = vmatprep.subr.bf16.mxu1 %v2077_v22 }
  0xc2   :  { %1484 = vmatpush1.bf16.msra.mxu0 %v2074_v23  ;;  %1590 = vmatpush1.bf16.msra.mxu1 %v2076_v24 }
  0xc5   :  { %1502 = vmatmul.mubr.bf16.vlgmr.msra.gmra.mrb[8].mxu0 %v2482_v16  ;;  %1608 = vmatmul.mubr.bf16.vlgmr.msra.gmra.mrb[8].mxu1 %v2482_v16 }
  0xc6   :  { %1511 = vmatprep.mubr.bf16.mxu0 %v2127_v45  ;;  %1617 = vmatprep.mubr.bf16.mxu1 %v2127_v45 }
  0xcd   :  { %1512 = vmatmul.mubr.bf16.gmra.mrb[12].mxu0 %v2515_v35  ;;  %1618 = vmatmul.mubr.bf16.gmra.mrb[12].mxu1 %v2515_v35 }
 0x138   :  { %v2781_v25 = vpop.f32.mrb[0].mxu0  ;;  %v2783_v26 = vpop.f32.mrb[0].mxu1 }
 0x139   :  { %v2785_v27 = vpop.f32.mrb[1].mxu0  ;;  %v2789_v29 = vpop.f32.mrb[1].mxu1 }
 0x13a   :  { %v1628_v28 = vadd.f32 %v2785_v27, %v2781_v25  ;;  %v2791_v16 = vpop.f32.mrb[2].mxu0  ;;  %v2793_v31 = vpop.f32.mrb[2].mxu1 }
 0x13b   :  { %v2795_v45 = vpop.f32.mrb[3].mxu0  ;;  %v2800_v33 = vpop.f32.mrb[3].mxu1 }
 0x13c   :  { %v1629_v32 = vadd.f32 %v1628_v28, %v2783_v26  ;;  %v1637_v35 = vadd.f32 %v2795_v45, %v2791_v16 }
 0x13e   :  { %v1630_v34 = vadd.f32 %v1629_v32, %v2789_v29  ;;  %v1638_v36 = vadd.f32 %v1637_v35, %v2793_v31 }
 0x140   :  { %v1639_v37 = vadd.f32 %v1638_v36, %v2800_v33  ;;  %v2805_v38 = vpop.f32.mrb[4].mxu0  ;;  %v2807_v39 = vpop.f32.mrb[4].mxu1 }
 0x141   :  { %v2809_v40 = vpop.f32.mrb[5].mxu0  ;;  %v2813_v42 = vpop.f32.mrb[5].mxu1 }
 0x142   :  { %v1646_v41 = vadd.f32 %v2809_v40, %v2805_v38  ;;  %v2815_v43 = vpop.f32.mrb[6].mxu0  ;;  %v2817_v44 = vpop.f32.mrb[6].mxu1 }
 0x143   :  { %v2819_v46 = vpop.f32.mrb[7].mxu0  ;;  %v2824_v10 = vpop.f32.mrb[7].mxu1 }
 0x144   :  { %v1647_v47 = vadd.f32 %v1646_v41, %v2807_v39  ;;  %v1655_v48 = vadd.f32 %v2819_v46, %v2815_v43 }
 0x146   :  { %v1648_v49 = vadd.f32 %v1647_v47, %v2813_v42  ;;  %v1656_v50 = vadd.f32 %v1655_v48, %v2817_v44 }
 0x148   :  { %v1657_v51 = vadd.f32 %v1656_v50, %v2824_v10 }
 0x198   :  { %v1503_v52 = vpop.f32.mrb[8].mxu0  ;;  %v1609_v54 = vpop.f32.mrb[8].mxu1 }
 0x199   :  { %v1631_v53 = vadd.f32 %v1630_v34, %v1503_v52  ;;  %v1505_v55 = vpop.f32.mrb[9].mxu0  ;;  %v1611_v19 = vpop.f32.mrb[9].mxu1 }
 0x19a   :  { %v1507_v57 = vpop.f32.mrb[10].mxu0  ;;  %v2829_v60 = vpop.f32.mrb[10].mxu1 }
 0x19b   :  { %v1632_v58 = vadd.f32 %v1631_v53, %v1505_v55  ;;  %v1640_v59 = vadd.f32 %v1639_v37, %v1507_v57  ;;  %v2831_v61 = vpop.f32.mrb[11].mxu0  ;;  %v2833_v56 = vpop.f32.mrb[11].mxu1 }
 0x19d   :  { %v1641_v62 = vadd.f32 %v1640_v59, %v2831_v61  ;;  %v1633_v30 = vadd.f32 %v1632_v58, %v1609_v54 }
 0x19f   :  { %v1634_v63 = vadd.f32 %v1633_v30, %v1611_v19  ;;  %v1642_v0 = vadd.f32 %v1641_v62, %v2829_v60 }
 0x1a0   :  { %v2837_v1 = vpop.f32.mrb[12].mxu0  ;;  %v2840_v3 = vpop.f32.mrb[12].mxu1 }
 0x1a1   :  { %v1649_v2 = vadd.f32 %v1648_v49, %v2837_v1  ;;  %1635 = vadd.xlane.f32.xlu0 %v1634_v63  ;;  %v2842_v4 = vpop.f32.mrb[13].mxu0  ;;  %v1643_v5 = vadd.f32 %v1642_v0, %v2833_v56  ;;  %v2845_v6 = vpop.f32.mrb[13].mxu1 }
 0x1a2   :  { %v2847_v7 = vpop.f32.mrb[14].mxu0  ;;  %v2851_v11 = vpop.f32.mrb[14].mxu1 }
 0x1a3   :  { %v1650_v8 = vadd.f32 %v1649_v2, %v2842_v4  ;;  %v1658_v9 = vadd.f32 %v1657_v51, %v2847_v7  ;;  %v2853_v12 = vpop.f32.mrb[15].mxu0  ;;  %v2855_v13 = vpop.f32.mrb[15].mxu1 }
 0x1a5   :  { %v1659_v14 = vadd.f32 %v1658_v9, %v2853_v12  ;;  %1644 = vadd.xlane.f32.xlu0 %v1643_v5  ;;  %v1651_v15 = vadd.f32 %v1650_v8, %v2840_v3 }
 0x1a7   :  { %v1660_v17 = vadd.f32 %v1659_v14, %v2851_v11  ;;  %v1652_v18 = vadd.f32 %v1651_v15, %v2845_v6 }
 0x1a9   :  { %v1661_v20 = vadd.f32 %v1660_v17, %v2855_v13  ;;  %1653 = vadd.xlane.f32.xlu1 %v1652_v18 }
 0x1ad   :  { %1662 = vadd.xlane.f32.xlu1 %v1661_v20 }
 0x22e   :  { %v1636_v21 = vpop.xlane.xlu0 %1635 }
 0x22f   :  { %v1664_v22 = vmul.f32 0.0009765625, %v1636_v21 }
 0x231   :  { %v2863_v23 = vsub.f32 %v2781_v25, %v1664_v22  ;;  %v2866_v24 = vsub.f32 %v2785_v27, %v1664_v22  ;;  %v2869_v28 = vsub.f32 %v2783_v26, %v1664_v22  ;;  %v2872_v34 = vsub.f32 %v2789_v29, %v1664_v22 }
 0x232   :  { %v1645_v32 = vpop.xlane.xlu0 %1644  ;;  %v2878_v41 = vsub.f32 %v1503_v52, %v1664_v22  ;;  %v2880_v25 = vsub.f32 %v1505_v55, %v1664_v22  ;;  %v2893_v51 = vsub.f32 %v1609_v54, %v1664_v22  ;;  %v2897_v55 = vsub.f32 %v1611_v19, %v1664_v22 }
 0x233   :  { %v1665_v35 = vmul.f32 0.0009765625, %v1645_v32  ;;  %v1700_v36 = vmul.f32 %v2863_v23, %v2863_v23  ;;  %v1701_v37 = vmul.f32 %v2866_v24, %v2866_v24  ;;  %v1702_v27 = vmul.f32 %v2869_v28, %v2869_v28 }
 0x234   :  { %v1703_v52 = vmul.f32 %v2872_v34, %v2872_v34  ;;  %v1705_v54 = vmul.f32 %v2880_v25, %v2880_v25  ;;  %v1706_v2 = vmul.f32 %v2893_v51, %v2893_v51  ;;  %v1707_v14 = vmul.f32 %v2897_v55, %v2897_v55 }
 0x235   :  { %v1732_v26 = vadd.f32 %v1701_v37, %v1700_v36  ;;  %v2885_v47 = vsub.f32 %v2791_v16, %v1665_v35  ;;  %v2888_v29 = vsub.f32 %v2795_v45, %v1665_v35  ;;  %v2891_v49 = vsub.f32 %v2793_v31, %v1665_v35 }
 0x236   :  { %v1654_v48 = vpop.xlane.xlu1 %1653  ;;  %v2900_v58 = vsub.f32 %v2800_v33, %v1665_v35  ;;  %v1704_v31 = vmul.f32 %v2878_v41, %v2878_v41  ;;  %v2910_v62 = vsub.f32 %v1507_v57, %v1665_v35  ;;  %v2923_v8 = vsub.f32 %v2831_v61, %v1665_v35 }
 0x237   :  { %v1666_v50 = vmul.f32 0.0009765625, %v1654_v48  ;;  %v1733_v53 = vadd.f32 %v1732_v26, %v1702_v27  ;;  %v1708_v16 = vmul.f32 %v2885_v47, %v2885_v47  ;;  %v1709_v45 = vmul.f32 %v2888_v29, %v2888_v29 }
 0x238   :  { %v1710_v33 = vmul.f32 %v2891_v49, %v2891_v49  ;;  %v2933_v17 = vsub.f32 %v2829_v60, %v1665_v35  ;;  %v1712_v20 = vmul.f32 %v2910_v62, %v2910_v62  ;;  %v1713_v60 = vmul.f32 %v2923_v8, %v2923_v8 }
 0x239   :  { %v1734_v59 = vadd.f32 %v1733_v53, %v1703_v52  ;;  %v1741_v30 = vadd.f32 %v1709_v45, %v1708_v16  ;;  %v2915_v63 = vsub.f32 %v2805_v38, %v1666_v50  ;;  %v2918_v0 = vsub.f32 %v2809_v40, %v1666_v50 }
 0x23a   :  { %v1663_v19 = vpop.xlane.xlu1 %1662  ;;  %v2926_v57 = vsub.f32 %v2807_v39, %v1666_v50  ;;  %v1711_v38 = vmul.f32 %v2900_v58, %v2900_v58  ;;  %v2940_v39 = vsub.f32 %v2833_v56, %v1665_v35  ;;  %v2945_v22 = vsub.f32 %v2813_v42, %v1666_v50 }
 0x23b   :  { %v1735_v5 = vadd.f32 %v1734_v59, %v1704_v31  ;;  %v1667_v9 = vmul.f32 0.0009765625, %v1663_v19  ;;  %v1742_v15 = vadd.f32 %v1741_v30, %v1710_v33  ;;  %v1716_v18 = vmul.f32 %v2915_v63, %v2915_v63 }
 0x23c   :  { %v1717_v61 = vmul.f32 %v2918_v0, %v2918_v0  ;;  %v2950_v36 = vsub.f32 %v2837_v1, %v1666_v50  ;;  %v1718_v37 = vmul.f32 %v2926_v57, %v2926_v57  ;;  %v1714_v48 = vmul.f32 %v2933_v17, %v2933_v17 }
 0x23d   :  { %v1736_v40 = vadd.f32 %v1735_v5, %v1705_v54  ;;  %v1743_v21 = vadd.f32 %v1742_v15, %v1711_v38  ;;  %v2955_v35 = vsub.f32 %v2815_v43, %v1667_v9  ;;  %v2958_v26 = vsub.f32 %v2819_v46, %v1667_v9 }
 0x23e   :  { %v1750_v56 = vadd.f32 %v1717_v61, %v1716_v18  ;;  %v2963_v52 = vsub.f32 %v2817_v44, %v1667_v9  ;;  %v2966_v53 = vsub.f32 %v2842_v4, %v1666_v50  ;;  %v1719_v16 = vmul.f32 %v2945_v22, %v2945_v22 }
 0x23f   :  { %v1737_v32 = vadd.f32 %v1736_v40, %v1706_v2  ;;  %v1744_v27 = vadd.f32 %v1743_v21, %v1712_v20  ;;  %v1715_v43 = vmul.f32 %v2940_v39, %v2940_v39  ;;  %v2973_v46 = vsub.f32 %v2824_v10, %v1667_v9 }
 0x240   :  { %v1751_v45 = vadd.f32 %v1750_v56, %v1718_v37  ;;  %v1724_v31 = vmul.f32 %v2955_v35, %v2955_v35  ;;  %v1725_v44 = vmul.f32 %v2958_v26, %v2958_v26  ;;  %v2980_v4 = vsub.f32 %v2840_v3, %v1666_v50 }
 0x241   :  { %v1738_v42 = vadd.f32 %v1737_v32, %v1707_v14  ;;  %v1745_v1 = vadd.f32 %v1744_v27, %v1713_v60  ;;  %v1720_v59 = vmul.f32 %v2950_v36, %v2950_v36  ;;  %v2985_v33 = vsub.f32 %v2847_v7, %v1667_v9 }
 0x242   :  { %v1752_v19 = vadd.f32 %v1751_v45, %v1719_v16  ;;  %v1726_v10 = vmul.f32 %v2963_v52, %v2963_v52  ;;  %v1759_v30 = vadd.f32 %v1725_v44, %v1724_v31  ;;  %v2990_v5 = vsub.f32 %v2845_v6, %v1666_v50 }
 0x243   :  { %1739 = vadd.xlane.f32.xlu0 %v1738_v42  ;;  %v1746_v54 = vadd.f32 %v1745_v1, %v1714_v48  ;;  %v1721_v14 = vmul.f32 %v2966_v53, %v2966_v53  ;;  %v2995_v38 = vsub.f32 %v2853_v12, %v1667_v9  ;;  %v1727_v15 = vmul.f32 %v2973_v46, %v2973_v46 }
 0x244   :  { %v1753_v3 = vadd.f32 %v1752_v19, %v1720_v59  ;;  %v1760_v7 = vadd.f32 %v1759_v30, %v1726_v10  ;;  %v1722_v40 = vmul.f32 %v2980_v4, %v2980_v4  ;;  %v3002_v61 = vsub.f32 %v2851_v11, %v1667_v9 }
 0x245   :  { %v1747_v2 = vadd.f32 %v1746_v54, %v1715_v43  ;;  %v1728_v6 = vmul.f32 %v2985_v33, %v2985_v33  ;;  %v1723_v12 = vmul.f32 %v2990_v5, %v2990_v5  ;;  %v3009_v21 = vsub.f32 %v2855_v13, %v1667_v9 }
 0x246   :  { %v1754_v18 = vadd.f32 %v1753_v3, %v1721_v14  ;;  %v1761_v50 = vadd.f32 %v1760_v7, %v1727_v15  ;;  %v1729_v32 = vmul.f32 %v2995_v38, %v2995_v38  ;;  %v1730_v11 = vmul.f32 %v3002_v61, %v3002_v61 }
 0x247   :  { %1748 = vadd.xlane.f32.xlu1 %v1747_v2  ;;  %v1731_v56 = vmul.f32 %v3009_v21, %v3009_v21 }
 0x248   :  { %v1755_v20 = vadd.f32 %v1754_v18, %v1722_v40  ;;  %v1762_v60 = vadd.f32 %v1761_v50, %v1728_v6 }
 0x24a   :  { %v1756_v37 = vadd.f32 %v1755_v20, %v1723_v12  ;;  %v1763_v27 = vadd.f32 %v1762_v60, %v1729_v32 }
 0x24c   :  { %1757 = vadd.xlane.f32.xlu0 %v1756_v37  ;;  %v1764_v42 = vadd.f32 %v1763_v27, %v1730_v11 }
 0x24e   :  { %v1765_v48 = vadd.f32 %v1764_v42, %v1731_v56 }
 0x250   :  { %1766 = vadd.xlane.f32.xlu1 %v1765_v48 }
 0x2d0   :  { %v1740_v1 = vpop.xlane.xlu0 %1739 }
 0x2d1   :  { %v1768_v16 = vmul.f32 0.0009765625, %v1740_v1 }
 0x2d3   :  { %v1772_v13 = vadd.f32 1e-05, %v1768_v16 }
 0x2d4   :  { %v1749_v9 = vpop.xlane.xlu1 %1748 }
 0x2d5   :  { %2119 = vrsqrt.f32 %v1772_v13  ;;  %v1769_v45 = vmul.f32 0.0009765625, %v1749_v9 }
 0x2d7   :  { %v1773_v43 = vadd.f32 1e-05, %v1769_v45 }
 0x2d9   :  { %2121 = vrsqrt.f32 %v1773_v43  ;;  %v1758_v31 = vpop.xlane.xlu0 %1757 }
 0x2da   :  { %v1770_v44 = vmul.f32 0.0009765625, %v1758_v31 }
 0x2dc   :  { %v1774_v59 = vadd.f32 1e-05, %v1770_v44 }
 0x2dd   :  { %v1767_v40 = vpop.xlane.xlu1 %1766 }
 0x2de   :  { %2123 = vrsqrt.f32 %v1774_v59 }
 0x2df   :  { %v2120_v54 = vpop.eup %2119 }
 0x2e0   :  { %v1780_v19 = vmul.f32 %v2120_v54, %v2863_v23  ;;  %v1781_v10 = vmul.f32 %v2120_v54, %v2866_v24  ;;  %v1782_v30 = vmul.f32 %v2120_v54, %v2869_v28  ;;  %v1783_v2 = vmul.f32 %v2120_v54, %v2872_v34 }
 0x2e1   :  { %v1784_v14 = vmul.f32 %v2120_v54, %v2878_v41  ;;  %v1785_v3 = vmul.f32 %v2120_v54, %v2880_v25  ;;  %v1786_v15 = vmul.f32 %v2120_v54, %v2893_v51  ;;  %v1787_v7 = vmul.f32 %v2120_v54, %v2897_v55 }
 0x2e2   :  { %v1812_v18 = vmax.f32 %v1780_v19, 0.0  ;;  %v1813_v6 = vmax.f32 %v1781_v10, 0.0  ;;  %v1814_v50 = vmax.f32 %v1782_v30, 0.0  ;;  %v1815_v12 = vmax.f32 %v1783_v2, 0.0 }
 0x2e3   :  { %v1816_v23 = vmax.f32 %v1784_v14, 0.0  ;;  %v1817_v20 = vmax.f32 %v1785_v3, 0.0  ;;  %v1818_v24 = vmax.f32 %v1786_v15, 0.0  ;;  %v1819_v32 = vmax.f32 %v1787_v7, 0.0  ;;  %v2122_v28 = vpop.eup %2121 }
 0x2e4   :  { %1844 = vst [vmem:[%s3147_s2] sm:$0xff] %v1812_v18  ;;  %1845 = vst [vmem:[%s3147_s2 + $0x8] sm:$0xff] %v1813_v6  ;;  %v1771_v34 = vmul.f32 0.0009765625, %v1767_v40  ;;  %v1788_v41 = vmul.f32 %v2122_v28, %v2885_v47  ;;  %v1789_v25 = vmul.f32 %v2122_v28, %v2888_v29  ;;  %v1790_v51 = vmul.f32 %v2122_v28, %v2891_v49 }
 0x2e5   :  { %1846 = vst [vmem:[%s3147_s2 + $0x10] sm:$0xff] %v1814_v50  ;;  %1847 = vst [vmem:[%s3147_s2 + $0x18] sm:$0xff] %v1815_v12  ;;  %v1791_v55 = vmul.f32 %v2122_v28, %v2900_v58  ;;  %v1792_v60 = vmul.f32 %v2122_v28, %v2910_v62  ;;  %v1793_v37 = vmul.f32 %v2122_v28, %v2923_v8 }
 0x2e6   :  { %1848 = vst [vmem:[%s3147_s2 + $0x20] sm:$0xff] %v1816_v23  ;;  %1849 = vst [vmem:[%s3147_s2 + $0x28] sm:$0xff] %v1817_v20  ;;  %v1794_v11 = vmul.f32 %v2122_v28, %v2933_v17  ;;  %v1795_v27 = vmul.f32 %v2122_v28, %v2940_v39  ;;  %v1820_v56 = vmax.f32 %v1788_v41, 0.0  ;;  %v1821_v42 = vmax.f32 %v1789_v25, 0.0 }
 0x2e7   :  { %1850 = vst [vmem:[%s3147_s2 + $0x30] sm:$0xff] %v1818_v24  ;;  %1851 = vst [vmem:[%s3147_s2 + $0x38] sm:$0xff] %v1819_v32  ;;  %v1822_v48 = vmax.f32 %v1790_v51, 0.0  ;;  %v1823_v1 = vmax.f32 %v1791_v55, 0.0  ;;  %v1824_v16 = vmax.f32 %v1792_v60, 0.0  ;;  %v1825_v47 = vmax.f32 %v1793_v37, 0.0 }
 0x2e8   :  { %v1826_v13 = vmax.f32 %v1794_v11, 0.0  ;;  %v1827_v29 = vmax.f32 %v1795_v27, 0.0  ;;  %1852 = vst [vmem:[%s3147_s2 + $0x40] sm:$0xff] %v1820_v56  ;;  %1853 = vst [vmem:[%s3147_s2 + $0x48] sm:$0xff] %v1821_v42  ;;  %v1775_v49 = vadd.f32 1e-05, %v1771_v34  ;;  %v2124_v58 = vpop.eup %2123 }
 0x2e9   :  { %1854 = vst [vmem:[%s3147_s2 + $0x50] sm:$0xff] %v1822_v48  ;;  %1855 = vst [vmem:[%s3147_s2 + $0x58] sm:$0xff] %v1823_v1  ;;  %v1796_v62 = vmul.f32 %v2124_v58, %v2915_v63  ;;  %v1797_v8 = vmul.f32 %v2124_v58, %v2918_v0  ;;  %v1798_v17 = vmul.f32 %v2124_v58, %v2926_v57 }
 0x2ea   :  { %1856 = vst [vmem:[%s3147_s2 + $0x60] sm:$0xff] %v1824_v16  ;;  %1857 = vst [vmem:[%s3147_s2 + $0x68] sm:$0xff] %v1825_v47  ;;  %2125 = vrsqrt.f32 %v1775_v49  ;;  %v1799_v39 = vmul.f32 %v2124_v58, %v2945_v22  ;;  %v1800_v9 = vmul.f32 %v2124_v58, %v2950_v36  ;;  %v1801_v45 = vmul.f32 %v2124_v58, %v2966_v53 }
 0x2eb   :  { %1858 = vst [vmem:[%s3147_s2 + $0x70] sm:$0xff] %v1826_v13  ;;  %1859 = vst [vmem:[%s3147_s2 + $0x78] sm:$0xff] %v1827_v29  ;;  %v1802_v43 = vmul.f32 %v2124_v58, %v2980_v4  ;;  %v1803_v31 = vmul.f32 %v2124_v58, %v2990_v5  ;;  %v1828_v44 = vmax.f32 %v1796_v62, 0.0  ;;  %v1829_v54 = vmax.f32 %v1797_v8, 0.0 }
 0x2ec   :  { %v1830_v59 = vmax.f32 %v1798_v17, 0.0  ;;  %v1831_v19 = vmax.f32 %v1799_v39, 0.0  ;;  %v1832_v10 = vmax.f32 %v1800_v9, 0.0  ;;  %v1833_v63 = vmax.f32 %v1801_v45, 0.0 }
 0x2ed   :  { %v1834_v30 = vmax.f32 %v1802_v43, 0.0  ;;  %v1835_v0 = vmax.f32 %v1803_v31, 0.0  ;;  %1860 = vst [vmem:[%s3147_s2 + $0x80] sm:$0xff] %v1828_v44  ;;  %1861 = vst [vmem:[%s3147_s2 + $0x88] sm:$0xff] %v1829_v54 }
 0x2ee   :  { %1862 = vst [vmem:[%s3147_s2 + $0x90] sm:$0xff] %v1830_v59  ;;  %1863 = vst [vmem:[%s3147_s2 + $0x98] sm:$0xff] %v1831_v19 }
 0x2ef   :  { %1864 = vst [vmem:[%s3147_s2 + $0xa0] sm:$0xff] %v1832_v10  ;;  %1865 = vst [vmem:[%s3147_s2 + $0xa8] sm:$0xff] %v1833_v63 }
 0x2f0   :  { %1866 = vst [vmem:[%s3147_s2 + $0xb0] sm:$0xff] %v1834_v30  ;;  %1867 = vst [vmem:[%s3147_s2 + $0xb8] sm:$0xff] %v1835_v0 }
 0x2f4   :  { %v2126_v57 = vpop.eup %2125 }
 0x2f5   :  { %v1804_v22 = vmul.f32 %v2126_v57, %v2955_v35  ;;  %v1805_v36 = vmul.f32 %v2126_v57, %v2958_v26  ;;  %v1806_v53 = vmul.f32 %v2126_v57, %v2963_v52  ;;  %v1807_v4 = vmul.f32 %v2126_v57, %v2973_v46 }
 0x2f6   :  { %v1808_v5 = vmul.f32 %v2126_v57, %v2985_v33  ;;  %v1809_v2 = vmul.f32 %v2126_v57, %v2995_v38  ;;  %v1810_v14 = vmul.f32 %v2126_v57, %v3002_v61  ;;  %v1811_v3 = vmul.f32 %v2126_v57, %v3009_v21 }
 0x2f7   :  { %v1836_v15 = vmax.f32 %v1804_v22, 0.0  ;;  %v1837_v7 = vmax.f32 %v1805_v36, 0.0  ;;  %v1838_v40 = vmax.f32 %v1806_v53, 0.0  ;;  %v1839_v18 = vmax.f32 %v1807_v4, 0.0 }
 0x2f8   :  { %v1840_v6 = vmax.f32 %v1808_v5, 0.0  ;;  %v1841_v35 = vmax.f32 %v1809_v2, 0.0  ;;  %v1842_v50 = vmax.f32 %v1810_v14, 0.0  ;;  %v1843_v26 = vmax.f32 %v1811_v3, 0.0 }
 0x2f9   :  { %1868 = vst [vmem:[%s3147_s2 + $0xc0] sm:$0xff] %v1836_v15  ;;  %1869 = vst [vmem:[%s3147_s2 + $0xc8] sm:$0xff] %v1837_v7 }
 0x2fa   :  { %1870 = vst [vmem:[%s3147_s2 + $0xd0] sm:$0xff] %v1838_v40  ;;  %1871 = vst [vmem:[%s3147_s2 + $0xd8] sm:$0xff] %v1839_v18 }
 0x2fb   :  { %1872 = vst [vmem:[%s3147_s2 + $0xe0] sm:$0xff] %v1840_v6  ;;  %1873 = vst [vmem:[%s3147_s2 + $0xe8] sm:$0xff] %v1841_v35 }
 0x2fc   :  { %1874 = vst [vmem:[%s3147_s2 + $0xf0] sm:$0xff] %v1842_v50  ;;  %1875 = vst [vmem:[%s3147_s2 + $0xf8] sm:$0xff] %v1843_v26 }

// kernel: resnet2_forward.13
= control target key start
LH: loop header
LB: loop body
LE: loop exit
PB: predicated region body
PF: predicated region fallthrough
CT: control target
= control target key end

     0   :  { %s574_s0 = inlined_call_operand.vmem [shape: f32[27,32,128], index: 0, kind: input, shape index: {}]   ;;  %s575_s1 = inlined_call_operand.vmem [shape: f32[32,128], index: 1, kind: output, shape index: {}]  }
   0x1   :  { %v8_v0 = vld [vmem:[%s574_s0] sm:$0xff]  ;;  %v9_v12 = vld [vmem:[%s574_s0 + $0x8] sm:$0xff]  ;;  %v10_v33 = vld [vmem:[%s574_s0 + $0x10] sm:$0xff] }
   0x2   :  { %v12_v1 = vld [vmem:[%s574_s0 + $0x20] sm:$0xff]  ;;  %v13_v13 = vld [vmem:[%s574_s0 + $0x28] sm:$0xff]  ;;  %v14_v34 = vld [vmem:[%s574_s0 + $0x30] sm:$0xff] }
   0x3   :  { %v16_v2 = vld [vmem:[%s574_s0 + $0x40] sm:$0xff]  ;;  %v116_v3 = vmax.f32 %v8_v0, %v12_v1  ;;  %v17_v14 = vld [vmem:[%s574_s0 + $0x48] sm:$0xff]  ;;  %v142_v16 = vmax.f32 %v9_v12, %v13_v13  ;;  %v18_v35 = vld [vmem:[%s574_s0 + $0x50] sm:$0xff]  ;;  %v168_v38 = vmax.f32 %v10_v33, %v14_v34 }
   0x4   :  { %v20_v4 = vld [vmem:[%s574_s0 + $0x60] sm:$0xff]  ;;  %v21_v18 = vld [vmem:[%s574_s0 + $0x68] sm:$0xff]  ;;  %v22_v41 = vld [vmem:[%s574_s0 + $0x70] sm:$0xff] }
   0x5   :  { %v117_v5 = vmax.f32 %v116_v3, %v16_v2  ;;  %v24_v6 = vld [vmem:[%s574_s0 + $0x80] sm:$0xff]  ;;  %v143_v20 = vmax.f32 %v142_v16, %v17_v14  ;;  %v25_v22 = vld [vmem:[%s574_s0 + $0x88] sm:$0xff]  ;;  %v169_v44 = vmax.f32 %v168_v38, %v18_v35  ;;  %v26_v47 = vld [vmem:[%s574_s0 + $0x90] sm:$0xff] }
   0x6   :  { %v28_v8 = vld [vmem:[%s574_s0 + $0xa0] sm:$0xff]  ;;  %v29_v26 = vld [vmem:[%s574_s0 + $0xa8] sm:$0xff]  ;;  %v30_v53 = vld [vmem:[%s574_s0 + $0xb0] sm:$0xff] }
   0x7   :  { %v118_v7 = vmax.f32 %v117_v5, %v20_v4  ;;  %v32_v10 = vld [vmem:[%s574_s0 + $0xc0] sm:$0xff]  ;;  %v144_v24 = vmax.f32 %v143_v20, %v21_v18  ;;  %v33_v31 = vld [vmem:[%s574_s0 + $0xc8] sm:$0xff]  ;;  %v170_v50 = vmax.f32 %v169_v44, %v22_v41  ;;  %v34_v60 = vld [vmem:[%s574_s0 + $0xd0] sm:$0xff] }
   0x8   :  { %v36_v15 = vld [vmem:[%s574_s0 + $0xe0] sm:$0xff]  ;;  %v37_v37 = vld [vmem:[%s574_s0 + $0xe8] sm:$0xff]  ;;  %v11_v63 = vld [vmem:[%s574_s0 + $0x18] sm:$0xff] }
   0x9   :  { %v119_v9 = vmax.f32 %v118_v7, %v24_v6  ;;  %v40_v19 = vld [vmem:[%s574_s0 + $0x100] sm:$0xff]  ;;  %v145_v28 = vmax.f32 %v144_v24, %v25_v22  ;;  %v41_v43 = vld [vmem:[%s574_s0 + $0x108] sm:$0xff]  ;;  %v171_v56 = vmax.f32 %v170_v50, %v26_v47  ;;  %v15_v0 = vld [vmem:[%s574_s0 + $0x38] sm:$0xff] }
   0xa   :  { %v44_v23 = vld [vmem:[%s574_s0 + $0x120] sm:$0xff]  ;;  %v45_v49 = vld [vmem:[%s574_s0 + $0x128] sm:$0xff]  ;;  %v19_v1 = vld [vmem:[%s574_s0 + $0x58] sm:$0xff]  ;;  %v194_v5 = vmax.f32 %v11_v63, %v15_v0 }
   0xb   :  { %v120_v11 = vmax.f32 %v119_v9, %v28_v8  ;;  %v48_v27 = vld [vmem:[%s574_s0 + $0x140] sm:$0xff]  ;;  %v146_v32 = vmax.f32 %v145_v28, %v29_v26  ;;  %v49_v55 = vld [vmem:[%s574_s0 + $0x148] sm:$0xff]  ;;  %v172_v62 = vmax.f32 %v171_v56, %v30_v53  ;;  %v38_v4 = vld [vmem:[%s574_s0 + $0xf0] sm:$0xff] }
   0xc   :  { %v52_v29 = vld [vmem:[%s574_s0 + $0x160] sm:$0xff]  ;;  %v53_v58 = vld [vmem:[%s574_s0 + $0x168] sm:$0xff]  ;;  %v23_v9 = vld [vmem:[%s574_s0 + $0x78] sm:$0xff]  ;;  %v195_v13 = vmax.f32 %v194_v5, %v19_v1 }
   0xd   :  { %v121_v17 = vmax.f32 %v120_v11, %v32_v10  ;;  %v56_v39 = vld [vmem:[%s574_s0 + $0x180] sm:$0xff]  ;;  %v147_v40 = vmax.f32 %v146_v32, %v33_v31  ;;  %v57_v7 = vld [vmem:[%s574_s0 + $0x188] sm:$0xff]  ;;  %v173_v8 = vmax.f32 %v172_v62, %v34_v60  ;;  %v42_v12 = vld [vmem:[%s574_s0 + $0x110] sm:$0xff] }
   0xe   :  { %v60_v45 = vld [vmem:[%s574_s0 + $0x1a0] sm:$0xff]  ;;  %v46_v20 = vld [vmem:[%s574_s0 + $0x130] sm:$0xff]  ;;  %v69_v31 = vld [vmem:[%s574_s0 + $0x1e8] sm:$0xff] }
   0xf   :  { %v122_v21 = vmax.f32 %v121_v17, %v36_v15  ;;  %v148_v46 = vmax.f32 %v147_v40, %v37_v37  ;;  %v64_v51 = vld [vmem:[%s574_s0 + $0x1c0] sm:$0xff]  ;;  %v61_v15 = vld [vmem:[%s574_s0 + $0x1a8] sm:$0xff]  ;;  %v174_v16 = vmax.f32 %v173_v8, %v38_v4  ;;  %v27_v17 = vld [vmem:[%s574_s0 + $0x98] sm:$0xff] }
  0x10   :  { %v68_v57 = vld [vmem:[%s574_s0 + $0x1e0] sm:$0xff]  ;;  %v50_v28 = vld [vmem:[%s574_s0 + $0x150] sm:$0xff]  ;;  %v35_v33 = vld [vmem:[%s574_s0 + $0xd8] sm:$0xff] }
  0x11   :  { %v123_v25 = vmax.f32 %v122_v21, %v40_v19  ;;  %v149_v52 = vmax.f32 %v148_v46, %v41_v43  ;;  %v72_v2 = vld [vmem:[%s574_s0 + $0x200] sm:$0xff]  ;;  %v196_v21 = vmax.f32 %v195_v13, %v23_v9  ;;  %v175_v24 = vmax.f32 %v174_v16, %v42_v12  ;;  %v39_v41 = vld [vmem:[%s574_s0 + $0xf8] sm:$0xff]  ;;  %v58_v44 = vld [vmem:[%s574_s0 + $0x190] sm:$0xff] }
  0x12   :  { %v76_v10 = vld [vmem:[%s574_s0 + $0x220] sm:$0xff]  ;;  %v77_v47 = vld [vmem:[%s574_s0 + $0x228] sm:$0xff]  ;;  %v66_v60 = vld [vmem:[%s574_s0 + $0x1d0] sm:$0xff] }
  0x13   :  { %v124_v30 = vmax.f32 %v123_v25, %v44_v23  ;;  %v150_v59 = vmax.f32 %v149_v52, %v45_v49  ;;  %v80_v18 = vld [vmem:[%s574_s0 + $0x240] sm:$0xff]  ;;  %v65_v23 = vld [vmem:[%s574_s0 + $0x1c8] sm:$0xff]  ;;  %v31_v25 = vld [vmem:[%s574_s0 + $0xb8] sm:$0xff]  ;;  %v176_v32 = vmax.f32 %v175_v24, %v46_v20 }
  0x14   :  { %v84_v26 = vld [vmem:[%s574_s0 + $0x260] sm:$0xff]  ;;  %v43_v49 = vld [vmem:[%s574_s0 + $0x118] sm:$0xff]  ;;  %v62_v52 = vld [vmem:[%s574_s0 + $0x1b0] sm:$0xff] }
  0x15   :  { %v125_v36 = vmax.f32 %v124_v30, %v48_v27  ;;  %v151_v3 = vmax.f32 %v150_v59, %v49_v55  ;;  %v88_v34 = vld [vmem:[%s574_s0 + $0x280] sm:$0xff]  ;;  %v177_v40 = vmax.f32 %v176_v32, %v50_v28  ;;  %v81_v55 = vld [vmem:[%s574_s0 + $0x248] sm:$0xff]  ;;  %v51_v1 = vld [vmem:[%s574_s0 + $0x158] sm:$0xff] }
  0x16   :  { %v96_v50 = vld [vmem:[%s574_s0 + $0x2c0] sm:$0xff]  ;;  %v85_v63 = vld [vmem:[%s574_s0 + $0x268] sm:$0xff]  ;;  %v70_v4 = vld [vmem:[%s574_s0 + $0x1f0] sm:$0xff] }
  0x17   :  { %v126_v42 = vmax.f32 %v125_v36, %v52_v29  ;;  %v152_v11 = vmax.f32 %v151_v3, %v53_v58  ;;  %v197_v29 = vmax.f32 %v196_v21, %v27_v17  ;;  %v54_v36 = vld [vmem:[%s574_s0 + $0x170] sm:$0xff]  ;;  %v100_v58 = vld [vmem:[%s574_s0 + $0x2e0] sm:$0xff]  ;;  %v55_v9 = vld [vmem:[%s574_s0 + $0x178] sm:$0xff] }
  0x18   :  { %v74_v12 = vld [vmem:[%s574_s0 + $0x210] sm:$0xff]  ;;  %v59_v17 = vld [vmem:[%s574_s0 + $0x198] sm:$0xff] }
  0x19   :  { %v127_v48 = vmax.f32 %v126_v42, %v56_v39  ;;  %v153_v19 = vmax.f32 %v152_v11, %v57_v7  ;;  %v198_v37 = vmax.f32 %v197_v29, %v31_v25  ;;  %v73_v39 = vld [vmem:[%s574_s0 + $0x208] sm:$0xff]  ;;  %v92_v42 = vld [vmem:[%s574_s0 + $0x2a0] sm:$0xff]  ;;  %v78_v20 = vld [vmem:[%s574_s0 + $0x230] sm:$0xff] }
  0x1a   :  { %v89_v7 = vld [vmem:[%s574_s0 + $0x288] sm:$0xff]  ;;  %v63_v25 = vld [vmem:[%s574_s0 + $0x1b8] sm:$0xff] }
  0x1b   :  { %v128_v54 = vmax.f32 %v127_v48, %v60_v45  ;;  %v154_v27 = vmax.f32 %v153_v19, %v61_v15  ;;  %v199_v45 = vmax.f32 %v198_v37, %v35_v33  ;;  %v178_v48 = vmax.f32 %v177_v40, %v54_v36  ;;  %v93_v15 = vld [vmem:[%s574_s0 + $0x2a8] sm:$0xff]  ;;  %v67_v32 = vld [vmem:[%s574_s0 + $0x1d8] sm:$0xff]  ;;  %v90_v40 = vld [vmem:[%s574_s0 + $0x290] sm:$0xff] }
  0x1c   :  { %v105_v36 = vld [vmem:[%s574_s0 + $0x308] sm:$0xff] }
  0x1d   :  { %v129_v61 = vmax.f32 %v128_v54, %v64_v51  ;;  %v155_v35 = vmax.f32 %v154_v27, %v65_v23  ;;  %v200_v53 = vmax.f32 %v199_v45, %v39_v41  ;;  %v179_v56 = vmax.f32 %v178_v48, %v58_v44  ;;  %v97_v23 = vld [vmem:[%s574_s0 + $0x2c8] sm:$0xff]  ;;  %v82_v27 = vld [vmem:[%s574_s0 + $0x250] sm:$0xff]  ;;  %v75_v44 = vld [vmem:[%s574_s0 + $0x218] sm:$0xff] }
  0x1e   :  { %v113_v48 = vld [vmem:[%s574_s0 + $0x348] sm:$0xff] }
  0x1f   :  { %v130_v6 = vmax.f32 %v129_v61, %v68_v57  ;;  %v156_v43 = vmax.f32 %v155_v35, %v69_v31  ;;  %v47_v57 = vld [vmem:[%s574_s0 + $0x138] sm:$0xff]  ;;  %v201_v61 = vmax.f32 %v200_v53, %v43_v49  ;;  %v180_v0 = vmax.f32 %v179_v56, %v62_v52  ;;  %v98_v52 = vld [vmem:[%s574_s0 + $0x2d0] sm:$0xff] }
  0x21   :  { %v131_v14 = vmax.f32 %v130_v6, %v72_v2  ;;  %v157_v51 = vmax.f32 %v156_v43, %v73_v39  ;;  %v104_v2 = vld [vmem:[%s574_s0 + $0x300] sm:$0xff]  ;;  %v202_v5 = vmax.f32 %v201_v61, %v47_v57  ;;  %v181_v8 = vmax.f32 %v180_v0, %v66_v60  ;;  %v102_v57 = vld [vmem:[%s574_s0 + $0x2f0] sm:$0xff]  ;;  %v87_v60 = vld [vmem:[%s574_s0 + $0x278] sm:$0xff] }
  0x22   :  { %v106_v61 = vld [vmem:[%s574_s0 + $0x310] sm:$0xff]  ;;  %v91_v0 = vld [vmem:[%s574_s0 + $0x298] sm:$0xff] }
  0x23   :  { %v132_v22 = vmax.f32 %v131_v14, %v76_v10  ;;  %v158_v59 = vmax.f32 %v157_v51, %v77_v47  ;;  %v108_v10 = vld [vmem:[%s574_s0 + $0x320] sm:$0xff]  ;;  %v203_v13 = vmax.f32 %v202_v5, %v51_v1  ;;  %v182_v16 = vmax.f32 %v181_v8, %v70_v4  ;;  %v110_v1 = vld [vmem:[%s574_s0 + $0x330] sm:$0xff]  ;;  %v95_v4 = vld [vmem:[%s574_s0 + $0x2b8] sm:$0xff] }
  0x24   :  { %v114_v5 = vld [vmem:[%s574_s0 + $0x350] sm:$0xff]  ;;  %v99_v8 = vld [vmem:[%s574_s0 + $0x2d8] sm:$0xff] }
  0x25   :  { %v133_v30 = vmax.f32 %v132_v22, %v80_v18  ;;  %v159_v3 = vmax.f32 %v158_v59, %v81_v55  ;;  %v112_v18 = vld [vmem:[%s574_s0 + $0x340] sm:$0xff]  ;;  %v204_v21 = vmax.f32 %v203_v13, %v55_v9  ;;  %v183_v24 = vmax.f32 %v182_v16, %v74_v12  ;;  %v83_v55 = vld [vmem:[%s574_s0 + $0x258] sm:$0xff] }
  0x26   :  { %v107_v13 = vld [vmem:[%s574_s0 + $0x318] sm:$0xff] }
  0x27   :  { %v134_v38 = vmax.f32 %v133_v30, %v84_v26  ;;  %v160_v11 = vmax.f32 %v159_v3, %v85_v63  ;;  %v205_v28 = vmax.f32 %v204_v21, %v59_v17  ;;  %v101_v30 = vld [vmem:[%s574_s0 + $0x2e8] sm:$0xff]  ;;  %v184_v31 = vmax.f32 %v183_v24, %v78_v20  ;;  %v115_v17 = vld [vmem:[%s574_s0 + $0x358] sm:$0xff] }
  0x29   :  { %v135_v46 = vmax.f32 %v134_v38, %v88_v34  ;;  %v161_v19 = vmax.f32 %v160_v11, %v89_v7  ;;  %v86_v34 = vld [vmem:[%s574_s0 + $0x270] sm:$0xff]  ;;  %v206_v35 = vmax.f32 %v205_v28, %v63_v25  ;;  %v185_v37 = vmax.f32 %v184_v31, %v82_v27  ;;  %v71_v38 = vld [vmem:[%s574_s0 + $0x1f8] sm:$0xff] }
  0x2a   :  { %v103_v11 = vld [vmem:[%s574_s0 + $0x2f8] sm:$0xff] }
  0x2b   :  { %v136_v54 = vmax.f32 %v135_v46, %v92_v42  ;;  %v162_v26 = vmax.f32 %v161_v19, %v93_v15  ;;  %v207_v41 = vmax.f32 %v206_v35, %v67_v32  ;;  %v109_v42 = vld [vmem:[%s574_s0 + $0x328] sm:$0xff]  ;;  %v186_v43 = vmax.f32 %v185_v37, %v86_v34  ;;  %v94_v46 = vld [vmem:[%s574_s0 + $0x2b0] sm:$0xff]  ;;  %v111_v15 = vld [vmem:[%s574_s0 + $0x338] sm:$0xff] }
  0x2d   :  { %v137_v62 = vmax.f32 %v136_v54, %v96_v50  ;;  %v163_v33 = vmax.f32 %v162_v26, %v97_v23  ;;  %v208_v47 = vmax.f32 %v207_v41, %v71_v38  ;;  %v187_v49 = vmax.f32 %v186_v43, %v90_v40  ;;  %v79_v50 = vld [vmem:[%s574_s0 + $0x238] sm:$0xff] }
  0x2f   :  { %v138_v6 = vmax.f32 %v137_v62, %v100_v58  ;;  %v164_v39 = vmax.f32 %v163_v33, %v101_v30  ;;  %v209_v53 = vmax.f32 %v208_v47, %v75_v44  ;;  %v188_v54 = vmax.f32 %v187_v49, %v94_v46 }
  0x31   :  { %v139_v14 = vmax.f32 %v138_v6, %v104_v2  ;;  %v165_v45 = vmax.f32 %v164_v39, %v105_v36  ;;  %v210_v58 = vmax.f32 %v209_v53, %v79_v50  ;;  %v189_v59 = vmax.f32 %v188_v54, %v98_v52 }
  0x33   :  { %v140_v22 = vmax.f32 %v139_v14, %v108_v10  ;;  %v166_v51 = vmax.f32 %v165_v45, %v109_v42  ;;  %v211_v62 = vmax.f32 %v210_v58, %v83_v55  ;;  %v190_v63 = vmax.f32 %v189_v59, %v102_v57 }
  0x35   :  { %v141_v29 = vmax.f32 %v140_v22, %v112_v18  ;;  %v167_v56 = vmax.f32 %v166_v51, %v113_v48  ;;  %v212_v2 = vmax.f32 %v211_v62, %v87_v60  ;;  %v191_v3 = vmax.f32 %v190_v63, %v106_v61 }
  0x37   :  { %220 = vst [vmem:[%s575_s1] sm:$0xff] %v141_v29  ;;  %221 = vst [vmem:[%s575_s1 + $0x8] sm:$0xff] %v167_v56  ;;  %v213_v6 = vmax.f32 %v212_v2, %v91_v0  ;;  %v192_v7 = vmax.f32 %v191_v3, %v110_v1 }
  0x39   :  { %v214_v9 = vmax.f32 %v213_v6, %v95_v4  ;;  %v193_v10 = vmax.f32 %v192_v7, %v114_v5 }
  0x3b   :  { %v215_v12 = vmax.f32 %v214_v9, %v99_v8  ;;  %222 = vst [vmem:[%s575_s1 + $0x10] sm:$0xff] %v193_v10 }
  0x3d   :  { %v216_v14 = vmax.f32 %v215_v12, %v103_v11 }
  0x3f   :  { %v217_v16 = vmax.f32 %v216_v14, %v107_v13 }
  0x41   :  { %v218_v18 = vmax.f32 %v217_v16, %v111_v15 }
  0x43   :  { %v219_v19 = vmax.f32 %v218_v18, %v115_v17 }
  0x45   :  { %223 = vst [vmem:[%s575_s1 + $0x18] sm:$0xff] %v219_v19 }

// kernel: resnet2_forward.14
= control target key start
LH: loop header
LB: loop body
LE: loop exit
PB: predicated region body
PF: predicated region fallthrough
CT: control target
= control target key end

     0   :  { %s1305_s1 = inlined_call_operand.vmem [shape: bf16[896,128], index: 1, kind: input, shape index: {}]   ;;  %s1306_s0 = inlined_call_operand.vmem [shape: bf16[32,896], index: 0, kind: input, shape index: {}]   ;;  %s1307_s2 = inlined_call_operand.vmem [shape: f32[32,128], index: 2, kind: output, shape index: {}]  }
   0x1   :  { %v984_v0 = vld [vmem:[%s1305_s1 + $0x40] sm:$0xff]   ;;  %v988_v4 = vld [vmem:[%s1305_s1 + $0x48] sm:$0xff]   ;;  %v992_v8 = vld [vmem:[%s1305_s1 + $0x50] sm:$0xff]  }
   0x2   :  { %v985_v1 = vld [vmem:[%s1305_s1 + $0xc0] sm:$0xff]   ;;  %870 = vmatprep.subr.bf16.mxu0 %v984_v0  ;;  %v989_v5 = vld [vmem:[%s1305_s1 + $0xc8] sm:$0xff]   ;;  %v993_v9 = vld [vmem:[%s1305_s1 + $0xd0] sm:$0xff]  }
   0x3   :  { %v986_v2 = vld [vmem:[%s1305_s1] sm:$0xff]   ;;  %898 = vmatprep.subr.bf16.mxu1 %v985_v1  ;;  %v990_v6 = vld [vmem:[%s1305_s1 + $0x8] sm:$0xff]   ;;  %v994_v10 = vld [vmem:[%s1305_s1 + $0x10] sm:$0xff]  }
   0x4   :  { %v987_v3 = vld [vmem:[%s1305_s1 + $0x80] sm:$0xff]   ;;  %871 = vmatpush3.bf16.msra.mxu0 %v986_v2  ;;  %v991_v7 = vld [vmem:[%s1305_s1 + $0x88] sm:$0xff]   ;;  %v995_v11 = vld [vmem:[%s1305_s1 + $0x90] sm:$0xff]  }
   0x5   :  { %899 = vmatpush3.bf16.msra.mxu1 %v987_v3  ;;  %872 = vmatprep.subr.bf16.mxu0 %v988_v4  ;;  %v996_v12 = vld [vmem:[%s1305_s1 + $0x58] sm:$0xff]   ;;  %v1000_v16 = vld [vmem:[%s1305_s1 + $0x60] sm:$0xff]   ;;  %v1004_v20 = vld [vmem:[%s1305_s1 + $0x68] sm:$0xff]  }
   0x6   :  { %900 = vmatprep.subr.bf16.mxu1 %v989_v5  ;;  %v997_v13 = vld [vmem:[%s1305_s1 + $0xd8] sm:$0xff]   ;;  %v1001_v17 = vld [vmem:[%s1305_s1 + $0xe0] sm:$0xff]   ;;  %v1005_v21 = vld [vmem:[%s1305_s1 + $0xe8] sm:$0xff]  }
   0x7   :  { %v998_v14 = vld [vmem:[%s1305_s1 + $0x18] sm:$0xff]   ;;  %v1002_v18 = vld [vmem:[%s1305_s1 + $0x20] sm:$0xff]   ;;  %v1006_v22 = vld [vmem:[%s1305_s1 + $0x28] sm:$0xff]  }
   0x8   :  { %873 = vmatpush3.bf16.msra.mxu0 %v990_v6  ;;  %v999_v15 = vld [vmem:[%s1305_s1 + $0x98] sm:$0xff]   ;;  %v1003_v19 = vld [vmem:[%s1305_s1 + $0xa0] sm:$0xff]   ;;  %v1007_v23 = vld [vmem:[%s1305_s1 + $0xa8] sm:$0xff]  }
   0x9   :  { %901 = vmatpush3.bf16.msra.mxu1 %v991_v7  ;;  %874 = vmatprep.subr.bf16.mxu0 %v992_v8  ;;  %v1008_v24 = vld [vmem:[%s1305_s1 + $0x70] sm:$0xff]   ;;  %v1012_v28 = vld [vmem:[%s1305_s1 + $0x78] sm:$0xff]   ;;  %v1018_v33 = vld [vmem:[%s1306_s0 + $0x4] ss:$28 sps:$4 sm:$0xff]  }
   0xa   :  { %902 = vmatprep.subr.bf16.mxu1 %v993_v9  ;;  %v1009_v25 = vld [vmem:[%s1305_s1 + $0xf0] sm:$0xff]   ;;  %v1013_v29 = vld [vmem:[%s1305_s1 + $0xf8] sm:$0xff]   ;;  %v1019_v34 = vld [vmem:[%s1306_s0 + $0x8] ss:$28 sps:$4 sm:$0xff]   ;;  %580 = vmatprep.mubr.bf16.mxu0 %v1018_v33 }
   0xb   :  { %v1010_v26 = vld [vmem:[%s1305_s1 + $0x30] sm:$0xff]   ;;  %v1014_v30 = vld [vmem:[%s1305_s1 + $0x38] sm:$0xff]   ;;  %v1021_v35 = vld [vmem:[%s1306_s0 + $0xc] ss:$28 sps:$4 sm:$0xff]  }
   0xc   :  { %875 = vmatpush3.bf16.msra.mxu0 %v994_v10  ;;  %v1011_v27 = vld [vmem:[%s1305_s1 + $0xb0] sm:$0xff]   ;;  %v1015_v31 = vld [vmem:[%s1305_s1 + $0xb8] sm:$0xff]   ;;  %v1022_v36 = vld [vmem:[%s1305_s1 + $0x140] sm:$0xff]   ;;  %629 = vmatprep.mubr.bf16.mxu1 %v1021_v35 }
   0xd   :  { %903 = vmatpush3.bf16.msra.mxu1 %v995_v11  ;;  %876 = vmatprep.subr.bf16.mxu0 %v996_v12  ;;  %v1016_v32 = vld [vmem:[%s1306_s0] ss:$28 sps:$4 sm:$0xff]   ;;  %v1024_v38 = vld [vmem:[%s1305_s1 + $0x148] sm:$0xff]   ;;  %v1027_v41 = vld [vmem:[%s1305_s1 + $0x150] sm:$0xff]  }
   0xe   :  { %904 = vmatprep.subr.bf16.mxu1 %v997_v13  ;;  %v1023_v37 = vld [vmem:[%s1305_s1 + $0x100] sm:$0xff]   ;;  %v1026_v40 = vld [vmem:[%s1305_s1 + $0x108] sm:$0xff]   ;;  %v1029_v43 = vld [vmem:[%s1305_s1 + $0x110] sm:$0xff]  }
   0xf   :  { %v1025_v39 = vld [vmem:[%s1305_s1 + $0x180] sm:$0xff]   ;;  %v1028_v42 = vld [vmem:[%s1305_s1 + $0x188] sm:$0xff]   ;;  %v1030_v44 = vld [vmem:[%s1305_s1 + $0x158] sm:$0xff]  }
  0x10   :  { %877 = vmatpush3.bf16.msra.mxu0 %v998_v14  ;;  %v1031_v45 = vld [vmem:[%s1305_s1 + $0x190] sm:$0xff]   ;;  %v1032_v46 = vld [vmem:[%s1305_s1 + $0x118] sm:$0xff]   ;;  %v1033_v47 = vld [vmem:[%s1305_s1 + $0x160] sm:$0xff]  }
  0x11   :  { %905 = vmatpush3.bf16.msra.mxu1 %v999_v15  ;;  %878 = vmatprep.subr.bf16.mxu0 %v1000_v16  ;;  %v1034_v48 = vld [vmem:[%s1305_s1 + $0x198] sm:$0xff]   ;;  %v1035_v49 = vld [vmem:[%s1305_s1 + $0x120] sm:$0xff]   ;;  %v1040_v52 = vld [vmem:[%s1305_s1 + $0x168] sm:$0xff]  }
  0x12   :  { %906 = vmatprep.subr.bf16.mxu1 %v1001_v17  ;;  %v1036_v50 = vld [vmem:[%s1306_s0 + $0x3c] ss:$28 sps:$4 sm:$0xff]   ;;  %v1038_v51 = vld [vmem:[%s1306_s0 + $0x44] ss:$28 sps:$4 sm:$0xff]   ;;  %v1044_v56 = vld [vmem:[%s1305_s1 + $0x128] sm:$0xff]  }
  0x13   :  { %v1041_v53 = vld [vmem:[%s1305_s1 + $0x1a0] sm:$0xff]   ;;  %v1042_v54 = vld [vmem:[%s1306_s0 + $0x38] ss:$28 sps:$4 sm:$0xff]   ;;  %v1046_v58 = vld [vmem:[%s1305_s1 + $0x1a8] sm:$0xff]  }
  0x14   :  { %879 = vmatpush3.bf16.msra.mxu0 %v1002_v18  ;;  %v1043_v55 = vld [vmem:[%s1306_s0 + $0x40] ss:$28 sps:$4 sm:$0xff]   ;;  %v1045_v57 = vld [vmem:[%s1305_s1 + $0x170] sm:$0xff]   ;;  %v1057_v3 = vld [vmem:[%s1306_s0 + $0x4c] ss:$28 sps:$4 sm:$0xff]  }
  0x15   :  { %907 = vmatpush3.bf16.msra.mxu1 %v1003_v19  ;;  %880 = vmatprep.subr.bf16.mxu0 %v1004_v20  ;;  %v1047_v59 = vld [vmem:[%s1305_s1 + $0x130] sm:$0xff]   ;;  %v1048_v60 = vld [vmem:[%s1305_s1 + $0x178] sm:$0xff]   ;;  %v1059_v5 = vld [vmem:[%s1306_s0 + $0x48] ss:$28 sps:$4 sm:$0xff]  }
  0x16   :  { %908 = vmatprep.subr.bf16.mxu1 %v1005_v21  ;;  %v1049_v61 = vld [vmem:[%s1305_s1 + $0x1b0] sm:$0xff]   ;;  %v1050_v62 = vld [vmem:[%s1305_s1 + $0x138] sm:$0xff]  }
  0x17   :  { %v1053_v63 = vld [vmem:[%s1306_s0 + $0x14] ss:$28 sps:$4 sm:$0xff]   ;;  %v1054_v0 = vld [vmem:[%s1305_s1 + $0x1b8] sm:$0xff]  }
  0x18   :  { %881 = vmatpush3.bf16.msra.mxu0 %v1006_v22  ;;  %v1055_v1 = vld [vmem:[%s1306_s0 + $0x18] ss:$28 sps:$4 sm:$0xff]   ;;  %v1051_v2 = vld [vmem:[%s1306_s0 + $0x10] ss:$28 sps:$4 sm:$0xff]  }
  0x19   :  { %909 = vmatpush3.bf16.msra.mxu1 %v1007_v23  ;;  %882 = vmatprep.subr.bf16.mxu0 %v1008_v24  ;;  %v1056_v4 = vld [vmem:[%s1306_s0 + $0x50] ss:$28 sps:$4 sm:$0xff]  }
  0x1a   :  { %910 = vmatprep.subr.bf16.mxu1 %v1009_v25 }
  0x1c   :  { %883 = vmatpush3.bf16.msra.mxu0 %v1010_v26 }
  0x1d   :  { %911 = vmatpush3.bf16.msra.mxu1 %v1011_v27  ;;  %884 = vmatprep.subr.bf16.mxu0 %v1012_v28 }
  0x1e   :  { %912 = vmatprep.subr.bf16.mxu1 %v1013_v29 }
  0x20   :  { %885 = vmatpush3.bf16.msra.mxu0 %v1014_v30 }
  0x21   :  { %913 = vmatpush3.bf16.msra.mxu1 %v1015_v31  ;;  %926 = vmatprep.subr.bf16.mxu0 %v1022_v36 }
  0x22   :  { %964 = vmatprep.subr.bf16.mxu1 %v1025_v39 }
  0x23   :  { %581 = vmatmul.mubr.bf16.vlgmr.msra.gmra.mrb[0].mxu0 %v1016_v32 }
  0x24   :  { %630 = vmatmul.mubr.bf16.vlgmr.msra.gmra.mrb[0].mxu1 %v1019_v34  ;;  %927 = vmatpush3.bf16.msra.mxu0 %v1023_v37 }
  0x25   :  { %928 = vmatprep.subr.bf16.mxu0 %v1024_v38  ;;  %965 = vmatpush3.bf16.msra.mxu1 %v1025_v39 }
  0x26   :  { %966 = vmatprep.subr.bf16.mxu1 %v1028_v42  ;;  %588 = vmatprep.mubr.bf16.mxu0 %v1036_v50 }
  0x27   :  { %637 = vmatprep.mubr.bf16.mxu1 %v1038_v51 }
  0x28   :  { %929 = vmatpush3.bf16.msra.mxu0 %v1026_v40 }
  0x29   :  { %930 = vmatprep.subr.bf16.mxu0 %v1027_v41  ;;  %967 = vmatpush3.bf16.msra.mxu1 %v1028_v42 }
  0x2a   :  { %968 = vmatprep.subr.bf16.mxu1 %v1031_v45 }
  0x2b   :  { %589 = vmatmul.mubr.bf16.gmra.mrb[4].mxu0 %v1042_v54 }
  0x2c   :  { %931 = vmatpush3.bf16.msra.mxu0 %v1029_v43  ;;  %638 = vmatmul.mubr.bf16.gmra.mrb[4].mxu1 %v1043_v55 }
  0x2d   :  { %932 = vmatprep.subr.bf16.mxu0 %v1030_v44  ;;  %969 = vmatpush3.bf16.msra.mxu1 %v1031_v45 }
  0x2e   :  { %970 = vmatprep.subr.bf16.mxu1 %v1034_v48  ;;  %678 = vmatprep.mubr.bf16.mxu0 %v1053_v63 }
  0x2f   :  { %980 = vmatprep.mubr.bf16.mxu1 %v1055_v1 }
  0x30   :  { %933 = vmatpush3.bf16.msra.mxu0 %v1032_v46 }
  0x31   :  { %934 = vmatprep.subr.bf16.mxu0 %v1033_v47  ;;  %971 = vmatpush3.bf16.msra.mxu1 %v1034_v48 }
  0x32   :  { %972 = vmatprep.subr.bf16.mxu1 %v1041_v53 }
  0x34   :  { %935 = vmatpush3.bf16.msra.mxu0 %v1035_v49 }
  0x35   :  { %936 = vmatprep.subr.bf16.mxu0 %v1040_v52  ;;  %973 = vmatpush3.bf16.msra.mxu1 %v1041_v53 }
  0x36   :  { %974 = vmatprep.subr.bf16.mxu1 %v1046_v58 }
  0x38   :  { %937 = vmatpush3.bf16.msra.mxu0 %v1044_v56 }
  0x39   :  { %938 = vmatprep.subr.bf16.mxu0 %v1045_v57  ;;  %975 = vmatpush3.bf16.msra.mxu1 %v1046_v58 }
  0x3a   :  { %976 = vmatprep.subr.bf16.mxu1 %v1049_v61 }
  0x3c   :  { %939 = vmatpush3.bf16.msra.mxu0 %v1047_v59 }
  0x3d   :  { %940 = vmatprep.subr.bf16.mxu0 %v1048_v60  ;;  %977 = vmatpush3.bf16.msra.mxu1 %v1049_v61 }
  0x3e   :  { %978 = vmatprep.subr.bf16.mxu1 %v1054_v0 }
  0x40   :  { %941 = vmatpush3.bf16.msra.mxu0 %v1050_v62 }
  0x41   :  { %979 = vmatpush3.bf16.msra.mxu1 %v1054_v0 }
  0x43   :  { %679 = vmatmul.mubr.bf16.vlgmr.msra.gmra.mrb[8].mxu0 %v1051_v2 }
  0x44   :  { %686 = vmatprep.mubr.bf16.mxu0 %v1057_v3  ;;  %981 = vmatmul.mubr.bf16.vlgmr.msra.gmra.mrb[8].mxu1 %v1056_v4 }
  0x4b   :  { %687 = vmatmul.mubr.bf16.gmra.mrb[12].mxu0 %v1059_v5 }
  0xf6   :  { %v886_v6 = vpop.f32.mrb[0].mxu0 }
  0xf7   :  { %v914_v7 = vpop.f32.mrb[0].mxu1  ;;  %v887_v8 = vpop.f32.mrb[1].mxu0 }
  0xf8   :  { %v888_v9 = vadd.f32 %v887_v8, %v886_v6  ;;  %v915_v10 = vpop.f32.mrb[1].mxu1  ;;  %v889_v11 = vpop.f32.mrb[2].mxu0 }
  0xf9   :  { %v916_v12 = vadd.f32 %v915_v10, %v914_v7  ;;  %v917_v13 = vpop.f32.mrb[2].mxu1  ;;  %v890_v14 = vpop.f32.mrb[3].mxu0 }
  0xfa   :  { %v891_v15 = vadd.f32 %v890_v14, %v889_v11  ;;  %v918_v16 = vpop.f32.mrb[3].mxu1 }
  0xfb   :  { %v632_v17 = vadd.f32 %v916_v12, %v888_v9  ;;  %v919_v18 = vadd.f32 %v918_v16, %v917_v13 }
  0xfd   :  { %v635_v19 = vadd.f32 %v919_v18, %v891_v15 }
  0xfe   :  { %v892_v20 = vpop.f32.mrb[4].mxu0 }
  0xff   :  { %v920_v21 = vpop.f32.mrb[4].mxu1  ;;  %v893_v22 = vpop.f32.mrb[5].mxu0 }
 0x100   :  { %v894_v23 = vadd.f32 %v893_v22, %v892_v20  ;;  %v921_v24 = vpop.f32.mrb[5].mxu1  ;;  %v895_v25 = vpop.f32.mrb[6].mxu0 }
 0x101   :  { %v922_v26 = vadd.f32 %v921_v24, %v920_v21  ;;  %v923_v27 = vpop.f32.mrb[6].mxu1  ;;  %v896_v28 = vpop.f32.mrb[7].mxu0 }
 0x102   :  { %v897_v29 = vadd.f32 %v896_v28, %v895_v25  ;;  %v924_v30 = vpop.f32.mrb[7].mxu1 }
 0x103   :  { %v640_v31 = vadd.f32 %v922_v26, %v894_v23  ;;  %v925_v32 = vadd.f32 %v924_v30, %v923_v27 }
 0x105   :  { %v643_v33 = vadd.f32 %v925_v32, %v897_v29 }
 0x116   :  { %v942_v34 = vpop.f32.mrb[8].mxu0 }
 0x117   :  { %v943_v35 = vpop.f32.mrb[9].mxu0  ;;  %v982_v39 = vpop.f32.mrb[8].mxu1 }
 0x118   :  { %v944_v36 = vadd.f32 %v943_v35, %v942_v34  ;;  %v945_v37 = vpop.f32.mrb[10].mxu0  ;;  %v729_v42 = vpop.f32.mrb[9].mxu1 }
 0x119   :  { %v946_v38 = vpop.f32.mrb[11].mxu0  ;;  %v983_v43 = vpop.f32.mrb[10].mxu1 }
 0x11a   :  { %v947_v40 = vadd.f32 %v946_v38, %v945_v37  ;;  %v681_v41 = vadd.f32 %v944_v36, %v632_v17  ;;  %v732_v46 = vpop.f32.mrb[11].mxu1 }
 0x11c   :  { %v730_v44 = vadd.f32 %v729_v42, %v681_v41  ;;  %v684_v45 = vadd.f32 %v947_v40, %v635_v19 }
 0x11e   :  { %v733_v47 = vadd.f32 %v732_v46, %v684_v45  ;;  %v948_v48 = vpop.f32.mrb[12].mxu0  ;;  %744 = vadd.xlane.f32.xlu0 %v730_v44 }
 0x11f   :  { %v949_v49 = vpop.f32.mrb[13].mxu0 }
 0x120   :  { %v950_v50 = vadd.f32 %v949_v49, %v948_v48  ;;  %v951_v51 = vpop.f32.mrb[14].mxu0 }
 0x121   :  { %v952_v52 = vpop.f32.mrb[15].mxu0 }
 0x122   :  { %v689_v53 = vadd.f32 %v950_v50, %v640_v31  ;;  %v953_v54 = vadd.f32 %v952_v52, %v951_v51  ;;  %746 = vadd.xlane.f32.xlu0 %v733_v47 }
 0x124   :  { %v692_v55 = vadd.f32 %v953_v54, %v643_v33  ;;  %v738_v56 = vadd.f32 %v982_v39, %v689_v53 }
 0x126   :  { %748 = vadd.xlane.f32.xlu1 %v738_v56  ;;  %v741_v57 = vadd.f32 %v983_v43, %v692_v55 }
 0x12a   :  { %750 = vadd.xlane.f32.xlu1 %v741_v57 }
 0x1ab   :  { %v745_v58 = vpop.xlane.xlu0 %744 }
 0x1ac   :  { %v752_v59 = vmul.f32 0.0078125, %v745_v58 }
 0x1ae   :  { %v756_v60 = vsub.f32 %v730_v44, %v752_v59 }
 0x1af   :  { %v747_v61 = vpop.xlane.xlu0 %746 }
 0x1b0   :  { %v753_v62 = vmul.f32 0.0078125, %v747_v61  ;;  %v760_v63 = vmul.f32 %v756_v60, %v756_v60 }
 0x1b2   :  { %v757_v0 = vsub.f32 %v733_v47, %v753_v62  ;;  %764 = vadd.xlane.f32.xlu0 %v760_v63 }
 0x1b3   :  { %v749_v1 = vpop.xlane.xlu1 %748 }
 0x1b4   :  { %v754_v2 = vmul.f32 0.0078125, %v749_v1  ;;  %v761_v3 = vmul.f32 %v757_v0, %v757_v0 }
 0x1b6   :  { %v758_v4 = vsub.f32 %v738_v56, %v754_v2  ;;  %766 = vadd.xlane.f32.xlu1 %v761_v3 }
 0x1b7   :  { %v751_v5 = vpop.xlane.xlu1 %750 }
 0x1b8   :  { %v755_v6 = vmul.f32 0.0078125, %v751_v5  ;;  %v762_v7 = vmul.f32 %v758_v4, %v758_v4 }
 0x1ba   :  { %v759_v8 = vsub.f32 %v741_v57, %v755_v6  ;;  %768 = vadd.xlane.f32.xlu0 %v762_v7 }
 0x1bc   :  { %v763_v9 = vmul.f32 %v759_v8, %v759_v8 }
 0x1be   :  { %770 = vadd.xlane.f32.xlu1 %v763_v9 }
 0x23f   :  { %v765_v10 = vpop.xlane.xlu0 %764 }
 0x240   :  { %v772_v11 = vmul.f32 0.0078125, %v765_v10 }
 0x242   :  { %v776_v12 = vadd.f32 1e-05, %v772_v11 }
 0x243   :  { %v767_v13 = vpop.xlane.xlu1 %766 }
 0x244   :  { %1060 = vrsqrt.f32 %v776_v12  ;;  %v773_v14 = vmul.f32 0.0078125, %v767_v13 }
 0x246   :  { %v777_v15 = vadd.f32 1e-05, %v773_v14 }
 0x247   :  { %v769_v16 = vpop.xlane.xlu0 %768 }
 0x248   :  { %1062 = vrsqrt.f32 %v777_v15  ;;  %v774_v17 = vmul.f32 0.0078125, %v769_v16 }
 0x24a   :  { %v778_v18 = vadd.f32 1e-05, %v774_v17 }
 0x24b   :  { %v771_v19 = vpop.xlane.xlu1 %770 }
 0x24c   :  { %1064 = vrsqrt.f32 %v778_v18  ;;  %v775_v20 = vmul.f32 0.0078125, %v771_v19 }
 0x24e   :  { %v1061_v21 = vpop.eup %1060  ;;  %v779_v22 = vadd.f32 1e-05, %v775_v20 }
 0x24f   :  { %v784_v23 = vmul.f32 %v1061_v21, %v756_v60 }
 0x250   :  { %1066 = vrsqrt.f32 %v779_v22 }
 0x251   :  { %v788_v24 = vmax.f32 %v784_v23, 0.0 }
 0x252   :  { %v1063_v25 = vpop.eup %1062 }
 0x253   :  { %792 = vst [vmem:[%s1307_s2] sm:$0xff] %v788_v24  ;;  %v785_v26 = vmul.f32 %v1063_v25, %v757_v0 }
 0x255   :  { %v789_v27 = vmax.f32 %v785_v26, 0.0 }
 0x256   :  { %v1065_v28 = vpop.eup %1064 }
 0x257   :  { %793 = vst [vmem:[%s1307_s2 + $0x8] sm:$0xff] %v789_v27  ;;  %v786_v29 = vmul.f32 %v1065_v28, %v758_v4 }
 0x259   :  { %v790_v30 = vmax.f32 %v786_v29, 0.0 }
 0x25a   :  { %v1067_v31 = vpop.eup %1066 }
 0x25b   :  { %794 = vst [vmem:[%s1307_s2 + $0x10] sm:$0xff] %v790_v30  ;;  %v787_v32 = vmul.f32 %v1067_v31, %v759_v8 }
 0x25d   :  { %v791_v33 = vmax.f32 %v787_v32, 0.0 }
 0x25f   :  { %795 = vst [vmem:[%s1307_s2 + $0x18] sm:$0xff] %v791_v33 }

// kernel: resnet2_forward.15
= control target key start
LH: loop header
LB: loop body
LE: loop exit
PB: predicated region body
PF: predicated region fallthrough
CT: control target
= control target key end

     0   :  { %s1333_s1 = inlined_call_operand.vmem [shape: bf16[896,128], index: 1, kind: input, shape index: {}]   ;;  %s1334_s0 = inlined_call_operand.vmem [shape: bf16[32,896], index: 0, kind: input, shape index: {}]   ;;  %s1335_s2 = inlined_call_operand.vmem [shape: f32[32,128], index: 2, kind: input, shape index: {}]   ;;  %s1336_s3 = inlined_call_operand.vmem [shape: f32[32,128], index: 3, kind: output, shape index: {}]  }
   0x1   :  { %v995_v0 = vld [vmem:[%s1333_s1 + $0x40] sm:$0xff]   ;;  %v999_v4 = vld [vmem:[%s1333_s1 + $0x48] sm:$0xff]   ;;  %v1003_v8 = vld [vmem:[%s1333_s1 + $0x50] sm:$0xff]  }
   0x2   :  { %v996_v1 = vld [vmem:[%s1333_s1 + $0xc0] sm:$0xff]   ;;  %881 = vmatprep.subr.bf16.mxu0 %v995_v0  ;;  %v1000_v5 = vld [vmem:[%s1333_s1 + $0xc8] sm:$0xff]   ;;  %v1004_v9 = vld [vmem:[%s1333_s1 + $0xd0] sm:$0xff]  }
   0x3   :  { %v997_v2 = vld [vmem:[%s1333_s1] sm:$0xff]   ;;  %909 = vmatprep.subr.bf16.mxu1 %v996_v1  ;;  %v1001_v6 = vld [vmem:[%s1333_s1 + $0x8] sm:$0xff]   ;;  %v1005_v10 = vld [vmem:[%s1333_s1 + $0x10] sm:$0xff]  }
   0x4   :  { %v998_v3 = vld [vmem:[%s1333_s1 + $0x80] sm:$0xff]   ;;  %882 = vmatpush3.bf16.msra.mxu0 %v997_v2  ;;  %v1002_v7 = vld [vmem:[%s1333_s1 + $0x88] sm:$0xff]   ;;  %v1006_v11 = vld [vmem:[%s1333_s1 + $0x90] sm:$0xff]  }
   0x5   :  { %910 = vmatpush3.bf16.msra.mxu1 %v998_v3  ;;  %883 = vmatprep.subr.bf16.mxu0 %v999_v4  ;;  %v1007_v12 = vld [vmem:[%s1333_s1 + $0x58] sm:$0xff]   ;;  %v1011_v16 = vld [vmem:[%s1333_s1 + $0x60] sm:$0xff]   ;;  %v1015_v20 = vld [vmem:[%s1333_s1 + $0x68] sm:$0xff]  }
   0x6   :  { %911 = vmatprep.subr.bf16.mxu1 %v1000_v5  ;;  %v1008_v13 = vld [vmem:[%s1333_s1 + $0xd8] sm:$0xff]   ;;  %v1012_v17 = vld [vmem:[%s1333_s1 + $0xe0] sm:$0xff]   ;;  %v1016_v21 = vld [vmem:[%s1333_s1 + $0xe8] sm:$0xff]  }
   0x7   :  { %v1009_v14 = vld [vmem:[%s1333_s1 + $0x18] sm:$0xff]   ;;  %v1013_v18 = vld [vmem:[%s1333_s1 + $0x20] sm:$0xff]   ;;  %v1017_v22 = vld [vmem:[%s1333_s1 + $0x28] sm:$0xff]  }
   0x8   :  { %884 = vmatpush3.bf16.msra.mxu0 %v1001_v6  ;;  %v1010_v15 = vld [vmem:[%s1333_s1 + $0x98] sm:$0xff]   ;;  %v1014_v19 = vld [vmem:[%s1333_s1 + $0xa0] sm:$0xff]   ;;  %v1018_v23 = vld [vmem:[%s1333_s1 + $0xa8] sm:$0xff]  }
   0x9   :  { %912 = vmatpush3.bf16.msra.mxu1 %v1002_v7  ;;  %885 = vmatprep.subr.bf16.mxu0 %v1003_v8  ;;  %v1019_v24 = vld [vmem:[%s1333_s1 + $0x70] sm:$0xff]   ;;  %v1023_v28 = vld [vmem:[%s1333_s1 + $0x78] sm:$0xff]   ;;  %v1029_v33 = vld [vmem:[%s1334_s0 + $0x4] ss:$28 sps:$4 sm:$0xff]  }
   0xa   :  { %913 = vmatprep.subr.bf16.mxu1 %v1004_v9  ;;  %v1020_v25 = vld [vmem:[%s1333_s1 + $0xf0] sm:$0xff]   ;;  %v1024_v29 = vld [vmem:[%s1333_s1 + $0xf8] sm:$0xff]   ;;  %v1030_v34 = vld [vmem:[%s1334_s0 + $0x8] ss:$28 sps:$4 sm:$0xff]   ;;  %583 = vmatprep.mubr.bf16.mxu0 %v1029_v33 }
   0xb   :  { %v1021_v26 = vld [vmem:[%s1333_s1 + $0x30] sm:$0xff]   ;;  %v1025_v30 = vld [vmem:[%s1333_s1 + $0x38] sm:$0xff]   ;;  %v1032_v35 = vld [vmem:[%s1334_s0 + $0xc] ss:$28 sps:$4 sm:$0xff]  }
   0xc   :  { %886 = vmatpush3.bf16.msra.mxu0 %v1005_v10  ;;  %v1022_v27 = vld [vmem:[%s1333_s1 + $0xb0] sm:$0xff]   ;;  %v1026_v31 = vld [vmem:[%s1333_s1 + $0xb8] sm:$0xff]   ;;  %v1033_v36 = vld [vmem:[%s1333_s1 + $0x140] sm:$0xff]   ;;  %632 = vmatprep.mubr.bf16.mxu1 %v1032_v35 }
   0xd   :  { %914 = vmatpush3.bf16.msra.mxu1 %v1006_v11  ;;  %887 = vmatprep.subr.bf16.mxu0 %v1007_v12  ;;  %v1027_v32 = vld [vmem:[%s1334_s0] ss:$28 sps:$4 sm:$0xff]   ;;  %v1035_v38 = vld [vmem:[%s1333_s1 + $0x148] sm:$0xff]   ;;  %v1038_v41 = vld [vmem:[%s1333_s1 + $0x150] sm:$0xff]  }
   0xe   :  { %915 = vmatprep.subr.bf16.mxu1 %v1008_v13  ;;  %v1034_v37 = vld [vmem:[%s1333_s1 + $0x100] sm:$0xff]   ;;  %v1037_v40 = vld [vmem:[%s1333_s1 + $0x108] sm:$0xff]   ;;  %v1040_v43 = vld [vmem:[%s1333_s1 + $0x110] sm:$0xff]  }
   0xf   :  { %v1036_v39 = vld [vmem:[%s1333_s1 + $0x180] sm:$0xff]   ;;  %v1039_v42 = vld [vmem:[%s1333_s1 + $0x188] sm:$0xff]   ;;  %v1041_v44 = vld [vmem:[%s1333_s1 + $0x158] sm:$0xff]  }
  0x10   :  { %888 = vmatpush3.bf16.msra.mxu0 %v1009_v14  ;;  %v1042_v45 = vld [vmem:[%s1333_s1 + $0x190] sm:$0xff]   ;;  %v1043_v46 = vld [vmem:[%s1333_s1 + $0x118] sm:$0xff]   ;;  %v1044_v47 = vld [vmem:[%s1333_s1 + $0x160] sm:$0xff]  }
  0x11   :  { %916 = vmatpush3.bf16.msra.mxu1 %v1010_v15  ;;  %889 = vmatprep.subr.bf16.mxu0 %v1011_v16  ;;  %v1045_v48 = vld [vmem:[%s1333_s1 + $0x198] sm:$0xff]   ;;  %v1046_v49 = vld [vmem:[%s1333_s1 + $0x120] sm:$0xff]   ;;  %v1051_v52 = vld [vmem:[%s1333_s1 + $0x168] sm:$0xff]  }
  0x12   :  { %917 = vmatprep.subr.bf16.mxu1 %v1012_v17  ;;  %v1047_v50 = vld [vmem:[%s1334_s0 + $0x3c] ss:$28 sps:$4 sm:$0xff]   ;;  %v1049_v51 = vld [vmem:[%s1334_s0 + $0x44] ss:$28 sps:$4 sm:$0xff]   ;;  %v1055_v56 = vld [vmem:[%s1333_s1 + $0x128] sm:$0xff]  }
  0x13   :  { %v1052_v53 = vld [vmem:[%s1333_s1 + $0x1a0] sm:$0xff]   ;;  %v1053_v54 = vld [vmem:[%s1334_s0 + $0x38] ss:$28 sps:$4 sm:$0xff]   ;;  %v1057_v58 = vld [vmem:[%s1333_s1 + $0x1a8] sm:$0xff]  }
  0x14   :  { %890 = vmatpush3.bf16.msra.mxu0 %v1013_v18  ;;  %v1054_v55 = vld [vmem:[%s1334_s0 + $0x40] ss:$28 sps:$4 sm:$0xff]   ;;  %v1056_v57 = vld [vmem:[%s1333_s1 + $0x170] sm:$0xff]   ;;  %v1068_v3 = vld [vmem:[%s1334_s0 + $0x4c] ss:$28 sps:$4 sm:$0xff]  }
  0x15   :  { %918 = vmatpush3.bf16.msra.mxu1 %v1014_v19  ;;  %891 = vmatprep.subr.bf16.mxu0 %v1015_v20  ;;  %v1058_v59 = vld [vmem:[%s1333_s1 + $0x130] sm:$0xff]   ;;  %v1059_v60 = vld [vmem:[%s1333_s1 + $0x178] sm:$0xff]   ;;  %v1070_v5 = vld [vmem:[%s1334_s0 + $0x48] ss:$28 sps:$4 sm:$0xff]  }
  0x16   :  { %919 = vmatprep.subr.bf16.mxu1 %v1016_v21  ;;  %v1060_v61 = vld [vmem:[%s1333_s1 + $0x1b0] sm:$0xff]   ;;  %v1061_v62 = vld [vmem:[%s1333_s1 + $0x138] sm:$0xff]  }
  0x17   :  { %v1064_v63 = vld [vmem:[%s1334_s0 + $0x14] ss:$28 sps:$4 sm:$0xff]   ;;  %v1065_v0 = vld [vmem:[%s1333_s1 + $0x1b8] sm:$0xff]  }
  0x18   :  { %892 = vmatpush3.bf16.msra.mxu0 %v1017_v22  ;;  %v1066_v1 = vld [vmem:[%s1334_s0 + $0x18] ss:$28 sps:$4 sm:$0xff]   ;;  %v1062_v2 = vld [vmem:[%s1334_s0 + $0x10] ss:$28 sps:$4 sm:$0xff]  }
  0x19   :  { %920 = vmatpush3.bf16.msra.mxu1 %v1018_v23  ;;  %893 = vmatprep.subr.bf16.mxu0 %v1019_v24  ;;  %v1067_v4 = vld [vmem:[%s1334_s0 + $0x50] ss:$28 sps:$4 sm:$0xff]  }
  0x1a   :  { %921 = vmatprep.subr.bf16.mxu1 %v1020_v25 }
  0x1c   :  { %894 = vmatpush3.bf16.msra.mxu0 %v1021_v26 }
  0x1d   :  { %922 = vmatpush3.bf16.msra.mxu1 %v1022_v27  ;;  %895 = vmatprep.subr.bf16.mxu0 %v1023_v28 }
  0x1e   :  { %923 = vmatprep.subr.bf16.mxu1 %v1024_v29 }
  0x20   :  { %896 = vmatpush3.bf16.msra.mxu0 %v1025_v30 }
  0x21   :  { %924 = vmatpush3.bf16.msra.mxu1 %v1026_v31  ;;  %937 = vmatprep.subr.bf16.mxu0 %v1033_v36 }
  0x22   :  { %975 = vmatprep.subr.bf16.mxu1 %v1036_v39 }
  0x23   :  { %584 = vmatmul.mubr.bf16.vlgmr.msra.gmra.mrb[0].mxu0 %v1027_v32 }
  0x24   :  { %633 = vmatmul.mubr.bf16.vlgmr.msra.gmra.mrb[0].mxu1 %v1030_v34  ;;  %938 = vmatpush3.bf16.msra.mxu0 %v1034_v37 }
  0x25   :  { %939 = vmatprep.subr.bf16.mxu0 %v1035_v38  ;;  %976 = vmatpush3.bf16.msra.mxu1 %v1036_v39 }
  0x26   :  { %977 = vmatprep.subr.bf16.mxu1 %v1039_v42  ;;  %591 = vmatprep.mubr.bf16.mxu0 %v1047_v50 }
  0x27   :  { %640 = vmatprep.mubr.bf16.mxu1 %v1049_v51 }
  0x28   :  { %940 = vmatpush3.bf16.msra.mxu0 %v1037_v40 }
  0x29   :  { %941 = vmatprep.subr.bf16.mxu0 %v1038_v41  ;;  %978 = vmatpush3.bf16.msra.mxu1 %v1039_v42 }
  0x2a   :  { %979 = vmatprep.subr.bf16.mxu1 %v1042_v45 }
  0x2b   :  { %592 = vmatmul.mubr.bf16.gmra.mrb[4].mxu0 %v1053_v54 }
  0x2c   :  { %942 = vmatpush3.bf16.msra.mxu0 %v1040_v43  ;;  %641 = vmatmul.mubr.bf16.gmra.mrb[4].mxu1 %v1054_v55 }
  0x2d   :  { %943 = vmatprep.subr.bf16.mxu0 %v1041_v44  ;;  %980 = vmatpush3.bf16.msra.mxu1 %v1042_v45 }
  0x2e   :  { %981 = vmatprep.subr.bf16.mxu1 %v1045_v48  ;;  %681 = vmatprep.mubr.bf16.mxu0 %v1064_v63 }
  0x2f   :  { %991 = vmatprep.mubr.bf16.mxu1 %v1066_v1 }
  0x30   :  { %944 = vmatpush3.bf16.msra.mxu0 %v1043_v46 }
  0x31   :  { %945 = vmatprep.subr.bf16.mxu0 %v1044_v47  ;;  %982 = vmatpush3.bf16.msra.mxu1 %v1045_v48 }
  0x32   :  { %983 = vmatprep.subr.bf16.mxu1 %v1052_v53 }
  0x34   :  { %946 = vmatpush3.bf16.msra.mxu0 %v1046_v49 }
  0x35   :  { %947 = vmatprep.subr.bf16.mxu0 %v1051_v52  ;;  %984 = vmatpush3.bf16.msra.mxu1 %v1052_v53 }
  0x36   :  { %985 = vmatprep.subr.bf16.mxu1 %v1057_v58 }
  0x38   :  { %948 = vmatpush3.bf16.msra.mxu0 %v1055_v56 }
  0x39   :  { %949 = vmatprep.subr.bf16.mxu0 %v1056_v57  ;;  %986 = vmatpush3.bf16.msra.mxu1 %v1057_v58 }
  0x3a   :  { %987 = vmatprep.subr.bf16.mxu1 %v1060_v61 }
  0x3c   :  { %950 = vmatpush3.bf16.msra.mxu0 %v1058_v59 }
  0x3d   :  { %951 = vmatprep.subr.bf16.mxu0 %v1059_v60  ;;  %988 = vmatpush3.bf16.msra.mxu1 %v1060_v61 }
  0x3e   :  { %989 = vmatprep.subr.bf16.mxu1 %v1065_v0 }
  0x40   :  { %952 = vmatpush3.bf16.msra.mxu0 %v1061_v62 }
  0x41   :  { %990 = vmatpush3.bf16.msra.mxu1 %v1065_v0 }
  0x43   :  { %682 = vmatmul.mubr.bf16.vlgmr.msra.gmra.mrb[8].mxu0 %v1062_v2 }
  0x44   :  { %689 = vmatprep.mubr.bf16.mxu0 %v1068_v3  ;;  %992 = vmatmul.mubr.bf16.vlgmr.msra.gmra.mrb[8].mxu1 %v1067_v4 }
  0x4b   :  { %690 = vmatmul.mubr.bf16.gmra.mrb[12].mxu0 %v1070_v5 }
  0xf6   :  { %v897_v6 = vpop.f32.mrb[0].mxu0 }
  0xf7   :  { %v925_v7 = vpop.f32.mrb[0].mxu1  ;;  %v898_v8 = vpop.f32.mrb[1].mxu0 }
  0xf8   :  { %v899_v9 = vadd.f32 %v898_v8, %v897_v6  ;;  %v926_v10 = vpop.f32.mrb[1].mxu1  ;;  %v900_v11 = vpop.f32.mrb[2].mxu0 }
  0xf9   :  { %v927_v12 = vadd.f32 %v926_v10, %v925_v7  ;;  %v928_v13 = vpop.f32.mrb[2].mxu1  ;;  %v901_v14 = vpop.f32.mrb[3].mxu0 }
  0xfa   :  { %v902_v15 = vadd.f32 %v901_v14, %v900_v11  ;;  %v929_v16 = vpop.f32.mrb[3].mxu1 }
  0xfb   :  { %v635_v17 = vadd.f32 %v927_v12, %v899_v9  ;;  %v930_v18 = vadd.f32 %v929_v16, %v928_v13 }
  0xfd   :  { %v638_v19 = vadd.f32 %v930_v18, %v902_v15 }
  0xfe   :  { %v903_v20 = vpop.f32.mrb[4].mxu0 }
  0xff   :  { %v931_v21 = vpop.f32.mrb[4].mxu1  ;;  %v904_v22 = vpop.f32.mrb[5].mxu0 }
 0x100   :  { %v905_v23 = vadd.f32 %v904_v22, %v903_v20  ;;  %v932_v24 = vpop.f32.mrb[5].mxu1  ;;  %v906_v25 = vpop.f32.mrb[6].mxu0  ;;  %v791_v22 = vld [vmem:[%s1335_s2] sm:$0xff] }
 0x101   :  { %v933_v26 = vadd.f32 %v932_v24, %v931_v21  ;;  %v934_v27 = vpop.f32.mrb[6].mxu1  ;;  %v907_v28 = vpop.f32.mrb[7].mxu0 }
 0x102   :  { %v908_v29 = vadd.f32 %v907_v28, %v906_v25  ;;  %v935_v30 = vpop.f32.mrb[7].mxu1 }
 0x103   :  { %v643_v31 = vadd.f32 %v933_v26, %v905_v23  ;;  %v936_v32 = vadd.f32 %v935_v30, %v934_v27  ;;  %v792_v27 = vld [vmem:[%s1335_s2 + $0x8] sm:$0xff] }
 0x105   :  { %v646_v33 = vadd.f32 %v936_v32, %v908_v29  ;;  %v793_v32 = vld [vmem:[%s1335_s2 + $0x10] sm:$0xff] }
 0x116   :  { %v953_v34 = vpop.f32.mrb[8].mxu0 }
 0x117   :  { %v954_v35 = vpop.f32.mrb[9].mxu0  ;;  %v993_v39 = vpop.f32.mrb[8].mxu1 }
 0x118   :  { %v955_v36 = vadd.f32 %v954_v35, %v953_v34  ;;  %v956_v37 = vpop.f32.mrb[10].mxu0  ;;  %v732_v42 = vpop.f32.mrb[9].mxu1 }
 0x119   :  { %v957_v38 = vpop.f32.mrb[11].mxu0  ;;  %v994_v43 = vpop.f32.mrb[10].mxu1 }
 0x11a   :  { %v958_v40 = vadd.f32 %v957_v38, %v956_v37  ;;  %v684_v41 = vadd.f32 %v955_v36, %v635_v17  ;;  %v735_v46 = vpop.f32.mrb[11].mxu1  ;;  %v794_v37 = vld [vmem:[%s1335_s2 + $0x18] sm:$0xff] }
 0x11c   :  { %v733_v44 = vadd.f32 %v732_v42, %v684_v41  ;;  %v687_v45 = vadd.f32 %v958_v40, %v638_v19 }
 0x11e   :  { %v736_v47 = vadd.f32 %v735_v46, %v687_v45  ;;  %v959_v48 = vpop.f32.mrb[12].mxu0  ;;  %747 = vadd.xlane.f32.xlu0 %v733_v44 }
 0x11f   :  { %v960_v49 = vpop.f32.mrb[13].mxu0 }
 0x120   :  { %v961_v50 = vadd.f32 %v960_v49, %v959_v48  ;;  %v962_v51 = vpop.f32.mrb[14].mxu0 }
 0x121   :  { %v963_v52 = vpop.f32.mrb[15].mxu0 }
 0x122   :  { %v692_v53 = vadd.f32 %v961_v50, %v643_v31  ;;  %v964_v54 = vadd.f32 %v963_v52, %v962_v51  ;;  %749 = vadd.xlane.f32.xlu0 %v736_v47 }
 0x124   :  { %v695_v55 = vadd.f32 %v964_v54, %v646_v33  ;;  %v741_v56 = vadd.f32 %v993_v39, %v692_v53 }
 0x126   :  { %751 = vadd.xlane.f32.xlu1 %v741_v56  ;;  %v744_v57 = vadd.f32 %v994_v43, %v695_v55 }
 0x12a   :  { %753 = vadd.xlane.f32.xlu1 %v744_v57 }
 0x1ab   :  { %v748_v58 = vpop.xlane.xlu0 %747 }
 0x1ac   :  { %v755_v59 = vmul.f32 0.0078125, %v748_v58 }
 0x1ae   :  { %v759_v60 = vsub.f32 %v733_v44, %v755_v59 }
 0x1af   :  { %v750_v61 = vpop.xlane.xlu0 %749 }
 0x1b0   :  { %v756_v62 = vmul.f32 0.0078125, %v750_v61  ;;  %v763_v63 = vmul.f32 %v759_v60, %v759_v60 }
 0x1b2   :  { %v760_v0 = vsub.f32 %v736_v47, %v756_v62  ;;  %767 = vadd.xlane.f32.xlu0 %v763_v63 }
 0x1b3   :  { %v752_v1 = vpop.xlane.xlu1 %751 }
 0x1b4   :  { %v757_v2 = vmul.f32 0.0078125, %v752_v1  ;;  %v764_v3 = vmul.f32 %v760_v0, %v760_v0 }
 0x1b6   :  { %v761_v4 = vsub.f32 %v741_v56, %v757_v2  ;;  %769 = vadd.xlane.f32.xlu1 %v764_v3 }
 0x1b7   :  { %v754_v5 = vpop.xlane.xlu1 %753 }
 0x1b8   :  { %v758_v6 = vmul.f32 0.0078125, %v754_v5  ;;  %v765_v7 = vmul.f32 %v761_v4, %v761_v4 }
 0x1ba   :  { %v762_v8 = vsub.f32 %v744_v57, %v758_v6  ;;  %771 = vadd.xlane.f32.xlu0 %v765_v7 }
 0x1bc   :  { %v766_v9 = vmul.f32 %v762_v8, %v762_v8 }
 0x1be   :  { %773 = vadd.xlane.f32.xlu1 %v766_v9 }
 0x23f   :  { %v768_v10 = vpop.xlane.xlu0 %767 }
 0x240   :  { %v775_v11 = vmul.f32 0.0078125, %v768_v10 }
 0x242   :  { %v779_v12 = vadd.f32 1e-05, %v775_v11 }
 0x243   :  { %v770_v13 = vpop.xlane.xlu1 %769 }
 0x244   :  { %1071 = vrsqrt.f32 %v779_v12  ;;  %v776_v14 = vmul.f32 0.0078125, %v770_v13 }
 0x246   :  { %v780_v15 = vadd.f32 1e-05, %v776_v14 }
 0x247   :  { %v772_v16 = vpop.xlane.xlu0 %771 }
 0x248   :  { %1073 = vrsqrt.f32 %v780_v15  ;;  %v777_v17 = vmul.f32 0.0078125, %v772_v16 }
 0x24a   :  { %v781_v18 = vadd.f32 1e-05, %v777_v17 }
 0x24b   :  { %v774_v19 = vpop.xlane.xlu1 %773 }
 0x24c   :  { %1075 = vrsqrt.f32 %v781_v18  ;;  %v778_v20 = vmul.f32 0.0078125, %v774_v19 }
 0x24e   :  { %v1072_v21 = vpop.eup %1071  ;;  %v782_v23 = vadd.f32 1e-05, %v778_v20 }
 0x24f   :  { %v787_v24 = vmul.f32 %v1072_v21, %v759_v60 }
 0x250   :  { %1077 = vrsqrt.f32 %v782_v23 }
 0x251   :  { %v795_v25 = vadd.f32 %v791_v22, %v787_v24 }
 0x252   :  { %v1074_v26 = vpop.eup %1073 }
 0x253   :  { %v799_v28 = vmax.f32 %v795_v25, 0.0  ;;  %v788_v29 = vmul.f32 %v1074_v26, %v760_v0 }
 0x255   :  { %803 = vst [vmem:[%s1336_s3] sm:$0xff] %v799_v28  ;;  %v796_v30 = vadd.f32 %v792_v27, %v788_v29 }
 0x256   :  { %v1076_v31 = vpop.eup %1075 }
 0x257   :  { %v800_v33 = vmax.f32 %v796_v30, 0.0  ;;  %v789_v34 = vmul.f32 %v1076_v31, %v761_v4 }
 0x259   :  { %804 = vst [vmem:[%s1336_s3 + $0x8] sm:$0xff] %v800_v33  ;;  %v797_v35 = vadd.f32 %v793_v32, %v789_v34 }
 0x25a   :  { %v1078_v36 = vpop.eup %1077 }
 0x25b   :  { %v801_v38 = vmax.f32 %v797_v35, 0.0  ;;  %v790_v39 = vmul.f32 %v1078_v36, %v762_v8 }
 0x25d   :  { %805 = vst [vmem:[%s1336_s3 + $0x10] sm:$0xff] %v801_v38  ;;  %v798_v40 = vadd.f32 %v794_v37, %v790_v39 }
 0x25f   :  { %v802_v41 = vmax.f32 %v798_v40, 0.0 }
 0x261   :  { %806 = vst [vmem:[%s1336_s3 + $0x18] sm:$0xff] %v802_v41 }

// kernel: resnet2_forward.16
= control target key start
LH: loop header
LB: loop body
LE: loop exit
PB: predicated region body
PF: predicated region fallthrough
CT: control target
= control target key end

     0   :  { %vm744_vm0 = vcmask 130048   ;;  %s1326_s1 = inlined_call_operand.vmem [shape: bf16[896,16], index: 1, kind: input, shape index: {}]   ;;  %s1327_s0 = inlined_call_operand.vmem [shape: bf16[32,896], index: 0, kind: input, shape index: {}]   ;;  %s1328_s2 = inlined_call_operand.vmem [shape: f32[32,16], index: 2, kind: output, shape index: {}]  }
   0x1   :  { %v993_v0 = vld [vmem:[%s1326_s1 + $0x40] sm:$0xff]   ;;  %v997_v4 = vld [vmem:[%s1326_s1 + $0x48] sm:$0xff]   ;;  %v1001_v8 = vld [vmem:[%s1326_s1 + $0x50] sm:$0xff]  }
   0x2   :  { %v994_v1 = vld [vmem:[%s1326_s1 + $0xc0] sm:$0xff]   ;;  %879 = vmatprep.subr.bf16.mxu0 %v993_v0  ;;  %v998_v5 = vld [vmem:[%s1326_s1 + $0xc8] sm:$0xff]   ;;  %v1002_v9 = vld [vmem:[%s1326_s1 + $0xd0] sm:$0xff]  }
   0x3   :  { %v995_v2 = vld [vmem:[%s1326_s1] sm:$0xff]   ;;  %907 = vmatprep.subr.bf16.mxu1 %v994_v1  ;;  %v999_v6 = vld [vmem:[%s1326_s1 + $0x8] sm:$0xff]   ;;  %v1003_v10 = vld [vmem:[%s1326_s1 + $0x10] sm:$0xff]  }
   0x4   :  { %v996_v3 = vld [vmem:[%s1326_s1 + $0x80] sm:$0xff]   ;;  %880 = vmatpush3.bf16.msra.mxu0 %v995_v2  ;;  %v1000_v7 = vld [vmem:[%s1326_s1 + $0x88] sm:$0xff]   ;;  %v1004_v11 = vld [vmem:[%s1326_s1 + $0x90] sm:$0xff]  }
   0x5   :  { %908 = vmatpush3.bf16.msra.mxu1 %v996_v3  ;;  %881 = vmatprep.subr.bf16.mxu0 %v997_v4  ;;  %v1005_v12 = vld [vmem:[%s1326_s1 + $0x58] sm:$0xff]   ;;  %v1009_v16 = vld [vmem:[%s1326_s1 + $0x60] sm:$0xff]   ;;  %v1013_v20 = vld [vmem:[%s1326_s1 + $0x68] sm:$0xff]  }
   0x6   :  { %909 = vmatprep.subr.bf16.mxu1 %v998_v5  ;;  %v1006_v13 = vld [vmem:[%s1326_s1 + $0xd8] sm:$0xff]   ;;  %v1010_v17 = vld [vmem:[%s1326_s1 + $0xe0] sm:$0xff]   ;;  %v1014_v21 = vld [vmem:[%s1326_s1 + $0xe8] sm:$0xff]  }
   0x7   :  { %v1007_v14 = vld [vmem:[%s1326_s1 + $0x18] sm:$0xff]   ;;  %v1011_v18 = vld [vmem:[%s1326_s1 + $0x20] sm:$0xff]   ;;  %v1015_v22 = vld [vmem:[%s1326_s1 + $0x28] sm:$0xff]  }
   0x8   :  { %882 = vmatpush3.bf16.msra.mxu0 %v999_v6  ;;  %v1008_v15 = vld [vmem:[%s1326_s1 + $0x98] sm:$0xff]   ;;  %v1012_v19 = vld [vmem:[%s1326_s1 + $0xa0] sm:$0xff]   ;;  %v1016_v23 = vld [vmem:[%s1326_s1 + $0xa8] sm:$0xff]  }
   0x9   :  { %910 = vmatpush3.bf16.msra.mxu1 %v1000_v7  ;;  %883 = vmatprep.subr.bf16.mxu0 %v1001_v8  ;;  %v1017_v24 = vld [vmem:[%s1326_s1 + $0x70] sm:$0xff]   ;;  %v1021_v28 = vld [vmem:[%s1326_s1 + $0x78] sm:$0xff]   ;;  %v1027_v33 = vld [vmem:[%s1327_s0 + $0x4] ss:$28 sps:$4 sm:$0xff]  }
   0xa   :  { %911 = vmatprep.subr.bf16.mxu1 %v1002_v9  ;;  %v1018_v25 = vld [vmem:[%s1326_s1 + $0xf0] sm:$0xff]   ;;  %v1022_v29 = vld [vmem:[%s1326_s1 + $0xf8] sm:$0xff]   ;;  %v1028_v34 = vld [vmem:[%s1327_s0 + $0x8] ss:$28 sps:$4 sm:$0xff]   ;;  %580 = vmatprep.mubr.bf16.mxu0 %v1027_v33 }
   0xb   :  { %v1019_v26 = vld [vmem:[%s1326_s1 + $0x30] sm:$0xff]   ;;  %v1023_v30 = vld [vmem:[%s1326_s1 + $0x38] sm:$0xff]   ;;  %v1030_v35 = vld [vmem:[%s1327_s0 + $0xc] ss:$28 sps:$4 sm:$0xff]  }
   0xc   :  { %884 = vmatpush3.bf16.msra.mxu0 %v1003_v10  ;;  %v1020_v27 = vld [vmem:[%s1326_s1 + $0xb0] sm:$0xff]   ;;  %v1024_v31 = vld [vmem:[%s1326_s1 + $0xb8] sm:$0xff]   ;;  %v1031_v36 = vld [vmem:[%s1326_s1 + $0x140] sm:$0xff]   ;;  %629 = vmatprep.mubr.bf16.mxu1 %v1030_v35 }
   0xd   :  { %912 = vmatpush3.bf16.msra.mxu1 %v1004_v11  ;;  %885 = vmatprep.subr.bf16.mxu0 %v1005_v12  ;;  %v1025_v32 = vld [vmem:[%s1327_s0] ss:$28 sps:$4 sm:$0xff]   ;;  %v1033_v38 = vld [vmem:[%s1326_s1 + $0x148] sm:$0xff]   ;;  %v1036_v41 = vld [vmem:[%s1326_s1 + $0x150] sm:$0xff]  }
   0xe   :  { %913 = vmatprep.subr.bf16.mxu1 %v1006_v13  ;;  %v1032_v37 = vld [vmem:[%s1326_s1 + $0x100] sm:$0xff]   ;;  %v1035_v40 = vld [vmem:[%s1326_s1 + $0x108] sm:$0xff]   ;;  %v1038_v43 = vld [vmem:[%s1326_s1 + $0x110] sm:$0xff]  }
   0xf   :  { %v1034_v39 = vld [vmem:[%s1326_s1 + $0x180] sm:$0xff]   ;;  %v1037_v42 = vld [vmem:[%s1326_s1 + $0x188] sm:$0xff]   ;;  %v1039_v44 = vld [vmem:[%s1326_s1 + $0x158] sm:$0xff]  }
  0x10   :  { %886 = vmatpush3.bf16.msra.mxu0 %v1007_v14  ;;  %v1040_v45 = vld [vmem:[%s1326_s1 + $0x190] sm:$0xff]   ;;  %v1041_v46 = vld [vmem:[%s1326_s1 + $0x118] sm:$0xff]   ;;  %v1042_v47 = vld [vmem:[%s1326_s1 + $0x160] sm:$0xff]  }
  0x11   :  { %914 = vmatpush3.bf16.msra.mxu1 %v1008_v15  ;;  %887 = vmatprep.subr.bf16.mxu0 %v1009_v16  ;;  %v1043_v48 = vld [vmem:[%s1326_s1 + $0x198] sm:$0xff]   ;;  %v1044_v49 = vld [vmem:[%s1326_s1 + $0x120] sm:$0xff]   ;;  %v1049_v52 = vld [vmem:[%s1326_s1 + $0x168] sm:$0xff]  }
  0x12   :  { %915 = vmatprep.subr.bf16.mxu1 %v1010_v17  ;;  %v1045_v50 = vld [vmem:[%s1327_s0 + $0x3c] ss:$28 sps:$4 sm:$0xff]   ;;  %v1047_v51 = vld [vmem:[%s1327_s0 + $0x44] ss:$28 sps:$4 sm:$0xff]   ;;  %v1053_v56 = vld [vmem:[%s1326_s1 + $0x128] sm:$0xff]  }
  0x13   :  { %v1050_v53 = vld [vmem:[%s1326_s1 + $0x1a0] sm:$0xff]   ;;  %v1051_v54 = vld [vmem:[%s1327_s0 + $0x38] ss:$28 sps:$4 sm:$0xff]   ;;  %v1055_v58 = vld [vmem:[%s1326_s1 + $0x1a8] sm:$0xff]  }
  0x14   :  { %888 = vmatpush3.bf16.msra.mxu0 %v1011_v18  ;;  %v1052_v55 = vld [vmem:[%s1327_s0 + $0x40] ss:$28 sps:$4 sm:$0xff]   ;;  %v1054_v57 = vld [vmem:[%s1326_s1 + $0x170] sm:$0xff]   ;;  %v1066_v3 = vld [vmem:[%s1327_s0 + $0x4c] ss:$28 sps:$4 sm:$0xff]  }
  0x15   :  { %916 = vmatpush3.bf16.msra.mxu1 %v1012_v19  ;;  %889 = vmatprep.subr.bf16.mxu0 %v1013_v20  ;;  %v1056_v59 = vld [vmem:[%s1326_s1 + $0x130] sm:$0xff]   ;;  %v1057_v60 = vld [vmem:[%s1326_s1 + $0x178] sm:$0xff]   ;;  %v1068_v5 = vld [vmem:[%s1327_s0 + $0x48] ss:$28 sps:$4 sm:$0xff]  }
  0x16   :  { %917 = vmatprep.subr.bf16.mxu1 %v1014_v21  ;;  %v1058_v61 = vld [vmem:[%s1326_s1 + $0x1b0] sm:$0xff]   ;;  %v1059_v62 = vld [vmem:[%s1326_s1 + $0x138] sm:$0xff]  }
  0x17   :  { %v1062_v63 = vld [vmem:[%s1327_s0 + $0x14] ss:$28 sps:$4 sm:$0xff]   ;;  %v1063_v0 = vld [vmem:[%s1326_s1 + $0x1b8] sm:$0xff]  }
  0x18   :  { %890 = vmatpush3.bf16.msra.mxu0 %v1015_v22  ;;  %v1064_v1 = vld [vmem:[%s1327_s0 + $0x18] ss:$28 sps:$4 sm:$0xff]   ;;  %v1060_v2 = vld [vmem:[%s1327_s0 + $0x10] ss:$28 sps:$4 sm:$0xff]  }
  0x19   :  { %918 = vmatpush3.bf16.msra.mxu1 %v1016_v23  ;;  %891 = vmatprep.subr.bf16.mxu0 %v1017_v24  ;;  %v1065_v4 = vld [vmem:[%s1327_s0 + $0x50] ss:$28 sps:$4 sm:$0xff]  }
  0x1a   :  { %919 = vmatprep.subr.bf16.mxu1 %v1018_v25 }
  0x1c   :  { %892 = vmatpush3.bf16.msra.mxu0 %v1019_v26 }
  0x1d   :  { %920 = vmatpush3.bf16.msra.mxu1 %v1020_v27  ;;  %893 = vmatprep.subr.bf16.mxu0 %v1021_v28 }
  0x1e   :  { %921 = vmatprep.subr.bf16.mxu1 %v1022_v29 }
  0x20   :  { %894 = vmatpush3.bf16.msra.mxu0 %v1023_v30 }
  0x21   :  { %922 = vmatpush3.bf16.msra.mxu1 %v1024_v31  ;;  %935 = vmatprep.subr.bf16.mxu0 %v1031_v36 }
  0x22   :  { %973 = vmatprep.subr.bf16.mxu1 %v1034_v39 }
  0x23   :  { %581 = vmatmul.mubr.bf16.vlgmr.msra.gmra.mrb[0].mxu0 %v1025_v32 }
  0x24   :  { %630 = vmatmul.mubr.bf16.vlgmr.msra.gmra.mrb[0].mxu1 %v1028_v34  ;;  %936 = vmatpush3.bf16.msra.mxu0 %v1032_v37 }
  0x25   :  { %937 = vmatprep.subr.bf16.mxu0 %v1033_v38  ;;  %974 = vmatpush3.bf16.msra.mxu1 %v1034_v39 }
  0x26   :  { %975 = vmatprep.subr.bf16.mxu1 %v1037_v42  ;;  %588 = vmatprep.mubr.bf16.mxu0 %v1045_v50 }
  0x27   :  { %637 = vmatprep.mubr.bf16.mxu1 %v1047_v51 }
  0x28   :  { %938 = vmatpush3.bf16.msra.mxu0 %v1035_v40 }
  0x29   :  { %939 = vmatprep.subr.bf16.mxu0 %v1036_v41  ;;  %976 = vmatpush3.bf16.msra.mxu1 %v1037_v42 }
  0x2a   :  { %977 = vmatprep.subr.bf16.mxu1 %v1040_v45 }
  0x2b   :  { %589 = vmatmul.mubr.bf16.gmra.mrb[4].mxu0 %v1051_v54 }
  0x2c   :  { %940 = vmatpush3.bf16.msra.mxu0 %v1038_v43  ;;  %638 = vmatmul.mubr.bf16.gmra.mrb[4].mxu1 %v1052_v55 }
  0x2d   :  { %941 = vmatprep.subr.bf16.mxu0 %v1039_v44  ;;  %978 = vmatpush3.bf16.msra.mxu1 %v1040_v45 }
  0x2e   :  { %979 = vmatprep.subr.bf16.mxu1 %v1043_v48  ;;  %678 = vmatprep.mubr.bf16.mxu0 %v1062_v63 }
  0x2f   :  { %989 = vmatprep.mubr.bf16.mxu1 %v1064_v1 }
  0x30   :  { %942 = vmatpush3.bf16.msra.mxu0 %v1041_v46 }
  0x31   :  { %943 = vmatprep.subr.bf16.mxu0 %v1042_v47  ;;  %980 = vmatpush3.bf16.msra.mxu1 %v1043_v48 }
  0x32   :  { %981 = vmatprep.subr.bf16.mxu1 %v1050_v53 }
  0x34   :  { %944 = vmatpush3.bf16.msra.mxu0 %v1044_v49 }
  0x35   :  { %945 = vmatprep.subr.bf16.mxu0 %v1049_v52  ;;  %982 = vmatpush3.bf16.msra.mxu1 %v1050_v53 }
  0x36   :  { %983 = vmatprep.subr.bf16.mxu1 %v1055_v58 }
  0x38   :  { %946 = vmatpush3.bf16.msra.mxu0 %v1053_v56 }
  0x39   :  { %947 = vmatprep.subr.bf16.mxu0 %v1054_v57  ;;  %984 = vmatpush3.bf16.msra.mxu1 %v1055_v58 }
  0x3a   :  { %985 = vmatprep.subr.bf16.mxu1 %v1058_v61 }
  0x3c   :  { %948 = vmatpush3.bf16.msra.mxu0 %v1056_v59 }
  0x3d   :  { %949 = vmatprep.subr.bf16.mxu0 %v1057_v60  ;;  %986 = vmatpush3.bf16.msra.mxu1 %v1058_v61 }
  0x3e   :  { %987 = vmatprep.subr.bf16.mxu1 %v1063_v0 }
  0x40   :  { %950 = vmatpush3.bf16.msra.mxu0 %v1059_v62 }
  0x41   :  { %988 = vmatpush3.bf16.msra.mxu1 %v1063_v0 }
  0x43   :  { %679 = vmatmul.mubr.bf16.vlgmr.msra.gmra.mrb[8].mxu0 %v1060_v2 }
  0x44   :  { %686 = vmatprep.mubr.bf16.mxu0 %v1066_v3  ;;  %990 = vmatmul.mubr.bf16.vlgmr.msra.gmra.mrb[8].mxu1 %v1065_v4 }
  0x4b   :  { %687 = vmatmul.mubr.bf16.gmra.mrb[12].mxu0 %v1068_v5 }
  0xf6   :  { %v895_v6 = vpop.f32.mrb[0].mxu0 }
  0xf7   :  { %v923_v7 = vpop.f32.mrb[0].mxu1  ;;  %v896_v8 = vpop.f32.mrb[1].mxu0 }
  0xf8   :  { %v897_v9 = vadd.f32 %v896_v8, %v895_v6  ;;  %v924_v10 = vpop.f32.mrb[1].mxu1  ;;  %v898_v11 = vpop.f32.mrb[2].mxu0 }
  0xf9   :  { %v925_v12 = vadd.f32 %v924_v10, %v923_v7  ;;  %v926_v13 = vpop.f32.mrb[2].mxu1  ;;  %v899_v14 = vpop.f32.mrb[3].mxu0 }
  0xfa   :  { %v900_v15 = vadd.f32 %v899_v14, %v898_v11  ;;  %v927_v16 = vpop.f32.mrb[3].mxu1 }
  0xfb   :  { %v632_v17 = vadd.f32 %v925_v12, %v897_v9  ;;  %v928_v18 = vadd.f32 %v927_v16, %v926_v13 }
  0xfd   :  { %v635_v19 = vadd.f32 %v928_v18, %v900_v15 }
  0xfe   :  { %v901_v20 = vpop.f32.mrb[4].mxu0 }
  0xff   :  { %v929_v21 = vpop.f32.mrb[4].mxu1  ;;  %v902_v22 = vpop.f32.mrb[5].mxu0 }
 0x100   :  { %v903_v23 = vadd.f32 %v902_v22, %v901_v20  ;;  %v930_v24 = vpop.f32.mrb[5].mxu1  ;;  %v904_v25 = vpop.f32.mrb[6].mxu0 }
 0x101   :  { %v931_v26 = vadd.f32 %v930_v24, %v929_v21  ;;  %v932_v27 = vpop.f32.mrb[6].mxu1  ;;  %v905_v28 = vpop.f32.mrb[7].mxu0 }
 0x102   :  { %v906_v29 = vadd.f32 %v905_v28, %v904_v25  ;;  %v933_v30 = vpop.f32.mrb[7].mxu1 }
 0x103   :  { %v640_v31 = vadd.f32 %v931_v26, %v903_v23  ;;  %v934_v32 = vadd.f32 %v933_v30, %v932_v27 }
 0x105   :  { %v643_v33 = vadd.f32 %v934_v32, %v906_v29 }
 0x116   :  { %v951_v34 = vpop.f32.mrb[8].mxu0 }
 0x117   :  { %v952_v35 = vpop.f32.mrb[9].mxu0  ;;  %v991_v39 = vpop.f32.mrb[8].mxu1 }
 0x118   :  { %v953_v36 = vadd.f32 %v952_v35, %v951_v34  ;;  %v954_v37 = vpop.f32.mrb[10].mxu0  ;;  %v729_v42 = vpop.f32.mrb[9].mxu1 }
 0x119   :  { %v955_v38 = vpop.f32.mrb[11].mxu0  ;;  %v992_v43 = vpop.f32.mrb[10].mxu1 }
 0x11a   :  { %v956_v40 = vadd.f32 %v955_v38, %v954_v37  ;;  %v681_v41 = vadd.f32 %v953_v36, %v632_v17  ;;  %v732_v46 = vpop.f32.mrb[11].mxu1 }
 0x11c   :  { %v730_v44 = vadd.f32 %v729_v42, %v681_v41  ;;  %v684_v45 = vadd.f32 %v956_v40, %v635_v19 }
 0x11e   :  { %v733_v47 = vadd.f32 %v732_v46, %v684_v45  ;;  %v957_v48 = vpop.f32.mrb[12].mxu0  ;;  %v745_v49 = vsel %vm744_vm0, %v730_v44, 0.0 }
 0x11f   :  { %v958_v50 = vpop.f32.mrb[13].mxu0  ;;  %746 = vadd.xlane.f32.xlu0 %v745_v49 }
 0x120   :  { %v959_v51 = vadd.f32 %v958_v50, %v957_v48  ;;  %v960_v52 = vpop.f32.mrb[14].mxu0  ;;  %v748_v56 = vsel %vm744_vm0, %v733_v47, 0.0 }
 0x121   :  { %v961_v53 = vpop.f32.mrb[15].mxu0 }
 0x122   :  { %v689_v54 = vadd.f32 %v959_v51, %v640_v31  ;;  %v962_v55 = vadd.f32 %v961_v53, %v960_v52 }
 0x123   :  { %749 = vadd.xlane.f32.xlu0 %v748_v56 }
 0x124   :  { %v692_v57 = vadd.f32 %v962_v55, %v643_v33  ;;  %v738_v58 = vadd.f32 %v991_v39, %v689_v54 }
 0x126   :  { %v751_v59 = vsel %vm744_vm0, %v738_v58, 0.0  ;;  %v741_v60 = vadd.f32 %v992_v43, %v692_v57 }
 0x127   :  { %752 = vadd.xlane.f32.xlu1 %v751_v59 }
 0x128   :  { %v754_v61 = vsel %vm744_vm0, %v741_v60, 0.0 }
 0x12b   :  { %755 = vadd.xlane.f32.xlu1 %v754_v61 }
 0x1ac   :  { %v747_v62 = vpop.xlane.xlu0 %746 }
 0x1ad   :  { %v757_v63 = vmul.f32 0.0625, %v747_v62 }
 0x1af   :  { %v761_v0 = vsub.f32 %v730_v44, %v757_v63 }
 0x1b0   :  { %v750_v1 = vpop.xlane.xlu0 %749 }
 0x1b1   :  { %v758_v2 = vmul.f32 0.0625, %v750_v1  ;;  %v765_v3 = vmul.f32 %v761_v0, %v761_v0 }
 0x1b3   :  { %v762_v4 = vsub.f32 %v733_v47, %v758_v2  ;;  %v769_v5 = vsel %vm744_vm0, %v765_v3, 0.0 }
 0x1b4   :  { %v753_v6 = vpop.xlane.xlu1 %752  ;;  %770 = vadd.xlane.f32.xlu0 %v769_v5 }
 0x1b5   :  { %v759_v7 = vmul.f32 0.0625, %v753_v6  ;;  %v766_v8 = vmul.f32 %v762_v4, %v762_v4 }
 0x1b7   :  { %v763_v9 = vsub.f32 %v738_v58, %v759_v7  ;;  %v772_v10 = vsel %vm744_vm0, %v766_v8, 0.0 }
 0x1b8   :  { %v756_v11 = vpop.xlane.xlu1 %755  ;;  %773 = vadd.xlane.f32.xlu1 %v772_v10 }
 0x1b9   :  { %v760_v12 = vmul.f32 0.0625, %v756_v11  ;;  %v767_v13 = vmul.f32 %v763_v9, %v763_v9 }
 0x1bb   :  { %v764_v14 = vsub.f32 %v741_v60, %v760_v12  ;;  %v775_v15 = vsel %vm744_vm0, %v767_v13, 0.0 }
 0x1bc   :  { %776 = vadd.xlane.f32.xlu0 %v775_v15 }
 0x1bd   :  { %v768_v16 = vmul.f32 %v764_v14, %v764_v14 }
 0x1bf   :  { %v778_v17 = vsel %vm744_vm0, %v768_v16, 0.0 }
 0x1c0   :  { %779 = vadd.xlane.f32.xlu1 %v778_v17 }
 0x241   :  { %v771_v18 = vpop.xlane.xlu0 %770 }
 0x242   :  { %v781_v19 = vmul.f32 0.0625, %v771_v18 }
 0x244   :  { %v785_v20 = vadd.f32 1e-05, %v781_v19 }
 0x245   :  { %v774_v21 = vpop.xlane.xlu1 %773 }
 0x246   :  { %1069 = vrsqrt.f32 %v785_v20  ;;  %v782_v22 = vmul.f32 0.0625, %v774_v21 }
 0x248   :  { %v786_v23 = vadd.f32 1e-05, %v782_v22 }
 0x249   :  { %v777_v24 = vpop.xlane.xlu0 %776 }
 0x24a   :  { %1071 = vrsqrt.f32 %v786_v23  ;;  %v783_v25 = vmul.f32 0.0625, %v777_v24 }
 0x24c   :  { %v787_v26 = vadd.f32 1e-05, %v783_v25 }
 0x24d   :  { %v780_v27 = vpop.xlane.xlu1 %779 }
 0x24e   :  { %1073 = vrsqrt.f32 %v787_v26  ;;  %v784_v28 = vmul.f32 0.0625, %v780_v27 }
 0x250   :  { %v1070_v29 = vpop.eup %1069  ;;  %v788_v30 = vadd.f32 1e-05, %v784_v28 }
 0x251   :  { %v793_v31 = vmul.f32 %v1070_v29, %v761_v0 }
 0x252   :  { %1075 = vrsqrt.f32 %v788_v30 }
 0x253   :  { %v797_v32 = vmax.f32 %v793_v31, 0.0 }
 0x254   :  { %v1072_v33 = vpop.eup %1071 }
 0x255   :  { %801 = vst.msk [vmem:[%s1328_s2] sm:$0xff] %vm744_vm0, %v797_v32  ;;  %v794_v34 = vmul.f32 %v1072_v33, %v762_v4 }
 0x257   :  { %v798_v35 = vmax.f32 %v794_v34, 0.0 }
 0x258   :  { %v1074_v36 = vpop.eup %1073 }
 0x259   :  { %802 = vst.msk [vmem:[%s1328_s2 + $0x8] sm:$0xff] %vm744_vm0, %v798_v35  ;;  %v795_v37 = vmul.f32 %v1074_v36, %v763_v9 }
 0x25b   :  { %v799_v38 = vmax.f32 %v795_v37, 0.0 }
 0x25c   :  { %v1076_v39 = vpop.eup %1075 }
 0x25d   :  { %803 = vst.msk [vmem:[%s1328_s2 + $0x10] sm:$0xff] %vm744_vm0, %v799_v38  ;;  %v796_v40 = vmul.f32 %v1076_v39, %v764_v14 }
 0x25f   :  { %v800_v41 = vmax.f32 %v796_v40, 0.0 }
 0x261   :  { %804 = vst.msk [vmem:[%s1328_s2 + $0x18] sm:$0xff] %vm744_vm0, %v800_v41 }

// kernel: resnet2_forward.17
= control target key start
LH: loop header
LB: loop body
LE: loop exit
PB: predicated region body
PF: predicated region fallthrough
CT: control target
= control target key end

     0   :  { %vm141_vm0 = vcmask 130048   ;;  %s329_s1 = inlined_call_operand.vmem [shape: bf16[128,16], index: 1, kind: input, shape index: {}]   ;;  %s330_s0 = inlined_call_operand.vmem [shape: bf16[32,128], index: 0, kind: input, shape index: {}]   ;;  %s331_s2 = inlined_call_operand.vmem [shape: f32[32,16], index: 2, kind: output, shape index: {}]  }
   0x1   :  { %v242_v0 = vld [vmem:[%s329_s1] sm:$0xff]   ;;  %v243_v1 = vld [vmem:[%s329_s1 + $0x8] sm:$0xff]   ;;  %v244_v2 = vld [vmem:[%s329_s1 + $0x10] sm:$0xff]  }
   0x2   :  { %222 = vmatprep.subr.bf16.mxu0 %v242_v0  ;;  %v245_v3 = vld [vmem:[%s329_s1 + $0x18] sm:$0xff]   ;;  %v250_v4 = vld [vmem:[%s330_s0] sm:$0xff]   ;;  %v247_v6 = vld [vmem:[%s329_s1 + $0x28] sm:$0xff]  }
   0x3   :  { %223 = vmatpush3.bf16.msra.mxu0 %v242_v0  ;;  %238 = vmatprep.mubr.bf16.mxu0 %v250_v4  ;;  %v246_v5 = vld [vmem:[%s329_s1 + $0x20] sm:$0xff]   ;;  %v248_v7 = vld [vmem:[%s329_s1 + $0x30] sm:$0xff]   ;;  %v249_v8 = vld [vmem:[%s329_s1 + $0x38] sm:$0xff]  }
   0x4   :  { %224 = vmatprep.subr.bf16.mxu0 %v243_v1  ;;  %v251_v9 = vld [vmem:[%s330_s0 + $0x8] sm:$0xff]  }
   0x7   :  { %225 = vmatpush3.bf16.msra.mxu0 %v243_v1 }
   0x8   :  { %226 = vmatprep.subr.bf16.mxu0 %v244_v2 }
   0xb   :  { %227 = vmatpush3.bf16.msra.mxu0 %v244_v2 }
   0xc   :  { %228 = vmatprep.subr.bf16.mxu0 %v245_v3 }
   0xf   :  { %229 = vmatpush3.bf16.msra.mxu0 %v245_v3 }
  0x10   :  { %230 = vmatprep.subr.bf16.mxu0 %v246_v5 }
  0x13   :  { %231 = vmatpush3.bf16.msra.mxu0 %v246_v5 }
  0x14   :  { %232 = vmatprep.subr.bf16.mxu0 %v247_v6 }
  0x17   :  { %233 = vmatpush3.bf16.msra.mxu0 %v247_v6 }
  0x18   :  { %234 = vmatprep.subr.bf16.mxu0 %v248_v7 }
  0x1b   :  { %235 = vmatpush3.bf16.msra.mxu0 %v248_v7 }
  0x1c   :  { %236 = vmatprep.subr.bf16.mxu0 %v249_v8 }
  0x1f   :  { %237 = vmatpush3.bf16.msra.mxu0 %v249_v8 }
  0x22   :  { %239 = vmatmul.mubr.bf16.vlgmr.msra.gmra.mrb[0].mxu0 %v251_v9 }
  0xf5   :  { %v240_v10 = vpop.f32.mrb[0].mxu0 }
  0xf6   :  { %v126_v11 = vpop.f32.mrb[1].mxu0  ;;  %v148_v12 = vsel %vm141_vm0, %v240_v10, 0.0 }
  0xf7   :  { %149 = vadd.xlane.f32.xlu1 %v148_v12  ;;  %v241_v13 = vpop.f32.mrb[2].mxu0  ;;  %v142_v14 = vsel %vm141_vm0, %v126_v11, 0.0 }
  0xf8   :  { %143 = vadd.xlane.f32.xlu0 %v142_v14  ;;  %v129_v15 = vpop.f32.mrb[3].mxu0  ;;  %v151_v16 = vsel %vm141_vm0, %v241_v13, 0.0 }
  0xf9   :  { %v145_v17 = vsel %vm141_vm0, %v129_v15, 0.0 }
  0xfb   :  { %152 = vadd.xlane.f32.xlu1 %v151_v16 }
  0xfc   :  { %146 = vadd.xlane.f32.xlu0 %v145_v17 }
 0x184   :  { %v150_v18 = vpop.xlane.xlu1 %149 }
 0x185   :  { %v156_v19 = vmul.f32 0.0625, %v150_v18  ;;  %v144_v20 = vpop.xlane.xlu0 %143 }
 0x186   :  { %v154_v21 = vmul.f32 0.0625, %v144_v20 }
 0x187   :  { %v160_v22 = vsub.f32 %v240_v10, %v156_v19 }
 0x188   :  { %v158_v23 = vsub.f32 %v126_v11, %v154_v21  ;;  %v153_v24 = vpop.xlane.xlu1 %152 }
 0x189   :  { %v157_v25 = vmul.f32 0.0625, %v153_v24  ;;  %v147_v26 = vpop.xlane.xlu0 %146  ;;  %v164_v32 = vmul.f32 %v160_v22, %v160_v22 }
 0x18a   :  { %v155_v27 = vmul.f32 0.0625, %v147_v26  ;;  %v162_v28 = vmul.f32 %v158_v23, %v158_v23 }
 0x18b   :  { %v161_v29 = vsub.f32 %v241_v13, %v157_v25  ;;  %v172_v34 = vsel %vm141_vm0, %v164_v32, 0.0 }
 0x18c   :  { %v159_v30 = vsub.f32 %v129_v15, %v155_v27  ;;  %v166_v31 = vsel %vm141_vm0, %v162_v28, 0.0 }
 0x18d   :  { %167 = vadd.xlane.f32.xlu0 %v166_v31  ;;  %v165_v36 = vmul.f32 %v161_v29, %v161_v29 }
 0x18e   :  { %v163_v33 = vmul.f32 %v159_v30, %v159_v30 }
 0x18f   :  { %v175_v37 = vsel %vm141_vm0, %v165_v36, 0.0 }
 0x190   :  { %v169_v35 = vsel %vm141_vm0, %v163_v33, 0.0 }
 0x191   :  { %173 = vadd.xlane.f32.xlu0 %v172_v34  ;;  %170 = vadd.xlane.f32.xlu1 %v169_v35 }
 0x195   :  { %176 = vadd.xlane.f32.xlu1 %v175_v37 }
 0x21a   :  { %v168_v38 = vpop.xlane.xlu0 %167 }
 0x21b   :  { %v178_v39 = vmul.f32 0.0625, %v168_v38 }
 0x21d   :  { %v182_v40 = vadd.f32 1e-05, %v178_v39 }
 0x21e   :  { %v171_v41 = vpop.xlane.xlu1 %170  ;;  %v174_v42 = vpop.xlane.xlu0 %173 }
 0x21f   :  { %252 = vrsqrt.f32 %v182_v40  ;;  %v179_v43 = vmul.f32 0.0625, %v171_v41  ;;  %v180_v44 = vmul.f32 0.0625, %v174_v42 }
 0x221   :  { %v183_v45 = vadd.f32 1e-05, %v179_v43  ;;  %v184_v46 = vadd.f32 1e-05, %v180_v44 }
 0x222   :  { %v177_v47 = vpop.xlane.xlu1 %176 }
 0x223   :  { %254 = vrsqrt.f32 %v183_v45  ;;  %v181_v48 = vmul.f32 0.0625, %v177_v47 }
 0x224   :  { %256 = vrsqrt.f32 %v184_v46 }
 0x225   :  { %v185_v49 = vadd.f32 1e-05, %v181_v48 }
 0x227   :  { %258 = vrsqrt.f32 %v185_v49 }
 0x229   :  { %v253_v50 = vpop.eup %252 }
 0x22a   :  { %v190_v51 = vmul.f32 %v253_v50, %v158_v23 }
 0x22c   :  { %194 = vst.msk [vmem:[%s331_s2] sm:$0xff] %vm141_vm0, %v190_v51 }
 0x22d   :  { %v255_v52 = vpop.eup %254 }
 0x22e   :  { %v257_v53 = vpop.eup %256  ;;  %v191_v54 = vmul.f32 %v255_v52, %v159_v30 }
 0x22f   :  { %v192_v55 = vmul.f32 %v257_v53, %v160_v22 }
 0x230   :  { %195 = vst.msk [vmem:[%s331_s2 + $0x8] sm:$0xff] %vm141_vm0, %v191_v54 }
 0x231   :  { %v259_v56 = vpop.eup %258  ;;  %196 = vst.msk [vmem:[%s331_s2 + $0x10] sm:$0xff] %vm141_vm0, %v192_v55 }
 0x232   :  { %v193_v57 = vmul.f32 %v259_v56, %v161_v29 }
 0x234   :  { %197 = vst.msk [vmem:[%s331_s2 + $0x18] sm:$0xff] %vm141_vm0, %v193_v57 }

// kernel: resnet2_forward.18
= control target key start
LH: loop header
LB: loop body
LE: loop exit
PB: predicated region body
PF: predicated region fallthrough
CT: control target
= control target key end

     0   :  { %vm747_vm0 = vcmask 130048   ;;  %s1354_s1 = inlined_call_operand.vmem [shape: bf16[896,16], index: 1, kind: input, shape index: {}]   ;;  %s1355_s0 = inlined_call_operand.vmem [shape: bf16[32,896], index: 0, kind: input, shape index: {}]   ;;  %s1356_s2 = inlined_call_operand.vmem [shape: f32[32,16], index: 2, kind: input, shape index: {}]   ;;  %s1357_s3 = inlined_call_operand.vmem [shape: f32[32,16], index: 3, kind: output, shape index: {}]  }
   0x1   :  { %v1004_v0 = vld [vmem:[%s1354_s1 + $0x40] sm:$0xff]   ;;  %v1008_v4 = vld [vmem:[%s1354_s1 + $0x48] sm:$0xff]   ;;  %v1012_v8 = vld [vmem:[%s1354_s1 + $0x50] sm:$0xff]  }
   0x2   :  { %v1005_v1 = vld [vmem:[%s1354_s1 + $0xc0] sm:$0xff]   ;;  %890 = vmatprep.subr.bf16.mxu0 %v1004_v0  ;;  %v1009_v5 = vld [vmem:[%s1354_s1 + $0xc8] sm:$0xff]   ;;  %v1013_v9 = vld [vmem:[%s1354_s1 + $0xd0] sm:$0xff]  }
   0x3   :  { %v1006_v2 = vld [vmem:[%s1354_s1] sm:$0xff]   ;;  %918 = vmatprep.subr.bf16.mxu1 %v1005_v1  ;;  %v1010_v6 = vld [vmem:[%s1354_s1 + $0x8] sm:$0xff]   ;;  %v1014_v10 = vld [vmem:[%s1354_s1 + $0x10] sm:$0xff]  }
   0x4   :  { %v1007_v3 = vld [vmem:[%s1354_s1 + $0x80] sm:$0xff]   ;;  %891 = vmatpush3.bf16.msra.mxu0 %v1006_v2  ;;  %v1011_v7 = vld [vmem:[%s1354_s1 + $0x88] sm:$0xff]   ;;  %v1015_v11 = vld [vmem:[%s1354_s1 + $0x90] sm:$0xff]  }
   0x5   :  { %919 = vmatpush3.bf16.msra.mxu1 %v1007_v3  ;;  %892 = vmatprep.subr.bf16.mxu0 %v1008_v4  ;;  %v1016_v12 = vld [vmem:[%s1354_s1 + $0x58] sm:$0xff]   ;;  %v1020_v16 = vld [vmem:[%s1354_s1 + $0x60] sm:$0xff]   ;;  %v1024_v20 = vld [vmem:[%s1354_s1 + $0x68] sm:$0xff]  }
   0x6   :  { %920 = vmatprep.subr.bf16.mxu1 %v1009_v5  ;;  %v1017_v13 = vld [vmem:[%s1354_s1 + $0xd8] sm:$0xff]   ;;  %v1021_v17 = vld [vmem:[%s1354_s1 + $0xe0] sm:$0xff]   ;;  %v1025_v21 = vld [vmem:[%s1354_s1 + $0xe8] sm:$0xff]  }
   0x7   :  { %v1018_v14 = vld [vmem:[%s1354_s1 + $0x18] sm:$0xff]   ;;  %v1022_v18 = vld [vmem:[%s1354_s1 + $0x20] sm:$0xff]   ;;  %v1026_v22 = vld [vmem:[%s1354_s1 + $0x28] sm:$0xff]  }
   0x8   :  { %893 = vmatpush3.bf16.msra.mxu0 %v1010_v6  ;;  %v1019_v15 = vld [vmem:[%s1354_s1 + $0x98] sm:$0xff]   ;;  %v1023_v19 = vld [vmem:[%s1354_s1 + $0xa0] sm:$0xff]   ;;  %v1027_v23 = vld [vmem:[%s1354_s1 + $0xa8] sm:$0xff]  }
   0x9   :  { %921 = vmatpush3.bf16.msra.mxu1 %v1011_v7  ;;  %894 = vmatprep.subr.bf16.mxu0 %v1012_v8  ;;  %v1028_v24 = vld [vmem:[%s1354_s1 + $0x70] sm:$0xff]   ;;  %v1032_v28 = vld [vmem:[%s1354_s1 + $0x78] sm:$0xff]   ;;  %v1038_v33 = vld [vmem:[%s1355_s0 + $0x4] ss:$28 sps:$4 sm:$0xff]  }
   0xa   :  { %922 = vmatprep.subr.bf16.mxu1 %v1013_v9  ;;  %v1029_v25 = vld [vmem:[%s1354_s1 + $0xf0] sm:$0xff]   ;;  %v1033_v29 = vld [vmem:[%s1354_s1 + $0xf8] sm:$0xff]   ;;  %v1039_v34 = vld [vmem:[%s1355_s0 + $0x8] ss:$28 sps:$4 sm:$0xff]   ;;  %583 = vmatprep.mubr.bf16.mxu0 %v1038_v33 }
   0xb   :  { %v1030_v26 = vld [vmem:[%s1354_s1 + $0x30] sm:$0xff]   ;;  %v1034_v30 = vld [vmem:[%s1354_s1 + $0x38] sm:$0xff]   ;;  %v1041_v35 = vld [vmem:[%s1355_s0 + $0xc] ss:$28 sps:$4 sm:$0xff]  }
   0xc   :  { %895 = vmatpush3.bf16.msra.mxu0 %v1014_v10  ;;  %v1031_v27 = vld [vmem:[%s1354_s1 + $0xb0] sm:$0xff]   ;;  %v1035_v31 = vld [vmem:[%s1354_s1 + $0xb8] sm:$0xff]   ;;  %v1042_v36 = vld [vmem:[%s1354_s1 + $0x140] sm:$0xff]   ;;  %632 = vmatprep.mubr.bf16.mxu1 %v1041_v35 }
   0xd   :  { %923 = vmatpush3.bf16.msra.mxu1 %v1015_v11  ;;  %896 = vmatprep.subr.bf16.mxu0 %v1016_v12  ;;  %v1036_v32 = vld [vmem:[%s1355_s0] ss:$28 sps:$4 sm:$0xff]   ;;  %v1044_v38 = vld [vmem:[%s1354_s1 + $0x148] sm:$0xff]   ;;  %v1047_v41 = vld [vmem:[%s1354_s1 + $0x150] sm:$0xff]  }
   0xe   :  { %924 = vmatprep.subr.bf16.mxu1 %v1017_v13  ;;  %v1043_v37 = vld [vmem:[%s1354_s1 + $0x100] sm:$0xff]   ;;  %v1046_v40 = vld [vmem:[%s1354_s1 + $0x108] sm:$0xff]   ;;  %v1049_v43 = vld [vmem:[%s1354_s1 + $0x110] sm:$0xff]  }
   0xf   :  { %v1045_v39 = vld [vmem:[%s1354_s1 + $0x180] sm:$0xff]   ;;  %v1048_v42 = vld [vmem:[%s1354_s1 + $0x188] sm:$0xff]   ;;  %v1050_v44 = vld [vmem:[%s1354_s1 + $0x158] sm:$0xff]  }
  0x10   :  { %897 = vmatpush3.bf16.msra.mxu0 %v1018_v14  ;;  %v1051_v45 = vld [vmem:[%s1354_s1 + $0x190] sm:$0xff]   ;;  %v1052_v46 = vld [vmem:[%s1354_s1 + $0x118] sm:$0xff]   ;;  %v1053_v47 = vld [vmem:[%s1354_s1 + $0x160] sm:$0xff]  }
  0x11   :  { %925 = vmatpush3.bf16.msra.mxu1 %v1019_v15  ;;  %898 = vmatprep.subr.bf16.mxu0 %v1020_v16  ;;  %v1054_v48 = vld [vmem:[%s1354_s1 + $0x198] sm:$0xff]   ;;  %v1055_v49 = vld [vmem:[%s1354_s1 + $0x120] sm:$0xff]   ;;  %v1060_v52 = vld [vmem:[%s1354_s1 + $0x168] sm:$0xff]  }
  0x12   :  { %926 = vmatprep.subr.bf16.mxu1 %v1021_v17  ;;  %v1056_v50 = vld [vmem:[%s1355_s0 + $0x3c] ss:$28 sps:$4 sm:$0xff]   ;;  %v1058_v51 = vld [vmem:[%s1355_s0 + $0x44] ss:$28 sps:$4 sm:$0xff]   ;;  %v1064_v56 = vld [vmem:[%s1354_s1 + $0x128] sm:$0xff]  }
  0x13   :  { %v1061_v53 = vld [vmem:[%s1354_s1 + $0x1a0] sm:$0xff]   ;;  %v1062_v54 = vld [vmem:[%s1355_s0 + $0x38] ss:$28 sps:$4 sm:$0xff]   ;;  %v1066_v58 = vld [vmem:[%s1354_s1 + $0x1a8] sm:$0xff]  }
  0x14   :  { %899 = vmatpush3.bf16.msra.mxu0 %v1022_v18  ;;  %v1063_v55 = vld [vmem:[%s1355_s0 + $0x40] ss:$28 sps:$4 sm:$0xff]   ;;  %v1065_v57 = vld [vmem:[%s1354_s1 + $0x170] sm:$0xff]   ;;  %v1077_v3 = vld [vmem:[%s1355_s0 + $0x4c] ss:$28 sps:$4 sm:$0xff]  }
  0x15   :  { %927 = vmatpush3.bf16.msra.mxu1 %v1023_v19  ;;  %900 = vmatprep.subr.bf16.mxu0 %v1024_v20  ;;  %v1067_v59 = vld [vmem:[%s1354_s1 + $0x130] sm:$0xff]   ;;  %v1068_v60 = vld [vmem:[%s1354_s1 + $0x178] sm:$0xff]   ;;  %v1079_v5 = vld [vmem:[%s1355_s0 + $0x48] ss:$28 sps:$4 sm:$0xff]  }
  0x16   :  { %928 = vmatprep.subr.bf16.mxu1 %v1025_v21  ;;  %v1069_v61 = vld [vmem:[%s1354_s1 + $0x1b0] sm:$0xff]   ;;  %v1070_v62 = vld [vmem:[%s1354_s1 + $0x138] sm:$0xff]  }
  0x17   :  { %v1073_v63 = vld [vmem:[%s1355_s0 + $0x14] ss:$28 sps:$4 sm:$0xff]   ;;  %v1074_v0 = vld [vmem:[%s1354_s1 + $0x1b8] sm:$0xff]  }
  0x18   :  { %901 = vmatpush3.bf16.msra.mxu0 %v1026_v22  ;;  %v1075_v1 = vld [vmem:[%s1355_s0 + $0x18] ss:$28 sps:$4 sm:$0xff]   ;;  %v1071_v2 = vld [vmem:[%s1355_s0 + $0x10] ss:$28 sps:$4 sm:$0xff]  }
  0x19   :  { %929 = vmatpush3.bf16.msra.mxu1 %v1027_v23  ;;  %902 = vmatprep.subr.bf16.mxu0 %v1028_v24  ;;  %v1076_v4 = vld [vmem:[%s1355_s0 + $0x50] ss:$28 sps:$4 sm:$0xff]  }
  0x1a   :  { %930 = vmatprep.subr.bf16.mxu1 %v1029_v25 }
  0x1c   :  { %903 = vmatpush3.bf16.msra.mxu0 %v1030_v26 }
  0x1d   :  { %931 = vmatpush3.bf16.msra.mxu1 %v1031_v27  ;;  %904 = vmatprep.subr.bf16.mxu0 %v1032_v28 }
  0x1e   :  { %932 = vmatprep.subr.bf16.mxu1 %v1033_v29 }
  0x20   :  { %905 = vmatpush3.bf16.msra.mxu0 %v1034_v30 }
  0x21   :  { %933 = vmatpush3.bf16.msra.mxu1 %v1035_v31  ;;  %946 = vmatprep.subr.bf16.mxu0 %v1042_v36 }
  0x22   :  { %984 = vmatprep.subr.bf16.mxu1 %v1045_v39 }
  0x23   :  { %584 = vmatmul.mubr.bf16.vlgmr.msra.gmra.mrb[0].mxu0 %v1036_v32 }
  0x24   :  { %633 = vmatmul.mubr.bf16.vlgmr.msra.gmra.mrb[0].mxu1 %v1039_v34  ;;  %947 = vmatpush3.bf16.msra.mxu0 %v1043_v37 }
  0x25   :  { %948 = vmatprep.subr.bf16.mxu0 %v1044_v38  ;;  %985 = vmatpush3.bf16.msra.mxu1 %v1045_v39 }
  0x26   :  { %986 = vmatprep.subr.bf16.mxu1 %v1048_v42  ;;  %591 = vmatprep.mubr.bf16.mxu0 %v1056_v50 }
  0x27   :  { %640 = vmatprep.mubr.bf16.mxu1 %v1058_v51 }
  0x28   :  { %949 = vmatpush3.bf16.msra.mxu0 %v1046_v40 }
  0x29   :  { %950 = vmatprep.subr.bf16.mxu0 %v1047_v41  ;;  %987 = vmatpush3.bf16.msra.mxu1 %v1048_v42 }
  0x2a   :  { %988 = vmatprep.subr.bf16.mxu1 %v1051_v45 }
  0x2b   :  { %592 = vmatmul.mubr.bf16.gmra.mrb[4].mxu0 %v1062_v54 }
  0x2c   :  { %951 = vmatpush3.bf16.msra.mxu0 %v1049_v43  ;;  %641 = vmatmul.mubr.bf16.gmra.mrb[4].mxu1 %v1063_v55 }
  0x2d   :  { %952 = vmatprep.subr.bf16.mxu0 %v1050_v44  ;;  %989 = vmatpush3.bf16.msra.mxu1 %v1051_v45 }
  0x2e   :  { %990 = vmatprep.subr.bf16.mxu1 %v1054_v48  ;;  %681 = vmatprep.mubr.bf16.mxu0 %v1073_v63 }
  0x2f   :  { %1000 = vmatprep.mubr.bf16.mxu1 %v1075_v1 }
  0x30   :  { %953 = vmatpush3.bf16.msra.mxu0 %v1052_v46 }
  0x31   :  { %954 = vmatprep.subr.bf16.mxu0 %v1053_v47  ;;  %991 = vmatpush3.bf16.msra.mxu1 %v1054_v48 }
  0x32   :  { %992 = vmatprep.subr.bf16.mxu1 %v1061_v53 }
  0x34   :  { %955 = vmatpush3.bf16.msra.mxu0 %v1055_v49 }
  0x35   :  { %956 = vmatprep.subr.bf16.mxu0 %v1060_v52  ;;  %993 = vmatpush3.bf16.msra.mxu1 %v1061_v53 }
  0x36   :  { %994 = vmatprep.subr.bf16.mxu1 %v1066_v58 }
  0x38   :  { %957 = vmatpush3.bf16.msra.mxu0 %v1064_v56 }
  0x39   :  { %958 = vmatprep.subr.bf16.mxu0 %v1065_v57  ;;  %995 = vmatpush3.bf16.msra.mxu1 %v1066_v58 }
  0x3a   :  { %996 = vmatprep.subr.bf16.mxu1 %v1069_v61 }
  0x3c   :  { %959 = vmatpush3.bf16.msra.mxu0 %v1067_v59 }
  0x3d   :  { %960 = vmatprep.subr.bf16.mxu0 %v1068_v60  ;;  %997 = vmatpush3.bf16.msra.mxu1 %v1069_v61 }
  0x3e   :  { %998 = vmatprep.subr.bf16.mxu1 %v1074_v0 }
  0x40   :  { %961 = vmatpush3.bf16.msra.mxu0 %v1070_v62 }
  0x41   :  { %999 = vmatpush3.bf16.msra.mxu1 %v1074_v0 }
  0x43   :  { %682 = vmatmul.mubr.bf16.vlgmr.msra.gmra.mrb[8].mxu0 %v1071_v2 }
  0x44   :  { %689 = vmatprep.mubr.bf16.mxu0 %v1077_v3  ;;  %1001 = vmatmul.mubr.bf16.vlgmr.msra.gmra.mrb[8].mxu1 %v1076_v4 }
  0x4b   :  { %690 = vmatmul.mubr.bf16.gmra.mrb[12].mxu0 %v1079_v5 }
  0xf6   :  { %v906_v6 = vpop.f32.mrb[0].mxu0 }
  0xf7   :  { %v934_v7 = vpop.f32.mrb[0].mxu1  ;;  %v907_v8 = vpop.f32.mrb[1].mxu0 }
  0xf8   :  { %v908_v9 = vadd.f32 %v907_v8, %v906_v6  ;;  %v935_v10 = vpop.f32.mrb[1].mxu1  ;;  %v909_v11 = vpop.f32.mrb[2].mxu0 }
  0xf9   :  { %v936_v12 = vadd.f32 %v935_v10, %v934_v7  ;;  %v937_v13 = vpop.f32.mrb[2].mxu1  ;;  %v910_v14 = vpop.f32.mrb[3].mxu0 }
  0xfa   :  { %v911_v15 = vadd.f32 %v910_v14, %v909_v11  ;;  %v938_v16 = vpop.f32.mrb[3].mxu1 }
  0xfb   :  { %v635_v17 = vadd.f32 %v936_v12, %v908_v9  ;;  %v939_v18 = vadd.f32 %v938_v16, %v937_v13 }
  0xfd   :  { %v638_v19 = vadd.f32 %v939_v18, %v911_v15 }
  0xfe   :  { %v912_v20 = vpop.f32.mrb[4].mxu0 }
  0xff   :  { %v940_v21 = vpop.f32.mrb[4].mxu1  ;;  %v913_v22 = vpop.f32.mrb[5].mxu0 }
 0x100   :  { %v914_v23 = vadd.f32 %v913_v22, %v912_v20  ;;  %v941_v24 = vpop.f32.mrb[5].mxu1  ;;  %v915_v25 = vpop.f32.mrb[6].mxu0 }
 0x101   :  { %v942_v26 = vadd.f32 %v941_v24, %v940_v21  ;;  %v943_v27 = vpop.f32.mrb[6].mxu1  ;;  %v916_v28 = vpop.f32.mrb[7].mxu0 }
 0x102   :  { %v917_v29 = vadd.f32 %v916_v28, %v915_v25  ;;  %v944_v30 = vpop.f32.mrb[7].mxu1 }
 0x103   :  { %v643_v31 = vadd.f32 %v942_v26, %v914_v23  ;;  %v945_v32 = vadd.f32 %v944_v30, %v943_v27  ;;  %v800_v30 = vld [vmem:[%s1356_s2] sm:$0xff] }
 0x105   :  { %v646_v33 = vadd.f32 %v945_v32, %v917_v29 }
 0x116   :  { %v962_v34 = vpop.f32.mrb[8].mxu0 }
 0x117   :  { %v963_v35 = vpop.f32.mrb[9].mxu0  ;;  %v1002_v39 = vpop.f32.mrb[8].mxu1 }
 0x118   :  { %v964_v36 = vadd.f32 %v963_v35, %v962_v34  ;;  %v965_v37 = vpop.f32.mrb[10].mxu0  ;;  %v732_v42 = vpop.f32.mrb[9].mxu1  ;;  %v801_v35 = vld [vmem:[%s1356_s2 + $0x8] sm:$0xff] }
 0x119   :  { %v966_v38 = vpop.f32.mrb[11].mxu0  ;;  %v1003_v43 = vpop.f32.mrb[10].mxu1 }
 0x11a   :  { %v967_v40 = vadd.f32 %v966_v38, %v965_v37  ;;  %v684_v41 = vadd.f32 %v964_v36, %v635_v17  ;;  %v735_v46 = vpop.f32.mrb[11].mxu1 }
 0x11c   :  { %v733_v44 = vadd.f32 %v732_v42, %v684_v41  ;;  %v687_v45 = vadd.f32 %v967_v40, %v638_v19  ;;  %v802_v40 = vld [vmem:[%s1356_s2 + $0x10] sm:$0xff] }
 0x11e   :  { %v736_v47 = vadd.f32 %v735_v46, %v687_v45  ;;  %v968_v48 = vpop.f32.mrb[12].mxu0  ;;  %v748_v49 = vsel %vm747_vm0, %v733_v44, 0.0  ;;  %v803_v45 = vld [vmem:[%s1356_s2 + $0x18] sm:$0xff] }
 0x11f   :  { %v969_v50 = vpop.f32.mrb[13].mxu0  ;;  %749 = vadd.xlane.f32.xlu0 %v748_v49 }
 0x120   :  { %v970_v51 = vadd.f32 %v969_v50, %v968_v48  ;;  %v971_v52 = vpop.f32.mrb[14].mxu0  ;;  %v751_v56 = vsel %vm747_vm0, %v736_v47, 0.0 }
 0x121   :  { %v972_v53 = vpop.f32.mrb[15].mxu0 }
 0x122   :  { %v692_v54 = vadd.f32 %v970_v51, %v643_v31  ;;  %v973_v55 = vadd.f32 %v972_v53, %v971_v52 }
 0x123   :  { %752 = vadd.xlane.f32.xlu0 %v751_v56 }
 0x124   :  { %v695_v57 = vadd.f32 %v973_v55, %v646_v33  ;;  %v741_v58 = vadd.f32 %v1002_v39, %v692_v54 }
 0x126   :  { %v754_v59 = vsel %vm747_vm0, %v741_v58, 0.0  ;;  %v744_v60 = vadd.f32 %v1003_v43, %v695_v57 }
 0x127   :  { %755 = vadd.xlane.f32.xlu1 %v754_v59 }
 0x128   :  { %v757_v61 = vsel %vm747_vm0, %v744_v60, 0.0 }
 0x12b   :  { %758 = vadd.xlane.f32.xlu1 %v757_v61 }
 0x1ac   :  { %v750_v62 = vpop.xlane.xlu0 %749 }
 0x1ad   :  { %v760_v63 = vmul.f32 0.0625, %v750_v62 }
 0x1af   :  { %v764_v0 = vsub.f32 %v733_v44, %v760_v63 }
 0x1b0   :  { %v753_v1 = vpop.xlane.xlu0 %752 }
 0x1b1   :  { %v761_v2 = vmul.f32 0.0625, %v753_v1  ;;  %v768_v3 = vmul.f32 %v764_v0, %v764_v0 }
 0x1b3   :  { %v765_v4 = vsub.f32 %v736_v47, %v761_v2  ;;  %v772_v5 = vsel %vm747_vm0, %v768_v3, 0.0 }
 0x1b4   :  { %v756_v6 = vpop.xlane.xlu1 %755  ;;  %773 = vadd.xlane.f32.xlu0 %v772_v5 }
 0x1b5   :  { %v762_v7 = vmul.f32 0.0625, %v756_v6  ;;  %v769_v8 = vmul.f32 %v765_v4, %v765_v4 }
 0x1b7   :  { %v766_v9 = vsub.f32 %v741_v58, %v762_v7  ;;  %v775_v10 = vsel %vm747_vm0, %v769_v8, 0.0 }
 0x1b8   :  { %v759_v11 = vpop.xlane.xlu1 %758  ;;  %776 = vadd.xlane.f32.xlu1 %v775_v10 }
 0x1b9   :  { %v763_v12 = vmul.f32 0.0625, %v759_v11  ;;  %v770_v13 = vmul.f32 %v766_v9, %v766_v9 }
 0x1bb   :  { %v767_v14 = vsub.f32 %v744_v60, %v763_v12  ;;  %v778_v15 = vsel %vm747_vm0, %v770_v13, 0.0 }
 0x1bc   :  { %779 = vadd.xlane.f32.xlu0 %v778_v15 }
 0x1bd   :  { %v771_v16 = vmul.f32 %v767_v14, %v767_v14 }
 0x1bf   :  { %v781_v17 = vsel %vm747_vm0, %v771_v16, 0.0 }
 0x1c0   :  { %782 = vadd.xlane.f32.xlu1 %v781_v17 }
 0x241   :  { %v774_v18 = vpop.xlane.xlu0 %773 }
 0x242   :  { %v784_v19 = vmul.f32 0.0625, %v774_v18 }
 0x244   :  { %v788_v20 = vadd.f32 1e-05, %v784_v19 }
 0x245   :  { %v777_v21 = vpop.xlane.xlu1 %776 }
 0x246   :  { %1080 = vrsqrt.f32 %v788_v20  ;;  %v785_v22 = vmul.f32 0.0625, %v777_v21 }
 0x248   :  { %v789_v23 = vadd.f32 1e-05, %v785_v22 }
 0x249   :  { %v780_v24 = vpop.xlane.xlu0 %779 }
 0x24a   :  { %1082 = vrsqrt.f32 %v789_v23  ;;  %v786_v25 = vmul.f32 0.0625, %v780_v24 }
 0x24c   :  { %v790_v26 = vadd.f32 1e-05, %v786_v25 }
 0x24d   :  { %v783_v27 = vpop.xlane.xlu1 %782 }
 0x24e   :  { %1084 = vrsqrt.f32 %v790_v26  ;;  %v787_v28 = vmul.f32 0.0625, %v783_v27 }
 0x250   :  { %v1081_v29 = vpop.eup %1080  ;;  %v791_v31 = vadd.f32 1e-05, %v787_v28 }
 0x251   :  { %v796_v32 = vmul.f32 %v1081_v29, %v764_v0 }
 0x252   :  { %1086 = vrsqrt.f32 %v791_v31 }
 0x253   :  { %v804_v33 = vadd.f32 %v800_v30, %v796_v32 }
 0x254   :  { %v1083_v34 = vpop.eup %1082 }
 0x255   :  { %v808_v36 = vmax.f32 %v804_v33, 0.0  ;;  %v797_v37 = vmul.f32 %v1083_v34, %v765_v4 }
 0x257   :  { %812 = vst.msk [vmem:[%s1357_s3] sm:$0xff] %vm747_vm0, %v808_v36  ;;  %v805_v38 = vadd.f32 %v801_v35, %v797_v37 }
 0x258   :  { %v1085_v39 = vpop.eup %1084 }
 0x259   :  { %v809_v41 = vmax.f32 %v805_v38, 0.0  ;;  %v798_v42 = vmul.f32 %v1085_v39, %v766_v9 }
 0x25b   :  { %813 = vst.msk [vmem:[%s1357_s3 + $0x8] sm:$0xff] %vm747_vm0, %v809_v41  ;;  %v806_v43 = vadd.f32 %v802_v40, %v798_v42 }
 0x25c   :  { %v1087_v44 = vpop.eup %1086 }
 0x25d   :  { %v810_v46 = vmax.f32 %v806_v43, 0.0  ;;  %v799_v47 = vmul.f32 %v1087_v44, %v767_v14 }
 0x25f   :  { %814 = vst.msk [vmem:[%s1357_s3 + $0x10] sm:$0xff] %vm747_vm0, %v810_v46  ;;  %v807_v48 = vadd.f32 %v803_v45, %v799_v47 }
 0x261   :  { %v811_v49 = vmax.f32 %v807_v48, 0.0 }
 0x263   :  { %815 = vst.msk [vmem:[%s1357_s3 + $0x18] sm:$0xff] %vm747_vm0, %v811_v49 }

// kernel: resnet2_forward.19
= control target key start
LH: loop header
LB: loop body
LE: loop exit
PB: predicated region body
PF: predicated region fallthrough
CT: control target
= control target key end

     0   :  { %vm744_vm0 = vcmask 15360   ;;  %s1326_s1 = inlined_call_operand.vmem [shape: bf16[896,2], index: 1, kind: input, shape index: {}]   ;;  %s1327_s0 = inlined_call_operand.vmem [shape: bf16[32,896], index: 0, kind: input, shape index: {}]   ;;  %s1328_s2 = inlined_call_operand.vmem [shape: f32[32,2], index: 2, kind: output, shape index: {}]  }
   0x1   :  { %v993_v0 = vld [vmem:[%s1326_s1 + $0x40] sm:$0xff]   ;;  %v997_v4 = vld [vmem:[%s1326_s1 + $0x48] sm:$0xff]   ;;  %v1001_v8 = vld [vmem:[%s1326_s1 + $0x50] sm:$0xff]  }
   0x2   :  { %v994_v1 = vld [vmem:[%s1326_s1 + $0xc0] sm:$0xff]   ;;  %879 = vmatprep.subr.bf16.mxu0 %v993_v0  ;;  %v998_v5 = vld [vmem:[%s1326_s1 + $0xc8] sm:$0xff]   ;;  %v1002_v9 = vld [vmem:[%s1326_s1 + $0xd0] sm:$0xff]  }
   0x3   :  { %v995_v2 = vld [vmem:[%s1326_s1] sm:$0xff]   ;;  %907 = vmatprep.subr.bf16.mxu1 %v994_v1  ;;  %v999_v6 = vld [vmem:[%s1326_s1 + $0x8] sm:$0xff]   ;;  %v1003_v10 = vld [vmem:[%s1326_s1 + $0x10] sm:$0xff]  }
   0x4   :  { %v996_v3 = vld [vmem:[%s1326_s1 + $0x80] sm:$0xff]   ;;  %880 = vmatpush3.bf16.msra.mxu0 %v995_v2  ;;  %v1000_v7 = vld [vmem:[%s1326_s1 + $0x88] sm:$0xff]   ;;  %v1004_v11 = vld [vmem:[%s1326_s1 + $0x90] sm:$0xff]  }
   0x5   :  { %908 = vmatpush3.bf16.msra.mxu1 %v996_v3  ;;  %881 = vmatprep.subr.bf16.mxu0 %v997_v4  ;;  %v1005_v12 = vld [vmem:[%s1326_s1 + $0x58] sm:$0xff]   ;;  %v1009_v16 = vld [vmem:[%s1326_s1 + $0x60] sm:$0xff]   ;;  %v1013_v20 = vld [vmem:[%s1326_s1 + $0x68] sm:$0xff]  }
   0x6   :  { %909 = vmatprep.subr.bf16.mxu1 %v998_v5  ;;  %v1006_v13 = vld [vmem:[%s1326_s1 + $0xd8] sm:$0xff]   ;;  %v1010_v17 = vld [vmem:[%s1326_s1 + $0xe0] sm:$0xff]   ;;  %v1014_v21 = vld [vmem:[%s1326_s1 + $0xe8] sm:$0xff]  }
   0x7   :  { %v1007_v14 = vld [vmem:[%s1326_s1 + $0x18] sm:$0xff]   ;;  %v1011_v18 = vld [vmem:[%s1326_s1 + $0x20] sm:$0xff]   ;;  %v1015_v22 = vld [vmem:[%s1326_s1 + $0x28] sm:$0xff]  }
   0x8   :  { %882 = vmatpush3.bf16.msra.mxu0 %v999_v6  ;;  %v1008_v15 = vld [vmem:[%s1326_s1 + $0x98] sm:$0xff]   ;;  %v1012_v19 = vld [vmem:[%s1326_s1 + $0xa0] sm:$0xff]   ;;  %v1016_v23 = vld [vmem:[%s1326_s1 + $0xa8] sm:$0xff]  }
   0x9   :  { %910 = vmatpush3.bf16.msra.mxu1 %v1000_v7  ;;  %883 = vmatprep.subr.bf16.mxu0 %v1001_v8  ;;  %v1017_v24 = vld [vmem:[%s1326_s1 + $0x70] sm:$0xff]   ;;  %v1021_v28 = vld [vmem:[%s1326_s1 + $0x78] sm:$0xff]   ;;  %v1027_v33 = vld [vmem:[%s1327_s0 + $0x4] ss:$28 sps:$4 sm:$0xff]  }
   0xa   :  { %911 = vmatprep.subr.bf16.mxu1 %v1002_v9  ;;  %v1018_v25 = vld [vmem:[%s1326_s1 + $0xf0] sm:$0xff]   ;;  %v1022_v29 = vld [vmem:[%s1326_s1 + $0xf8] sm:$0xff]   ;;  %v1028_v34 = vld [vmem:[%s1327_s0 + $0x8] ss:$28 sps:$4 sm:$0xff]   ;;  %580 = vmatprep.mubr.bf16.mxu0 %v1027_v33 }
   0xb   :  { %v1019_v26 = vld [vmem:[%s1326_s1 + $0x30] sm:$0xff]   ;;  %v1023_v30 = vld [vmem:[%s1326_s1 + $0x38] sm:$0xff]   ;;  %v1030_v35 = vld [vmem:[%s1327_s0 + $0xc] ss:$28 sps:$4 sm:$0xff]  }
   0xc   :  { %884 = vmatpush3.bf16.msra.mxu0 %v1003_v10  ;;  %v1020_v27 = vld [vmem:[%s1326_s1 + $0xb0] sm:$0xff]   ;;  %v1024_v31 = vld [vmem:[%s1326_s1 + $0xb8] sm:$0xff]   ;;  %v1031_v36 = vld [vmem:[%s1326_s1 + $0x140] sm:$0xff]   ;;  %629 = vmatprep.mubr.bf16.mxu1 %v1030_v35 }
   0xd   :  { %912 = vmatpush3.bf16.msra.mxu1 %v1004_v11  ;;  %885 = vmatprep.subr.bf16.mxu0 %v1005_v12  ;;  %v1025_v32 = vld [vmem:[%s1327_s0] ss:$28 sps:$4 sm:$0xff]   ;;  %v1033_v38 = vld [vmem:[%s1326_s1 + $0x148] sm:$0xff]   ;;  %v1036_v41 = vld [vmem:[%s1326_s1 + $0x150] sm:$0xff]  }
   0xe   :  { %913 = vmatprep.subr.bf16.mxu1 %v1006_v13  ;;  %v1032_v37 = vld [vmem:[%s1326_s1 + $0x100] sm:$0xff]   ;;  %v1035_v40 = vld [vmem:[%s1326_s1 + $0x108] sm:$0xff]   ;;  %v1038_v43 = vld [vmem:[%s1326_s1 + $0x110] sm:$0xff]  }
   0xf   :  { %v1034_v39 = vld [vmem:[%s1326_s1 + $0x180] sm:$0xff]   ;;  %v1037_v42 = vld [vmem:[%s1326_s1 + $0x188] sm:$0xff]   ;;  %v1039_v44 = vld [vmem:[%s1326_s1 + $0x158] sm:$0xff]  }
  0x10   :  { %886 = vmatpush3.bf16.msra.mxu0 %v1007_v14  ;;  %v1040_v45 = vld [vmem:[%s1326_s1 + $0x190] sm:$0xff]   ;;  %v1041_v46 = vld [vmem:[%s1326_s1 + $0x118] sm:$0xff]   ;;  %v1042_v47 = vld [vmem:[%s1326_s1 + $0x160] sm:$0xff]  }
  0x11   :  { %914 = vmatpush3.bf16.msra.mxu1 %v1008_v15  ;;  %887 = vmatprep.subr.bf16.mxu0 %v1009_v16  ;;  %v1043_v48 = vld [vmem:[%s1326_s1 + $0x198] sm:$0xff]   ;;  %v1044_v49 = vld [vmem:[%s1326_s1 + $0x120] sm:$0xff]   ;;  %v1049_v52 = vld [vmem:[%s1326_s1 + $0x168] sm:$0xff]  }
  0x12   :  { %915 = vmatprep.subr.bf16.mxu1 %v1010_v17  ;;  %v1045_v50 = vld [vmem:[%s1327_s0 + $0x3c] ss:$28 sps:$4 sm:$0xff]   ;;  %v1047_v51 = vld [vmem:[%s1327_s0 + $0x44] ss:$28 sps:$4 sm:$0xff]   ;;  %v1053_v56 = vld [vmem:[%s1326_s1 + $0x128] sm:$0xff]  }
  0x13   :  { %v1050_v53 = vld [vmem:[%s1326_s1 + $0x1a0] sm:$0xff]   ;;  %v1051_v54 = vld [vmem:[%s1327_s0 + $0x38] ss:$28 sps:$4 sm:$0xff]   ;;  %v1055_v58 = vld [vmem:[%s1326_s1 + $0x1a8] sm:$0xff]  }
  0x14   :  { %888 = vmatpush3.bf16.msra.mxu0 %v1011_v18  ;;  %v1052_v55 = vld [vmem:[%s1327_s0 + $0x40] ss:$28 sps:$4 sm:$0xff]   ;;  %v1054_v57 = vld [vmem:[%s1326_s1 + $0x170] sm:$0xff]   ;;  %v1066_v3 = vld [vmem:[%s1327_s0 + $0x4c] ss:$28 sps:$4 sm:$0xff]  }
  0x15   :  { %916 = vmatpush3.bf16.msra.mxu1 %v1012_v19  ;;  %889 = vmatprep.subr.bf16.mxu0 %v1013_v20  ;;  %v1056_v59 = vld [vmem:[%s1326_s1 + $0x130] sm:$0xff]   ;;  %v1057_v60 = vld [vmem:[%s1326_s1 + $0x178] sm:$0xff]   ;;  %v1068_v5 = vld [vmem:[%s1327_s0 + $0x48] ss:$28 sps:$4 sm:$0xff]  }
  0x16   :  { %917 = vmatprep.subr.bf16.mxu1 %v1014_v21  ;;  %v1058_v61 = vld [vmem:[%s1326_s1 + $0x1b0] sm:$0xff]   ;;  %v1059_v62 = vld [vmem:[%s1326_s1 + $0x138] sm:$0xff]  }
  0x17   :  { %v1062_v63 = vld [vmem:[%s1327_s0 + $0x14] ss:$28 sps:$4 sm:$0xff]   ;;  %v1063_v0 = vld [vmem:[%s1326_s1 + $0x1b8] sm:$0xff]  }
  0x18   :  { %890 = vmatpush3.bf16.msra.mxu0 %v1015_v22  ;;  %v1064_v1 = vld [vmem:[%s1327_s0 + $0x18] ss:$28 sps:$4 sm:$0xff]   ;;  %v1060_v2 = vld [vmem:[%s1327_s0 + $0x10] ss:$28 sps:$4 sm:$0xff]  }
  0x19   :  { %918 = vmatpush3.bf16.msra.mxu1 %v1016_v23  ;;  %891 = vmatprep.subr.bf16.mxu0 %v1017_v24  ;;  %v1065_v4 = vld [vmem:[%s1327_s0 + $0x50] ss:$28 sps:$4 sm:$0xff]  }
  0x1a   :  { %919 = vmatprep.subr.bf16.mxu1 %v1018_v25 }
  0x1c   :  { %892 = vmatpush3.bf16.msra.mxu0 %v1019_v26 }
  0x1d   :  { %920 = vmatpush3.bf16.msra.mxu1 %v1020_v27  ;;  %893 = vmatprep.subr.bf16.mxu0 %v1021_v28 }
  0x1e   :  { %921 = vmatprep.subr.bf16.mxu1 %v1022_v29 }
  0x20   :  { %894 = vmatpush3.bf16.msra.mxu0 %v1023_v30 }
  0x21   :  { %922 = vmatpush3.bf16.msra.mxu1 %v1024_v31  ;;  %935 = vmatprep.subr.bf16.mxu0 %v1031_v36 }
  0x22   :  { %973 = vmatprep.subr.bf16.mxu1 %v1034_v39 }
  0x23   :  { %581 = vmatmul.mubr.bf16.vlgmr.msra.gmra.mrb[0].mxu0 %v1025_v32 }
  0x24   :  { %630 = vmatmul.mubr.bf16.vlgmr.msra.gmra.mrb[0].mxu1 %v1028_v34  ;;  %936 = vmatpush3.bf16.msra.mxu0 %v1032_v37 }
  0x25   :  { %937 = vmatprep.subr.bf16.mxu0 %v1033_v38  ;;  %974 = vmatpush3.bf16.msra.mxu1 %v1034_v39 }
  0x26   :  { %975 = vmatprep.subr.bf16.mxu1 %v1037_v42  ;;  %588 = vmatprep.mubr.bf16.mxu0 %v1045_v50 }
  0x27   :  { %637 = vmatprep.mubr.bf16.mxu1 %v1047_v51 }
  0x28   :  { %938 = vmatpush3.bf16.msra.mxu0 %v1035_v40 }
  0x29   :  { %939 = vmatprep.subr.bf16.mxu0 %v1036_v41  ;;  %976 = vmatpush3.bf16.msra.mxu1 %v1037_v42 }
  0x2a   :  { %977 = vmatprep.subr.bf16.mxu1 %v1040_v45 }
  0x2b   :  { %589 = vmatmul.mubr.bf16.gmra.mrb[4].mxu0 %v1051_v54 }
  0x2c   :  { %940 = vmatpush3.bf16.msra.mxu0 %v1038_v43  ;;  %638 = vmatmul.mubr.bf16.gmra.mrb[4].mxu1 %v1052_v55 }
  0x2d   :  { %941 = vmatprep.subr.bf16.mxu0 %v1039_v44  ;;  %978 = vmatpush3.bf16.msra.mxu1 %v1040_v45 }
  0x2e   :  { %979 = vmatprep.subr.bf16.mxu1 %v1043_v48  ;;  %678 = vmatprep.mubr.bf16.mxu0 %v1062_v63 }
  0x2f   :  { %989 = vmatprep.mubr.bf16.mxu1 %v1064_v1 }
  0x30   :  { %942 = vmatpush3.bf16.msra.mxu0 %v1041_v46 }
  0x31   :  { %943 = vmatprep.subr.bf16.mxu0 %v1042_v47  ;;  %980 = vmatpush3.bf16.msra.mxu1 %v1043_v48 }
  0x32   :  { %981 = vmatprep.subr.bf16.mxu1 %v1050_v53 }
  0x34   :  { %944 = vmatpush3.bf16.msra.mxu0 %v1044_v49 }
  0x35   :  { %945 = vmatprep.subr.bf16.mxu0 %v1049_v52  ;;  %982 = vmatpush3.bf16.msra.mxu1 %v1050_v53 }
  0x36   :  { %983 = vmatprep.subr.bf16.mxu1 %v1055_v58 }
  0x38   :  { %946 = vmatpush3.bf16.msra.mxu0 %v1053_v56 }
  0x39   :  { %947 = vmatprep.subr.bf16.mxu0 %v1054_v57  ;;  %984 = vmatpush3.bf16.msra.mxu1 %v1055_v58 }
  0x3a   :  { %985 = vmatprep.subr.bf16.mxu1 %v1058_v61 }
  0x3c   :  { %948 = vmatpush3.bf16.msra.mxu0 %v1056_v59 }
  0x3d   :  { %949 = vmatprep.subr.bf16.mxu0 %v1057_v60  ;;  %986 = vmatpush3.bf16.msra.mxu1 %v1058_v61 }
  0x3e   :  { %987 = vmatprep.subr.bf16.mxu1 %v1063_v0 }
  0x40   :  { %950 = vmatpush3.bf16.msra.mxu0 %v1059_v62 }
  0x41   :  { %988 = vmatpush3.bf16.msra.mxu1 %v1063_v0 }
  0x43   :  { %679 = vmatmul.mubr.bf16.vlgmr.msra.gmra.mrb[8].mxu0 %v1060_v2 }
  0x44   :  { %686 = vmatprep.mubr.bf16.mxu0 %v1066_v3  ;;  %990 = vmatmul.mubr.bf16.vlgmr.msra.gmra.mrb[8].mxu1 %v1065_v4 }
  0x4b   :  { %687 = vmatmul.mubr.bf16.gmra.mrb[12].mxu0 %v1068_v5 }
  0xf6   :  { %v895_v6 = vpop.f32.mrb[0].mxu0 }
  0xf7   :  { %v923_v7 = vpop.f32.mrb[0].mxu1  ;;  %v896_v8 = vpop.f32.mrb[1].mxu0 }
  0xf8   :  { %v897_v9 = vadd.f32 %v896_v8, %v895_v6  ;;  %v924_v10 = vpop.f32.mrb[1].mxu1  ;;  %v898_v11 = vpop.f32.mrb[2].mxu0 }
  0xf9   :  { %v925_v12 = vadd.f32 %v924_v10, %v923_v7  ;;  %v926_v13 = vpop.f32.mrb[2].mxu1  ;;  %v899_v14 = vpop.f32.mrb[3].mxu0 }
  0xfa   :  { %v900_v15 = vadd.f32 %v899_v14, %v898_v11  ;;  %v927_v16 = vpop.f32.mrb[3].mxu1 }
  0xfb   :  { %v632_v17 = vadd.f32 %v925_v12, %v897_v9  ;;  %v928_v18 = vadd.f32 %v927_v16, %v926_v13 }
  0xfd   :  { %v635_v19 = vadd.f32 %v928_v18, %v900_v15 }
  0xfe   :  { %v901_v20 = vpop.f32.mrb[4].mxu0 }
  0xff   :  { %v929_v21 = vpop.f32.mrb[4].mxu1  ;;  %v902_v22 = vpop.f32.mrb[5].mxu0 }
 0x100   :  { %v903_v23 = vadd.f32 %v902_v22, %v901_v20  ;;  %v930_v24 = vpop.f32.mrb[5].mxu1  ;;  %v904_v25 = vpop.f32.mrb[6].mxu0 }
 0x101   :  { %v931_v26 = vadd.f32 %v930_v24, %v929_v21  ;;  %v932_v27 = vpop.f32.mrb[6].mxu1  ;;  %v905_v28 = vpop.f32.mrb[7].mxu0 }
 0x102   :  { %v906_v29 = vadd.f32 %v905_v28, %v904_v25  ;;  %v933_v30 = vpop.f32.mrb[7].mxu1 }
 0x103   :  { %v640_v31 = vadd.f32 %v931_v26, %v903_v23  ;;  %v934_v32 = vadd.f32 %v933_v30, %v932_v27 }
 0x105   :  { %v643_v33 = vadd.f32 %v934_v32, %v906_v29 }
 0x116   :  { %v951_v34 = vpop.f32.mrb[8].mxu0 }
 0x117   :  { %v952_v35 = vpop.f32.mrb[9].mxu0  ;;  %v991_v39 = vpop.f32.mrb[8].mxu1 }
 0x118   :  { %v953_v36 = vadd.f32 %v952_v35, %v951_v34  ;;  %v954_v37 = vpop.f32.mrb[10].mxu0  ;;  %v729_v42 = vpop.f32.mrb[9].mxu1 }
 0x119   :  { %v955_v38 = vpop.f32.mrb[11].mxu0  ;;  %v992_v43 = vpop.f32.mrb[10].mxu1 }
 0x11a   :  { %v956_v40 = vadd.f32 %v955_v38, %v954_v37  ;;  %v681_v41 = vadd.f32 %v953_v36, %v632_v17  ;;  %v732_v46 = vpop.f32.mrb[11].mxu1 }
 0x11c   :  { %v730_v44 = vadd.f32 %v729_v42, %v681_v41  ;;  %v684_v45 = vadd.f32 %v956_v40, %v635_v19 }
 0x11e   :  { %v733_v47 = vadd.f32 %v732_v46, %v684_v45  ;;  %v957_v48 = vpop.f32.mrb[12].mxu0  ;;  %v745_v49 = vsel %vm744_vm0, %v730_v44, 0.0 }
 0x11f   :  { %v958_v50 = vpop.f32.mrb[13].mxu0  ;;  %746 = vadd.xlane.f32.xlu0 %v745_v49 }
 0x120   :  { %v959_v51 = vadd.f32 %v958_v50, %v957_v48  ;;  %v960_v52 = vpop.f32.mrb[14].mxu0  ;;  %v748_v56 = vsel %vm744_vm0, %v733_v47, 0.0 }
 0x121   :  { %v961_v53 = vpop.f32.mrb[15].mxu0 }
 0x122   :  { %v689_v54 = vadd.f32 %v959_v51, %v640_v31  ;;  %v962_v55 = vadd.f32 %v961_v53, %v960_v52 }
 0x123   :  { %749 = vadd.xlane.f32.xlu0 %v748_v56 }
 0x124   :  { %v692_v57 = vadd.f32 %v962_v55, %v643_v33  ;;  %v738_v58 = vadd.f32 %v991_v39, %v689_v54 }
 0x126   :  { %v751_v59 = vsel %vm744_vm0, %v738_v58, 0.0  ;;  %v741_v60 = vadd.f32 %v992_v43, %v692_v57 }
 0x127   :  { %752 = vadd.xlane.f32.xlu1 %v751_v59 }
 0x128   :  { %v754_v61 = vsel %vm744_vm0, %v741_v60, 0.0 }
 0x12b   :  { %755 = vadd.xlane.f32.xlu1 %v754_v61 }
 0x1ac   :  { %v747_v62 = vpop.xlane.xlu0 %746 }
 0x1ad   :  { %v757_v63 = vmul.f32 0.5, %v747_v62 }
 0x1af   :  { %v761_v0 = vsub.f32 %v730_v44, %v757_v63 }
 0x1b0   :  { %v750_v1 = vpop.xlane.xlu0 %749 }
 0x1b1   :  { %v758_v2 = vmul.f32 0.5, %v750_v1  ;;  %v765_v3 = vmul.f32 %v761_v0, %v761_v0 }
 0x1b3   :  { %v762_v4 = vsub.f32 %v733_v47, %v758_v2  ;;  %v769_v5 = vsel %vm744_vm0, %v765_v3, 0.0 }
 0x1b4   :  { %v753_v6 = vpop.xlane.xlu1 %752  ;;  %770 = vadd.xlane.f32.xlu0 %v769_v5 }
 0x1b5   :  { %v759_v7 = vmul.f32 0.5, %v753_v6  ;;  %v766_v8 = vmul.f32 %v762_v4, %v762_v4 }
 0x1b7   :  { %v763_v9 = vsub.f32 %v738_v58, %v759_v7  ;;  %v772_v10 = vsel %vm744_vm0, %v766_v8, 0.0 }
 0x1b8   :  { %v756_v11 = vpop.xlane.xlu1 %755  ;;  %773 = vadd.xlane.f32.xlu1 %v772_v10 }
 0x1b9   :  { %v760_v12 = vmul.f32 0.5, %v756_v11  ;;  %v767_v13 = vmul.f32 %v763_v9, %v763_v9 }
 0x1bb   :  { %v764_v14 = vsub.f32 %v741_v60, %v760_v12  ;;  %v775_v15 = vsel %vm744_vm0, %v767_v13, 0.0 }
 0x1bc   :  { %776 = vadd.xlane.f32.xlu0 %v775_v15 }
 0x1bd   :  { %v768_v16 = vmul.f32 %v764_v14, %v764_v14 }
 0x1bf   :  { %v778_v17 = vsel %vm744_vm0, %v768_v16, 0.0 }
 0x1c0   :  { %779 = vadd.xlane.f32.xlu1 %v778_v17 }
 0x241   :  { %v771_v18 = vpop.xlane.xlu0 %770 }
 0x242   :  { %v781_v19 = vmul.f32 0.5, %v771_v18 }
 0x244   :  { %v785_v20 = vadd.f32 1e-05, %v781_v19 }
 0x245   :  { %v774_v21 = vpop.xlane.xlu1 %773 }
 0x246   :  { %1069 = vrsqrt.f32 %v785_v20  ;;  %v782_v22 = vmul.f32 0.5, %v774_v21 }
 0x248   :  { %v786_v23 = vadd.f32 1e-05, %v782_v22 }
 0x249   :  { %v777_v24 = vpop.xlane.xlu0 %776 }
 0x24a   :  { %1071 = vrsqrt.f32 %v786_v23  ;;  %v783_v25 = vmul.f32 0.5, %v777_v24 }
 0x24c   :  { %v787_v26 = vadd.f32 1e-05, %v783_v25 }
 0x24d   :  { %v780_v27 = vpop.xlane.xlu1 %779 }
 0x24e   :  { %1073 = vrsqrt.f32 %v787_v26  ;;  %v784_v28 = vmul.f32 0.5, %v780_v27 }
 0x250   :  { %v1070_v29 = vpop.eup %1069  ;;  %v788_v30 = vadd.f32 1e-05, %v784_v28 }
 0x251   :  { %v793_v31 = vmul.f32 %v1070_v29, %v761_v0 }
 0x252   :  { %1075 = vrsqrt.f32 %v788_v30 }
 0x253   :  { %v797_v32 = vmax.f32 %v793_v31, 0.0 }
 0x254   :  { %v1072_v33 = vpop.eup %1071 }
 0x255   :  { %801 = vst.msk [vmem:[%s1328_s2] sm:$0xff] %vm744_vm0, %v797_v32  ;;  %v794_v34 = vmul.f32 %v1072_v33, %v762_v4 }
 0x257   :  { %v798_v35 = vmax.f32 %v794_v34, 0.0 }
 0x258   :  { %v1074_v36 = vpop.eup %1073 }
 0x259   :  { %802 = vst.msk [vmem:[%s1328_s2 + $0x8] sm:$0xff] %vm744_vm0, %v798_v35  ;;  %v795_v37 = vmul.f32 %v1074_v36, %v763_v9 }
 0x25b   :  { %v799_v38 = vmax.f32 %v795_v37, 0.0 }
 0x25c   :  { %v1076_v39 = vpop.eup %1075 }
 0x25d   :  { %803 = vst.msk [vmem:[%s1328_s2 + $0x10] sm:$0xff] %vm744_vm0, %v799_v38  ;;  %v796_v40 = vmul.f32 %v1076_v39, %v764_v14 }
 0x25f   :  { %v800_v41 = vmax.f32 %v796_v40, 0.0 }
 0x261   :  { %804 = vst.msk [vmem:[%s1328_s2 + $0x18] sm:$0xff] %vm744_vm0, %v800_v41 }

// kernel: resnet2_forward.20
= control target key start
LH: loop header
LB: loop body
LE: loop exit
PB: predicated region body
PF: predicated region fallthrough
CT: control target
= control target key end

     0   :  { %vm141_vm0 = vcmask 15360   ;;  %s329_s1 = inlined_call_operand.vmem [shape: bf16[128,2], index: 1, kind: input, shape index: {}]   ;;  %s330_s0 = inlined_call_operand.vmem [shape: bf16[32,128], index: 0, kind: input, shape index: {}]   ;;  %s331_s2 = inlined_call_operand.vmem [shape: f32[32,2], index: 2, kind: output, shape index: {}]  }
   0x1   :  { %v242_v0 = vld [vmem:[%s329_s1] sm:$0xff]   ;;  %v243_v1 = vld [vmem:[%s329_s1 + $0x8] sm:$0xff]   ;;  %v244_v2 = vld [vmem:[%s329_s1 + $0x10] sm:$0xff]  }
   0x2   :  { %222 = vmatprep.subr.bf16.mxu0 %v242_v0  ;;  %v245_v3 = vld [vmem:[%s329_s1 + $0x18] sm:$0xff]   ;;  %v250_v4 = vld [vmem:[%s330_s0] sm:$0xff]   ;;  %v247_v6 = vld [vmem:[%s329_s1 + $0x28] sm:$0xff]  }
   0x3   :  { %223 = vmatpush3.bf16.msra.mxu0 %v242_v0  ;;  %238 = vmatprep.mubr.bf16.mxu0 %v250_v4  ;;  %v246_v5 = vld [vmem:[%s329_s1 + $0x20] sm:$0xff]   ;;  %v248_v7 = vld [vmem:[%s329_s1 + $0x30] sm:$0xff]   ;;  %v249_v8 = vld [vmem:[%s329_s1 + $0x38] sm:$0xff]  }
   0x4   :  { %224 = vmatprep.subr.bf16.mxu0 %v243_v1  ;;  %v251_v9 = vld [vmem:[%s330_s0 + $0x8] sm:$0xff]  }
   0x7   :  { %225 = vmatpush3.bf16.msra.mxu0 %v243_v1 }
   0x8   :  { %226 = vmatprep.subr.bf16.mxu0 %v244_v2 }
   0xb   :  { %227 = vmatpush3.bf16.msra.mxu0 %v244_v2 }
   0xc   :  { %228 = vmatprep.subr.bf16.mxu0 %v245_v3 }
   0xf   :  { %229 = vmatpush3.bf16.msra.mxu0 %v245_v3 }
  0x10   :  { %230 = vmatprep.subr.bf16.mxu0 %v246_v5 }
  0x13   :  { %231 = vmatpush3.bf16.msra.mxu0 %v246_v5 }
  0x14   :  { %232 = vmatprep.subr.bf16.mxu0 %v247_v6 }
  0x17   :  { %233 = vmatpush3.bf16.msra.mxu0 %v247_v6 }
  0x18   :  { %234 = vmatprep.subr.bf16.mxu0 %v248_v7 }
  0x1b   :  { %235 = vmatpush3.bf16.msra.mxu0 %v248_v7 }
  0x1c   :  { %236 = vmatprep.subr.bf16.mxu0 %v249_v8 }
  0x1f   :  { %237 = vmatpush3.bf16.msra.mxu0 %v249_v8 }
  0x22   :  { %239 = vmatmul.mubr.bf16.vlgmr.msra.gmra.mrb[0].mxu0 %v251_v9 }
  0xf5   :  { %v240_v10 = vpop.f32.mrb[0].mxu0 }
  0xf6   :  { %v126_v11 = vpop.f32.mrb[1].mxu0  ;;  %v148_v12 = vsel %vm141_vm0, %v240_v10, 0.0 }
  0xf7   :  { %149 = vadd.xlane.f32.xlu1 %v148_v12  ;;  %v241_v13 = vpop.f32.mrb[2].mxu0  ;;  %v142_v14 = vsel %vm141_vm0, %v126_v11, 0.0 }
  0xf8   :  { %143 = vadd.xlane.f32.xlu0 %v142_v14  ;;  %v129_v15 = vpop.f32.mrb[3].mxu0  ;;  %v151_v16 = vsel %vm141_vm0, %v241_v13, 0.0 }
  0xf9   :  { %v145_v17 = vsel %vm141_vm0, %v129_v15, 0.0 }
  0xfb   :  { %152 = vadd.xlane.f32.xlu1 %v151_v16 }
  0xfc   :  { %146 = vadd.xlane.f32.xlu0 %v145_v17 }
 0x184   :  { %v150_v18 = vpop.xlane.xlu1 %149 }
 0x185   :  { %v156_v19 = vmul.f32 0.5, %v150_v18  ;;  %v144_v20 = vpop.xlane.xlu0 %143 }
 0x186   :  { %v154_v21 = vmul.f32 0.5, %v144_v20 }
 0x187   :  { %v160_v22 = vsub.f32 %v240_v10, %v156_v19 }
 0x188   :  { %v158_v23 = vsub.f32 %v126_v11, %v154_v21  ;;  %v153_v24 = vpop.xlane.xlu1 %152 }
 0x189   :  { %v157_v25 = vmul.f32 0.5, %v153_v24  ;;  %v147_v26 = vpop.xlane.xlu0 %146  ;;  %v164_v32 = vmul.f32 %v160_v22, %v160_v22 }
 0x18a   :  { %v155_v27 = vmul.f32 0.5, %v147_v26  ;;  %v162_v28 = vmul.f32 %v158_v23, %v158_v23 }
 0x18b   :  { %v161_v29 = vsub.f32 %v241_v13, %v157_v25  ;;  %v172_v34 = vsel %vm141_vm0, %v164_v32, 0.0 }
 0x18c   :  { %v159_v30 = vsub.f32 %v129_v15, %v155_v27  ;;  %v166_v31 = vsel %vm141_vm0, %v162_v28, 0.0 }
 0x18d   :  { %167 = vadd.xlane.f32.xlu0 %v166_v31  ;;  %v165_v36 = vmul.f32 %v161_v29, %v161_v29 }
 0x18e   :  { %v163_v33 = vmul.f32 %v159_v30, %v159_v30 }
 0x18f   :  { %v175_v37 = vsel %vm141_vm0, %v165_v36, 0.0 }
 0x190   :  { %v169_v35 = vsel %vm141_vm0, %v163_v33, 0.0 }
 0x191   :  { %173 = vadd.xlane.f32.xlu0 %v172_v34  ;;  %170 = vadd.xlane.f32.xlu1 %v169_v35 }
 0x195   :  { %176 = vadd.xlane.f32.xlu1 %v175_v37 }
 0x21a   :  { %v168_v38 = vpop.xlane.xlu0 %167 }
 0x21b   :  { %v178_v39 = vmul.f32 0.5, %v168_v38 }
 0x21d   :  { %v182_v40 = vadd.f32 1e-05, %v178_v39 }
 0x21e   :  { %v171_v41 = vpop.xlane.xlu1 %170  ;;  %v174_v42 = vpop.xlane.xlu0 %173 }
 0x21f   :  { %252 = vrsqrt.f32 %v182_v40  ;;  %v179_v43 = vmul.f32 0.5, %v171_v41  ;;  %v180_v44 = vmul.f32 0.5, %v174_v42 }
 0x221   :  { %v183_v45 = vadd.f32 1e-05, %v179_v43  ;;  %v184_v46 = vadd.f32 1e-05, %v180_v44 }
 0x222   :  { %v177_v47 = vpop.xlane.xlu1 %176 }
 0x223   :  { %254 = vrsqrt.f32 %v183_v45  ;;  %v181_v48 = vmul.f32 0.5, %v177_v47 }
 0x224   :  { %256 = vrsqrt.f32 %v184_v46 }
 0x225   :  { %v185_v49 = vadd.f32 1e-05, %v181_v48 }
 0x227   :  { %258 = vrsqrt.f32 %v185_v49 }
 0x229   :  { %v253_v50 = vpop.eup %252 }
 0x22a   :  { %v190_v51 = vmul.f32 %v253_v50, %v158_v23 }
 0x22c   :  { %194 = vst.msk [vmem:[%s331_s2] sm:$0xff] %vm141_vm0, %v190_v51 }
 0x22d   :  { %v255_v52 = vpop.eup %254 }
 0x22e   :  { %v257_v53 = vpop.eup %256  ;;  %v191_v54 = vmul.f32 %v255_v52, %v159_v30 }
 0x22f   :  { %v192_v55 = vmul.f32 %v257_v53, %v160_v22 }
 0x230   :  { %195 = vst.msk [vmem:[%s331_s2 + $0x8] sm:$0xff] %vm141_vm0, %v191_v54 }
 0x231   :  { %v259_v56 = vpop.eup %258  ;;  %196 = vst.msk [vmem:[%s331_s2 + $0x10] sm:$0xff] %vm141_vm0, %v192_v55 }
 0x232   :  { %v193_v57 = vmul.f32 %v259_v56, %v161_v29 }
 0x234   :  { %197 = vst.msk [vmem:[%s331_s2 + $0x18] sm:$0xff] %vm141_vm0, %v193_v57 }

// kernel: resnet2_forward.21
= control target key start
LH: loop header
LB: loop body
LE: loop exit
PB: predicated region body
PF: predicated region fallthrough
CT: control target
= control target key end

     0   :  { %vm747_vm0 = vcmask 15360   ;;  %s1354_s1 = inlined_call_operand.vmem [shape: bf16[896,2], index: 1, kind: input, shape index: {}]   ;;  %s1355_s0 = inlined_call_operand.vmem [shape: bf16[32,896], index: 0, kind: input, shape index: {}]   ;;  %s1356_s2 = inlined_call_operand.vmem [shape: f32[32,2], index: 2, kind: input, shape index: {}]   ;;  %s1357_s3 = inlined_call_operand.vmem [shape: f32[32,2], index: 3, kind: output, shape index: {}]  }
   0x1   :  { %v1004_v0 = vld [vmem:[%s1354_s1 + $0x40] sm:$0xff]   ;;  %v1008_v4 = vld [vmem:[%s1354_s1 + $0x48] sm:$0xff]   ;;  %v1012_v8 = vld [vmem:[%s1354_s1 + $0x50] sm:$0xff]  }
   0x2   :  { %v1005_v1 = vld [vmem:[%s1354_s1 + $0xc0] sm:$0xff]   ;;  %890 = vmatprep.subr.bf16.mxu0 %v1004_v0  ;;  %v1009_v5 = vld [vmem:[%s1354_s1 + $0xc8] sm:$0xff]   ;;  %v1013_v9 = vld [vmem:[%s1354_s1 + $0xd0] sm:$0xff]  }
   0x3   :  { %v1006_v2 = vld [vmem:[%s1354_s1] sm:$0xff]   ;;  %918 = vmatprep.subr.bf16.mxu1 %v1005_v1  ;;  %v1010_v6 = vld [vmem:[%s1354_s1 + $0x8] sm:$0xff]   ;;  %v1014_v10 = vld [vmem:[%s1354_s1 + $0x10] sm:$0xff]  }
   0x4   :  { %v1007_v3 = vld [vmem:[%s1354_s1 + $0x80] sm:$0xff]   ;;  %891 = vmatpush3.bf16.msra.mxu0 %v1006_v2  ;;  %v1011_v7 = vld [vmem:[%s1354_s1 + $0x88] sm:$0xff]   ;;  %v1015_v11 = vld [vmem:[%s1354_s1 + $0x90] sm:$0xff]  }
   0x5   :  { %919 = vmatpush3.bf16.msra.mxu1 %v1007_v3  ;;  %892 = vmatprep.subr.bf16.mxu0 %v1008_v4  ;;  %v1016_v12 = vld [vmem:[%s1354_s1 + $0x58] sm:$0xff]   ;;  %v1020_v16 = vld [vmem:[%s1354_s1 + $0x60] sm:$0xff]   ;;  %v1024_v20 = vld [vmem:[%s1354_s1 + $0x68] sm:$0xff]  }
   0x6   :  { %920 = vmatprep.subr.bf16.mxu1 %v1009_v5  ;;  %v1017_v13 = vld [vmem:[%s1354_s1 + $0xd8] sm:$0xff]   ;;  %v1021_v17 = vld [vmem:[%s1354_s1 + $0xe0] sm:$0xff]   ;;  %v1025_v21 = vld [vmem:[%s1354_s1 + $0xe8] sm:$0xff]  }
   0x7   :  { %v1018_v14 = vld [vmem:[%s1354_s1 + $0x18] sm:$0xff]   ;;  %v1022_v18 = vld [vmem:[%s1354_s1 + $0x20] sm:$0xff]   ;;  %v1026_v22 = vld [vmem:[%s1354_s1 + $0x28] sm:$0xff]  }
   0x8   :  { %893 = vmatpush3.bf16.msra.mxu0 %v1010_v6  ;;  %v1019_v15 = vld [vmem:[%s1354_s1 + $0x98] sm:$0xff]   ;;  %v1023_v19 = vld [vmem:[%s1354_s1 + $0xa0] sm:$0xff]   ;;  %v1027_v23 = vld [vmem:[%s1354_s1 + $0xa8] sm:$0xff]  }
   0x9   :  { %921 = vmatpush3.bf16.msra.mxu1 %v1011_v7  ;;  %894 = vmatprep.subr.bf16.mxu0 %v1012_v8  ;;  %v1028_v24 = vld [vmem:[%s1354_s1 + $0x70] sm:$0xff]   ;;  %v1032_v28 = vld [vmem:[%s1354_s1 + $0x78] sm:$0xff]   ;;  %v1038_v33 = vld [vmem:[%s1355_s0 + $0x4] ss:$28 sps:$4 sm:$0xff]  }
   0xa   :  { %922 = vmatprep.subr.bf16.mxu1 %v1013_v9  ;;  %v1029_v25 = vld [vmem:[%s1354_s1 + $0xf0] sm:$0xff]   ;;  %v1033_v29 = vld [vmem:[%s1354_s1 + $0xf8] sm:$0xff]   ;;  %v1039_v34 = vld [vmem:[%s1355_s0 + $0x8] ss:$28 sps:$4 sm:$0xff]   ;;  %583 = vmatprep.mubr.bf16.mxu0 %v1038_v33 }
   0xb   :  { %v1030_v26 = vld [vmem:[%s1354_s1 + $0x30] sm:$0xff]   ;;  %v1034_v30 = vld [vmem:[%s1354_s1 + $0x38] sm:$0xff]   ;;  %v1041_v35 = vld [vmem:[%s1355_s0 + $0xc] ss:$28 sps:$4 sm:$0xff]  }
   0xc   :  { %895 = vmatpush3.bf16.msra.mxu0 %v1014_v10  ;;  %v1031_v27 = vld [vmem:[%s1354_s1 + $0xb0] sm:$0xff]   ;;  %v1035_v31 = vld [vmem:[%s1354_s1 + $0xb8] sm:$0xff]   ;;  %v1042_v36 = vld [vmem:[%s1354_s1 + $0x140] sm:$0xff]   ;;  %632 = vmatprep.mubr.bf16.mxu1 %v1041_v35 }
   0xd   :  { %923 = vmatpush3.bf16.msra.mxu1 %v1015_v11  ;;  %896 = vmatprep.subr.bf16.mxu0 %v1016_v12  ;;  %v1036_v32 = vld [vmem:[%s1355_s0] ss:$28 sps:$4 sm:$0xff]   ;;  %v1044_v38 = vld [vmem:[%s1354_s1 + $0x148] sm:$0xff]   ;;  %v1047_v41 = vld [vmem:[%s1354_s1 + $0x150] sm:$0xff]  }
   0xe   :  { %924 = vmatprep.subr.bf16.mxu1 %v1017_v13  ;;  %v1043_v37 = vld [vmem:[%s1354_s1 + $0x100] sm:$0xff]   ;;  %v1046_v40 = vld [vmem:[%s1354_s1 + $0x108] sm:$0xff]   ;;  %v1049_v43 = vld [vmem:[%s1354_s1 + $0x110] sm:$0xff]  }
   0xf   :  { %v1045_v39 = vld [vmem:[%s1354_s1 + $0x180] sm:$0xff]   ;;  %v1048_v42 = vld [vmem:[%s1354_s1 + $0x188] sm:$0xff]   ;;  %v1050_v44 = vld [vmem:[%s1354_s1 + $0x158] sm:$0xff]  }
  0x10   :  { %897 = vmatpush3.bf16.msra.mxu0 %v1018_v14  ;;  %v1051_v45 = vld [vmem:[%s1354_s1 + $0x190] sm:$0xff]   ;;  %v1052_v46 = vld [vmem:[%s1354_s1 + $0x118] sm:$0xff]   ;;  %v1053_v47 = vld [vmem:[%s1354_s1 + $0x160] sm:$0xff]  }
  0x11   :  { %925 = vmatpush3.bf16.msra.mxu1 %v1019_v15  ;;  %898 = vmatprep.subr.bf16.mxu0 %v1020_v16  ;;  %v1054_v48 = vld [vmem:[%s1354_s1 + $0x198] sm:$0xff]   ;;  %v1055_v49 = vld [vmem:[%s1354_s1 + $0x120] sm:$0xff]   ;;  %v1060_v52 = vld [vmem:[%s1354_s1 + $0x168] sm:$0xff]  }
  0x12   :  { %926 = vmatprep.subr.bf16.mxu1 %v1021_v17  ;;  %v1056_v50 = vld [vmem:[%s1355_s0 + $0x3c] ss:$28 sps:$4 sm:$0xff]   ;;  %v1058_v51 = vld [vmem:[%s1355_s0 + $0x44] ss:$28 sps:$4 sm:$0xff]   ;;  %v1064_v56 = vld [vmem:[%s1354_s1 + $0x128] sm:$0xff]  }
  0x13   :  { %v1061_v53 = vld [vmem:[%s1354_s1 + $0x1a0] sm:$0xff]   ;;  %v1062_v54 = vld [vmem:[%s1355_s0 + $0x38] ss:$28 sps:$4 sm:$0xff]   ;;  %v1066_v58 = vld [vmem:[%s1354_s1 + $0x1a8] sm:$0xff]  }
  0x14   :  { %899 = vmatpush3.bf16.msra.mxu0 %v1022_v18  ;;  %v1063_v55 = vld [vmem:[%s1355_s0 + $0x40] ss:$28 sps:$4 sm:$0xff]   ;;  %v1065_v57 = vld [vmem:[%s1354_s1 + $0x170] sm:$0xff]   ;;  %v1077_v3 = vld [vmem:[%s1355_s0 + $0x4c] ss:$28 sps:$4 sm:$0xff]  }
  0x15   :  { %927 = vmatpush3.bf16.msra.mxu1 %v1023_v19  ;;  %900 = vmatprep.subr.bf16.mxu0 %v1024_v20  ;;  %v1067_v59 = vld [vmem:[%s1354_s1 + $0x130] sm:$0xff]   ;;  %v1068_v60 = vld [vmem:[%s1354_s1 + $0x178] sm:$0xff]   ;;  %v1079_v5 = vld [vmem:[%s1355_s0 + $0x48] ss:$28 sps:$4 sm:$0xff]  }
  0x16   :  { %928 = vmatprep.subr.bf16.mxu1 %v1025_v21  ;;  %v1069_v61 = vld [vmem:[%s1354_s1 + $0x1b0] sm:$0xff]   ;;  %v1070_v62 = vld [vmem:[%s1354_s1 + $0x138] sm:$0xff]  }
  0x17   :  { %v1073_v63 = vld [vmem:[%s1355_s0 + $0x14] ss:$28 sps:$4 sm:$0xff]   ;;  %v1074_v0 = vld [vmem:[%s1354_s1 + $0x1b8] sm:$0xff]  }
  0x18   :  { %901 = vmatpush3.bf16.msra.mxu0 %v1026_v22  ;;  %v1075_v1 = vld [vmem:[%s1355_s0 + $0x18] ss:$28 sps:$4 sm:$0xff]   ;;  %v1071_v2 = vld [vmem:[%s1355_s0 + $0x10] ss:$28 sps:$4 sm:$0xff]  }
  0x19   :  { %929 = vmatpush3.bf16.msra.mxu1 %v1027_v23  ;;  %902 = vmatprep.subr.bf16.mxu0 %v1028_v24  ;;  %v1076_v4 = vld [vmem:[%s1355_s0 + $0x50] ss:$28 sps:$4 sm:$0xff]  }
  0x1a   :  { %930 = vmatprep.subr.bf16.mxu1 %v1029_v25 }
  0x1c   :  { %903 = vmatpush3.bf16.msra.mxu0 %v1030_v26 }
  0x1d   :  { %931 = vmatpush3.bf16.msra.mxu1 %v1031_v27  ;;  %904 = vmatprep.subr.bf16.mxu0 %v1032_v28 }
  0x1e   :  { %932 = vmatprep.subr.bf16.mxu1 %v1033_v29 }
  0x20   :  { %905 = vmatpush3.bf16.msra.mxu0 %v1034_v30 }
  0x21   :  { %933 = vmatpush3.bf16.msra.mxu1 %v1035_v31  ;;  %946 = vmatprep.subr.bf16.mxu0 %v1042_v36 }
  0x22   :  { %984 = vmatprep.subr.bf16.mxu1 %v1045_v39 }
  0x23   :  { %584 = vmatmul.mubr.bf16.vlgmr.msra.gmra.mrb[0].mxu0 %v1036_v32 }
  0x24   :  { %633 = vmatmul.mubr.bf16.vlgmr.msra.gmra.mrb[0].mxu1 %v1039_v34  ;;  %947 = vmatpush3.bf16.msra.mxu0 %v1043_v37 }
  0x25   :  { %948 = vmatprep.subr.bf16.mxu0 %v1044_v38  ;;  %985 = vmatpush3.bf16.msra.mxu1 %v1045_v39 }
  0x26   :  { %986 = vmatprep.subr.bf16.mxu1 %v1048_v42  ;;  %591 = vmatprep.mubr.bf16.mxu0 %v1056_v50 }
  0x27   :  { %640 = vmatprep.mubr.bf16.mxu1 %v1058_v51 }
  0x28   :  { %949 = vmatpush3.bf16.msra.mxu0 %v1046_v40 }
  0x29   :  { %950 = vmatprep.subr.bf16.mxu0 %v1047_v41  ;;  %987 = vmatpush3.bf16.msra.mxu1 %v1048_v42 }
  0x2a   :  { %988 = vmatprep.subr.bf16.mxu1 %v1051_v45 }
  0x2b   :  { %592 = vmatmul.mubr.bf16.gmra.mrb[4].mxu0 %v1062_v54 }
  0x2c   :  { %951 = vmatpush3.bf16.msra.mxu0 %v1049_v43  ;;  %641 = vmatmul.mubr.bf16.gmra.mrb[4].mxu1 %v1063_v55 }
  0x2d   :  { %952 = vmatprep.subr.bf16.mxu0 %v1050_v44  ;;  %989 = vmatpush3.bf16.msra.mxu1 %v1051_v45 }
  0x2e   :  { %990 = vmatprep.subr.bf16.mxu1 %v1054_v48  ;;  %681 = vmatprep.mubr.bf16.mxu0 %v1073_v63 }
  0x2f   :  { %1000 = vmatprep.mubr.bf16.mxu1 %v1075_v1 }
  0x30   :  { %953 = vmatpush3.bf16.msra.mxu0 %v1052_v46 }
  0x31   :  { %954 = vmatprep.subr.bf16.mxu0 %v1053_v47  ;;  %991 = vmatpush3.bf16.msra.mxu1 %v1054_v48 }
  0x32   :  { %992 = vmatprep.subr.bf16.mxu1 %v1061_v53 }
  0x34   :  { %955 = vmatpush3.bf16.msra.mxu0 %v1055_v49 }
  0x35   :  { %956 = vmatprep.subr.bf16.mxu0 %v1060_v52  ;;  %993 = vmatpush3.bf16.msra.mxu1 %v1061_v53 }
  0x36   :  { %994 = vmatprep.subr.bf16.mxu1 %v1066_v58 }
  0x38   :  { %957 = vmatpush3.bf16.msra.mxu0 %v1064_v56 }
  0x39   :  { %958 = vmatprep.subr.bf16.mxu0 %v1065_v57  ;;  %995 = vmatpush3.bf16.msra.mxu1 %v1066_v58 }
  0x3a   :  { %996 = vmatprep.subr.bf16.mxu1 %v1069_v61 }
  0x3c   :  { %959 = vmatpush3.bf16.msra.mxu0 %v1067_v59 }
  0x3d   :  { %960 = vmatprep.subr.bf16.mxu0 %v1068_v60  ;;  %997 = vmatpush3.bf16.msra.mxu1 %v1069_v61 }
  0x3e   :  { %998 = vmatprep.subr.bf16.mxu1 %v1074_v0 }
  0x40   :  { %961 = vmatpush3.bf16.msra.mxu0 %v1070_v62 }
  0x41   :  { %999 = vmatpush3.bf16.msra.mxu1 %v1074_v0 }
  0x43   :  { %682 = vmatmul.mubr.bf16.vlgmr.msra.gmra.mrb[8].mxu0 %v1071_v2 }
  0x44   :  { %689 = vmatprep.mubr.bf16.mxu0 %v1077_v3  ;;  %1001 = vmatmul.mubr.bf16.vlgmr.msra.gmra.mrb[8].mxu1 %v1076_v4 }
  0x4b   :  { %690 = vmatmul.mubr.bf16.gmra.mrb[12].mxu0 %v1079_v5 }
  0xf6   :  { %v906_v6 = vpop.f32.mrb[0].mxu0 }
  0xf7   :  { %v934_v7 = vpop.f32.mrb[0].mxu1  ;;  %v907_v8 = vpop.f32.mrb[1].mxu0 }
  0xf8   :  { %v908_v9 = vadd.f32 %v907_v8, %v906_v6  ;;  %v935_v10 = vpop.f32.mrb[1].mxu1  ;;  %v909_v11 = vpop.f32.mrb[2].mxu0 }
  0xf9   :  { %v936_v12 = vadd.f32 %v935_v10, %v934_v7  ;;  %v937_v13 = vpop.f32.mrb[2].mxu1  ;;  %v910_v14 = vpop.f32.mrb[3].mxu0 }
  0xfa   :  { %v911_v15 = vadd.f32 %v910_v14, %v909_v11  ;;  %v938_v16 = vpop.f32.mrb[3].mxu1 }
  0xfb   :  { %v635_v17 = vadd.f32 %v936_v12, %v908_v9  ;;  %v939_v18 = vadd.f32 %v938_v16, %v937_v13 }
  0xfd   :  { %v638_v19 = vadd.f32 %v939_v18, %v911_v15 }
  0xfe   :  { %v912_v20 = vpop.f32.mrb[4].mxu0 }
  0xff   :  { %v940_v21 = vpop.f32.mrb[4].mxu1  ;;  %v913_v22 = vpop.f32.mrb[5].mxu0 }
 0x100   :  { %v914_v23 = vadd.f32 %v913_v22, %v912_v20  ;;  %v941_v24 = vpop.f32.mrb[5].mxu1  ;;  %v915_v25 = vpop.f32.mrb[6].mxu0 }
 0x101   :  { %v942_v26 = vadd.f32 %v941_v24, %v940_v21  ;;  %v943_v27 = vpop.f32.mrb[6].mxu1  ;;  %v916_v28 = vpop.f32.mrb[7].mxu0 }
 0x102   :  { %v917_v29 = vadd.f32 %v916_v28, %v915_v25  ;;  %v944_v30 = vpop.f32.mrb[7].mxu1 }
 0x103   :  { %v643_v31 = vadd.f32 %v942_v26, %v914_v23  ;;  %v945_v32 = vadd.f32 %v944_v30, %v943_v27  ;;  %v800_v30 = vld [vmem:[%s1356_s2] sm:$0xff] }
 0x105   :  { %v646_v33 = vadd.f32 %v945_v32, %v917_v29 }
 0x116   :  { %v962_v34 = vpop.f32.mrb[8].mxu0 }
 0x117   :  { %v963_v35 = vpop.f32.mrb[9].mxu0  ;;  %v1002_v39 = vpop.f32.mrb[8].mxu1 }
 0x118   :  { %v964_v36 = vadd.f32 %v963_v35, %v962_v34  ;;  %v965_v37 = vpop.f32.mrb[10].mxu0  ;;  %v732_v42 = vpop.f32.mrb[9].mxu1  ;;  %v801_v35 = vld [vmem:[%s1356_s2 + $0x8] sm:$0xff] }
 0x119   :  { %v966_v38 = vpop.f32.mrb[11].mxu0  ;;  %v1003_v43 = vpop.f32.mrb[10].mxu1 }
 0x11a   :  { %v967_v40 = vadd.f32 %v966_v38, %v965_v37  ;;  %v684_v41 = vadd.f32 %v964_v36, %v635_v17  ;;  %v735_v46 = vpop.f32.mrb[11].mxu1 }
 0x11c   :  { %v733_v44 = vadd.f32 %v732_v42, %v684_v41  ;;  %v687_v45 = vadd.f32 %v967_v40, %v638_v19  ;;  %v802_v40 = vld [vmem:[%s1356_s2 + $0x10] sm:$0xff] }
 0x11e   :  { %v736_v47 = vadd.f32 %v735_v46, %v687_v45  ;;  %v968_v48 = vpop.f32.mrb[12].mxu0  ;;  %v748_v49 = vsel %vm747_vm0, %v733_v44, 0.0  ;;  %v803_v45 = vld [vmem:[%s1356_s2 + $0x18] sm:$0xff] }
 0x11f   :  { %v969_v50 = vpop.f32.mrb[13].mxu0  ;;  %749 = vadd.xlane.f32.xlu0 %v748_v49 }
 0x120   :  { %v970_v51 = vadd.f32 %v969_v50, %v968_v48  ;;  %v971_v52 = vpop.f32.mrb[14].mxu0  ;;  %v751_v56 = vsel %vm747_vm0, %v736_v47, 0.0 }
 0x121   :  { %v972_v53 = vpop.f32.mrb[15].mxu0 }
 0x122   :  { %v692_v54 = vadd.f32 %v970_v51, %v643_v31  ;;  %v973_v55 = vadd.f32 %v972_v53, %v971_v52 }
 0x123   :  { %752 = vadd.xlane.f32.xlu0 %v751_v56 }
 0x124   :  { %v695_v57 = vadd.f32 %v973_v55, %v646_v33  ;;  %v741_v58 = vadd.f32 %v1002_v39, %v692_v54 }
 0x126   :  { %v754_v59 = vsel %vm747_vm0, %v741_v58, 0.0  ;;  %v744_v60 = vadd.f32 %v1003_v43, %v695_v57 }
 0x127   :  { %755 = vadd.xlane.f32.xlu1 %v754_v59 }
 0x128   :  { %v757_v61 = vsel %vm747_vm0, %v744_v60, 0.0 }
 0x12b   :  { %758 = vadd.xlane.f32.xlu1 %v757_v61 }
 0x1ac   :  { %v750_v62 = vpop.xlane.xlu0 %749 }
 0x1ad   :  { %v760_v63 = vmul.f32 0.5, %v750_v62 }
 0x1af   :  { %v764_v0 = vsub.f32 %v733_v44, %v760_v63 }
 0x1b0   :  { %v753_v1 = vpop.xlane.xlu0 %752 }
 0x1b1   :  { %v761_v2 = vmul.f32 0.5, %v753_v1  ;;  %v768_v3 = vmul.f32 %v764_v0, %v764_v0 }
 0x1b3   :  { %v765_v4 = vsub.f32 %v736_v47, %v761_v2  ;;  %v772_v5 = vsel %vm747_vm0, %v768_v3, 0.0 }
 0x1b4   :  { %v756_v6 = vpop.xlane.xlu1 %755  ;;  %773 = vadd.xlane.f32.xlu0 %v772_v5 }
 0x1b5   :  { %v762_v7 = vmul.f32 0.5, %v756_v6  ;;  %v769_v8 = vmul.f32 %v765_v4, %v765_v4 }
 0x1b7   :  { %v766_v9 = vsub.f32 %v741_v58, %v762_v7  ;;  %v775_v10 = vsel %vm747_vm0, %v769_v8, 0.0 }
 0x1b8   :  { %v759_v11 = vpop.xlane.xlu1 %758  ;;  %776 = vadd.xlane.f32.xlu1 %v775_v10 }
 0x1b9   :  { %v763_v12 = vmul.f32 0.5, %v759_v11  ;;  %v770_v13 = vmul.f32 %v766_v9, %v766_v9 }
 0x1bb   :  { %v767_v14 = vsub.f32 %v744_v60, %v763_v12  ;;  %v778_v15 = vsel %vm747_vm0, %v770_v13, 0.0 }
 0x1bc   :  { %779 = vadd.xlane.f32.xlu0 %v778_v15 }
 0x1bd   :  { %v771_v16 = vmul.f32 %v767_v14, %v767_v14 }
 0x1bf   :  { %v781_v17 = vsel %vm747_vm0, %v771_v16, 0.0 }
 0x1c0   :  { %782 = vadd.xlane.f32.xlu1 %v781_v17 }
 0x241   :  { %v774_v18 = vpop.xlane.xlu0 %773 }
 0x242   :  { %v784_v19 = vmul.f32 0.5, %v774_v18 }
 0x244   :  { %v788_v20 = vadd.f32 1e-05, %v784_v19 }
 0x245   :  { %v777_v21 = vpop.xlane.xlu1 %776 }
 0x246   :  { %1080 = vrsqrt.f32 %v788_v20  ;;  %v785_v22 = vmul.f32 0.5, %v777_v21 }
 0x248   :  { %v789_v23 = vadd.f32 1e-05, %v785_v22 }
 0x249   :  { %v780_v24 = vpop.xlane.xlu0 %779 }
 0x24a   :  { %1082 = vrsqrt.f32 %v789_v23  ;;  %v786_v25 = vmul.f32 0.5, %v780_v24 }
 0x24c   :  { %v790_v26 = vadd.f32 1e-05, %v786_v25 }
 0x24d   :  { %v783_v27 = vpop.xlane.xlu1 %782 }
 0x24e   :  { %1084 = vrsqrt.f32 %v790_v26  ;;  %v787_v28 = vmul.f32 0.5, %v783_v27 }
 0x250   :  { %v1081_v29 = vpop.eup %1080  ;;  %v791_v31 = vadd.f32 1e-05, %v787_v28 }
 0x251   :  { %v796_v32 = vmul.f32 %v1081_v29, %v764_v0 }
 0x252   :  { %1086 = vrsqrt.f32 %v791_v31 }
 0x253   :  { %v804_v33 = vadd.f32 %v800_v30, %v796_v32 }
 0x254   :  { %v1083_v34 = vpop.eup %1082 }
 0x255   :  { %v808_v36 = vmax.f32 %v804_v33, 0.0  ;;  %v797_v37 = vmul.f32 %v1083_v34, %v765_v4 }
 0x257   :  { %812 = vst.msk [vmem:[%s1357_s3] sm:$0xff] %vm747_vm0, %v808_v36  ;;  %v805_v38 = vadd.f32 %v801_v35, %v797_v37 }
 0x258   :  { %v1085_v39 = vpop.eup %1084 }
 0x259   :  { %v809_v41 = vmax.f32 %v805_v38, 0.0  ;;  %v798_v42 = vmul.f32 %v1085_v39, %v766_v9 }
 0x25b   :  { %813 = vst.msk [vmem:[%s1357_s3 + $0x8] sm:$0xff] %vm747_vm0, %v809_v41  ;;  %v806_v43 = vadd.f32 %v802_v40, %v798_v42 }
 0x25c   :  { %v1087_v44 = vpop.eup %1086 }
 0x25d   :  { %v810_v46 = vmax.f32 %v806_v43, 0.0  ;;  %v799_v47 = vmul.f32 %v1087_v44, %v767_v14 }
 0x25f   :  { %814 = vst.msk [vmem:[%s1357_s3 + $0x10] sm:$0xff] %vm747_vm0, %v810_v46  ;;  %v807_v48 = vadd.f32 %v803_v45, %v799_v47 }
 0x261   :  { %v811_v49 = vmax.f32 %v807_v48, 0.0 }
 0x263   :  { %815 = vst.msk [vmem:[%s1357_s3 + $0x18] sm:$0xff] %vm747_vm0, %v811_v49 }

</bundles_post_ra>
